<compile_context>
chip_gen: v7x
topology: tpu7x:2x2x1
jax: 0.10.0
libtpu: 0.0.40
codegen_flags: <defaults>
</compile_context>

<pallas_src>
import jax
import jax.numpy as jnp
from jax import lax
from jax.experimental import pallas as pl
from jax.experimental.pallas import tpu as pltpu

_LANES = 128


def _xcorr_kernel(z_ref, x_ref, o_ref):
    # Channels-last tiles (batch dim squeezed away by the BlockSpec):
    #   z_ref: (Hz, Wz, Ct)   template features (correlation taps)
    #   x_ref: (Hx, Wx, Ct)   search features
    #   o_ref: (Ho, Wo, Ct)   valid cross-correlation output
    Hz, Wz, Ct = z_ref.shape
    Ho, Wo, _ = o_ref.shape

    f32 = jnp.float32

    # Hoisted once per grid step: the f32 cast of the (tiny) template and the
    # unbroadcast (1, Ct) tap rows.  Done before the fori_loop so the sublane
    # extracts / casts are NOT re-issued for every output-row strip.
    z = z_ref[...].astype(f32)                                  # (Hz, Wz, Ct)
    z_taps = [[z[p, q][None, :] for q in range(Wz)] for p in range(Hz)]

    # Strip-mine output rows: R rows per iteration share every x-row slice.
    R = min(4, Ho)
    n_strips = -(-Ho // R)

    def strip_body(s, carry):
        # Clamp so the last (possibly partial) strip recomputes a few rows
        # instead of reading/writing out of bounds (overwrites are identical).
        i0 = jnp.minimum(s * R, Ho - R)

        # R accumulators stay in vregs: (Wo, Ct) f32 each.
        accs = [jnp.zeros((Wo, Ct), f32) for _ in range(R)]

        # Single pass over the R + Hz - 1 x rows this strip consumes.
        for lr in range(R + Hz - 1):                    # static, unrolled
            r = i0 + lr
            js = [j for j in range(R) if 0 <= lr - j < Hz]
            if not js:
                continue
            for q in range(Wz):                         # static, unrolled
                # Shifted window loaded directly from VMEM (shift rides the
                # vld slot), cast once, reused by every output row in the strip.
                xs = x_ref[r, pl.ds(q, Wo), :].astype(f32)   # (Wo, Ct)
                for j in js:
                    accs[j] = accs[j] + xs * z_taps[lr - j][q]

        # One lane-dense store per output row.
        for j in range(R):
            o_ref[i0 + j] = accs[j].astype(o_ref.dtype)
        return carry

    lax.fori_loop(0, n_strips, strip_body, 0,
                  unroll=True if n_strips <= 8 else 2)


def depthwise_xcorr_nhwc(z_nhwc, x_nhwc):
    """Per-batch, per-channel valid cross-correlation, channels-last (NHWC).

    Preferred entry point: no layout plumbing around the kernel.
    """
    B, Hz, Wz, C = z_nhwc.shape
    Bx, Hx, Wx, Cx = x_nhwc.shape
    assert B == Bx and C == Cx and Hx >= Hz and Wx >= Wz
    Ho, Wo = Hx - Hz + 1, Wx - Wz + 1

    # Pad C to a multiple of 128 so the lane dim is dense (unmasked vst) and the
    # channel tile is always (8,128)-legal.  Padded channels are zeros and are
    # sliced off below (depthwise op => they never mix with real channels).
    Cp = -(-C // _LANES) * _LANES
    if Cp != C:
        pad = ((0, 0), (0, 0), (0, 0), (0, Cp - C))
        z_nhwc = jnp.pad(z_nhwc, pad)
        x_nhwc = jnp.pad(x_nhwc, pad)

    Ct = _LANES          # 128 (not 256): more grid steps -> both v7x TCs busy
    n_ct = Cp // Ct

    out = pl.pallas_call(
        _xcorr_kernel,
        out_shape=jax.ShapeDtypeStruct((B, Ho, Wo, Cp), x_nhwc.dtype),
        grid=(n_ct, B),                       # c outer, b inner
        in_specs=[
            pl.BlockSpec((None, Hz, Wz, Ct), lambda c, b: (b, 0, 0, c)),
            pl.BlockSpec((None, Hx, Wx, Ct), lambda c, b: (b, 0, 0, c)),
        ],
        out_specs=pl.BlockSpec((None, Ho, Wo, Ct), lambda c, b: (b, 0, 0, c)),
        compiler_params=pltpu.CompilerParams(
            dimension_semantics=("parallel", "parallel")),
    )(z_nhwc, x_nhwc)

    return out[..., :C] if Cp != C else out


def depthwise_xcorr(z_f, x_f):
    """NCHW interface matching the PyTorch module convention.

    # TODO(synk): the NCHW<->NHWC transposes below are pure layout plumbing
    # (extra HBM passes around a few-microsecond kernel); callers that already
    # run channels-last should call depthwise_xcorr_nhwc directly / fuse the
    # transpose into the producer conv.
    """
    z_nhwc = jnp.transpose(z_f, (0, 2, 3, 1))     # (B, Hz, Wz, C)
    x_nhwc = jnp.transpose(x_f, (0, 2, 3, 1))     # (B, Hx, Wx, C)
    out_nhwc = depthwise_xcorr_nhwc(z_nhwc, x_nhwc)
    return jnp.transpose(out_nhwc, (0, 3, 1, 2))  # back to NCHW


class RPN:
    """JAX counterpart of the (abstract) PyTorch `RPN` module."""

    def __init__(self):
        # The PyTorch __init__ declares no parameters.
        pass

    def forward(self, z_f, x_f):
        return depthwise_xcorr(z_f, x_f)

    __call__ = forward


def _reference_xcorr(z_f, x_f):
    # Pure-JAX reference: depthwise valid correlation via grouped conv.
    B, C, Hz, Wz = z_f.shape
    outs = []
    for b in range(B):
        rhs = z_f[b][:, None, :, :]               # (C, 1, Hz, Wz), groups=C
        out = lax.conv_general_dilated(
            x_f[b:b + 1], rhs,
            window_strides=(1, 1), padding="VALID",
            dimension_numbers=("NCHW", "OIHW", "NCHW"),
            feature_group_count=C)
        outs.append(out)
    return jnp.concatenate(outs, axis=0)


if __name__ == "__main__":
    key = jax.random.PRNGKey(0)
    kz, kx = jax.random.split(key)

    # Small shapes consistent with a Siamese-RPN forward:
    #   template features z_f: (B, C, 4, 4), search features x_f: (B, C, 16, 16)
    B, C = 2, 4
    z_f = jax.random.normal(kz, (B, C, 4, 4), dtype=jnp.float32)
    x_f = jax.random.normal(kx, (B, C, 16, 16), dtype=jnp.float32)

    rpn = RPN()
    out = rpn(z_f, x_f)
    out = jax.block_until_ready(out)

    ref = _reference_xcorr(z_f, x_f)
    assert out.shape == (B, C, 13, 13), out.shape
    assert jnp.allclose(out, ref, atol=1e-4, rtol=1e-4), "mismatch vs reference"

    print("KERNEL_OK")
</pallas_src>

<mosaic_0001>
module attributes {stable_mosaic.version = 11 : i64} {
  func.func @_xcorr_kernel(%arg0: i32, %arg1: i32, %arg2: memref<1x4x4x128xf32, #tpu.memory_space<vmem>>, %arg3: memref<1x16x16x128xf32, #tpu.memory_space<vmem>>, %arg4: memref<1x13x13x128xf32, #tpu.memory_space<vmem>>) attributes {dimension_semantics = [#tpu.dimension_semantics<parallel>, #tpu.dimension_semantics<parallel>], iteration_bounds = array<i64: 1, 2>, scalar_prefetch = 0 : i64, scratch_operands = 0 : i64, tpu.core_type = #tpu.core_type<tc>, window_params = [{transform_indices = @transform_0, window_bounds = array<i64: 1, 4, 4, 128>}, {transform_indices = @transform_1, window_bounds = array<i64: 1, 16, 16, 128>}, {transform_indices = @transform_2, window_bounds = array<i64: 1, 13, 13, 128>}]} {
    %c0 = arith.constant 0 : index
    %c0_0 = arith.constant 0 : index
    %c0_1 = arith.constant 0 : index
    %c0_2 = arith.constant 0 : index
    %0 = vector.load %arg2[%c0, %c0_0, %c0_1, %c0_2] : memref<1x4x4x128xf32, #tpu.memory_space<vmem>>, vector<1x4x4x128xf32>
    %1 = vector.shape_cast %0 : vector<1x4x4x128xf32> to vector<4x4x128xf32>
    %2 = vector.extract_strided_slice %1 {offsets = [0, 0, 0], sizes = [1, 1, 128], strides = [1, 1, 1]} : vector<4x4x128xf32> to vector<1x1x128xf32>
    %3 = vector.shape_cast %2 : vector<1x1x128xf32> to vector<128xf32>
    %4 = vector.shape_cast %3 : vector<128xf32> to vector<1x128xf32>
    %5 = vector.extract_strided_slice %1 {offsets = [0, 1, 0], sizes = [1, 1, 128], strides = [1, 1, 1]} : vector<4x4x128xf32> to vector<1x1x128xf32>
    %6 = vector.shape_cast %5 : vector<1x1x128xf32> to vector<128xf32>
    %7 = vector.shape_cast %6 : vector<128xf32> to vector<1x128xf32>
    %8 = vector.extract_strided_slice %1 {offsets = [0, 2, 0], sizes = [1, 1, 128], strides = [1, 1, 1]} : vector<4x4x128xf32> to vector<1x1x128xf32>
    %9 = vector.shape_cast %8 : vector<1x1x128xf32> to vector<128xf32>
    %10 = vector.shape_cast %9 : vector<128xf32> to vector<1x128xf32>
    %11 = vector.extract_strided_slice %1 {offsets = [0, 3, 0], sizes = [1, 1, 128], strides = [1, 1, 1]} : vector<4x4x128xf32> to vector<1x1x128xf32>
    %12 = vector.shape_cast %11 : vector<1x1x128xf32> to vector<128xf32>
    %13 = vector.shape_cast %12 : vector<128xf32> to vector<1x128xf32>
    %14 = vector.extract_strided_slice %1 {offsets = [1, 0, 0], sizes = [1, 1, 128], strides = [1, 1, 1]} : vector<4x4x128xf32> to vector<1x1x128xf32>
    %15 = vector.shape_cast %14 : vector<1x1x128xf32> to vector<128xf32>
    %16 = vector.shape_cast %15 : vector<128xf32> to vector<1x128xf32>
    %17 = vector.extract_strided_slice %1 {offsets = [1, 1, 0], sizes = [1, 1, 128], strides = [1, 1, 1]} : vector<4x4x128xf32> to vector<1x1x128xf32>
    %18 = vector.shape_cast %17 : vector<1x1x128xf32> to vector<128xf32>
    %19 = vector.shape_cast %18 : vector<128xf32> to vector<1x128xf32>
    %20 = vector.extract_strided_slice %1 {offsets = [1, 2, 0], sizes = [1, 1, 128], strides = [1, 1, 1]} : vector<4x4x128xf32> to vector<1x1x128xf32>
    %21 = vector.shape_cast %20 : vector<1x1x128xf32> to vector<128xf32>
    %22 = vector.shape_cast %21 : vector<128xf32> to vector<1x128xf32>
    %23 = vector.extract_strided_slice %1 {offsets = [1, 3, 0], sizes = [1, 1, 128], strides = [1, 1, 1]} : vector<4x4x128xf32> to vector<1x1x128xf32>
    %24 = vector.shape_cast %23 : vector<1x1x128xf32> to vector<128xf32>
    %25 = vector.shape_cast %24 : vector<128xf32> to vector<1x128xf32>
    %26 = vector.extract_strided_slice %1 {offsets = [2, 0, 0], sizes = [1, 1, 128], strides = [1, 1, 1]} : vector<4x4x128xf32> to vector<1x1x128xf32>
    %27 = vector.shape_cast %26 : vector<1x1x128xf32> to vector<128xf32>
    %28 = vector.shape_cast %27 : vector<128xf32> to vector<1x128xf32>
    %29 = vector.extract_strided_slice %1 {offsets = [2, 1, 0], sizes = [1, 1, 128], strides = [1, 1, 1]} : vector<4x4x128xf32> to vector<1x1x128xf32>
    %30 = vector.shape_cast %29 : vector<1x1x128xf32> to vector<128xf32>
    %31 = vector.shape_cast %30 : vector<128xf32> to vector<1x128xf32>
    %32 = vector.extract_strided_slice %1 {offsets = [2, 2, 0], sizes = [1, 1, 128], strides = [1, 1, 1]} : vector<4x4x128xf32> to vector<1x1x128xf32>
    %33 = vector.shape_cast %32 : vector<1x1x128xf32> to vector<128xf32>
    %34 = vector.shape_cast %33 : vector<128xf32> to vector<1x128xf32>
    %35 = vector.extract_strided_slice %1 {offsets = [2, 3, 0], sizes = [1, 1, 128], strides = [1, 1, 1]} : vector<4x4x128xf32> to vector<1x1x128xf32>
    %36 = vector.shape_cast %35 : vector<1x1x128xf32> to vector<128xf32>
    %37 = vector.shape_cast %36 : vector<128xf32> to vector<1x128xf32>
    %38 = vector.extract_strided_slice %1 {offsets = [3, 0, 0], sizes = [1, 1, 128], strides = [1, 1, 1]} : vector<4x4x128xf32> to vector<1x1x128xf32>
    %39 = vector.shape_cast %38 : vector<1x1x128xf32> to vector<128xf32>
    %40 = vector.shape_cast %39 : vector<128xf32> to vector<1x128xf32>
    %41 = vector.extract_strided_slice %1 {offsets = [3, 1, 0], sizes = [1, 1, 128], strides = [1, 1, 1]} : vector<4x4x128xf32> to vector<1x1x128xf32>
    %42 = vector.shape_cast %41 : vector<1x1x128xf32> to vector<128xf32>
    %43 = vector.shape_cast %42 : vector<128xf32> to vector<1x128xf32>
    %44 = vector.extract_strided_slice %1 {offsets = [3, 2, 0], sizes = [1, 1, 128], strides = [1, 1, 1]} : vector<4x4x128xf32> to vector<1x1x128xf32>
    %45 = vector.shape_cast %44 : vector<1x1x128xf32> to vector<128xf32>
    %46 = vector.shape_cast %45 : vector<128xf32> to vector<1x128xf32>
    %47 = vector.extract_strided_slice %1 {offsets = [3, 3, 0], sizes = [1, 1, 128], strides = [1, 1, 1]} : vector<4x4x128xf32> to vector<1x1x128xf32>
    %48 = vector.shape_cast %47 : vector<1x1x128xf32> to vector<128xf32>
    %49 = vector.shape_cast %48 : vector<128xf32> to vector<1x128xf32>
    %c0_i32 = arith.constant 0 : i32
    %c4_i32 = arith.constant 4 : i32
    %50 = arith.muli %c0_i32, %c4_i32 : i32
    %c9_i32 = arith.constant 9 : i32
    %51 = arith.minsi %50, %c9_i32 : i32
    %cst = arith.constant 0.000000e+00 : f32
    %52 = vector.broadcast %cst : f32 to vector<13x128xf32>
    %cst_3 = arith.constant 0.000000e+00 : f32
    %53 = vector.broadcast %cst_3 : f32 to vector<13x128xf32>
    %cst_4 = arith.constant 0.000000e+00 : f32
    %54 = vector.broadcast %cst_4 : f32 to vector<13x128xf32>
    %cst_5 = arith.constant 0.000000e+00 : f32
    %55 = vector.broadcast %cst_5 : f32 to vector<13x128xf32>
    %c0_i32_6 = arith.constant 0 : i32
    %56 = arith.addi %51, %c0_i32_6 : i32
    %c0_7 = arith.constant 0 : index
    %57 = arith.index_cast %56 : i32 to index
    %c0_8 = arith.constant 0 : index
    %c0_9 = arith.constant 0 : index
    %58 = vector.load %arg3[%c0_7, %57, %c0_8, %c0_9] : memref<1x16x16x128xf32, #tpu.memory_space<vmem>>, vector<1x1x13x128xf32>
    %59 = vector.shape_cast %58 : vector<1x1x13x128xf32> to vector<13x128xf32>
    %60 = vector.broadcast %4 : vector<1x128xf32> to vector<13x128xf32>
    %61 = arith.mulf %59, %60 : vector<13x128xf32>
    %62 = arith.addf %52, %61 : vector<13x128xf32>
    %c0_10 = arith.constant 0 : index
    %63 = arith.index_cast %56 : i32 to index
    %c1 = arith.constant 1 : index
    %c0_11 = arith.constant 0 : index
    %64 = vector.load %arg3[%c0_10, %63, %c1, %c0_11] : memref<1x16x16x128xf32, #tpu.memory_space<vmem>>, vector<1x1x13x128xf32>
    %65 = vector.shape_cast %64 : vector<1x1x13x128xf32> to vector<13x128xf32>
    %66 = vector.broadcast %7 : vector<1x128xf32> to vector<13x128xf32>
    %67 = arith.mulf %65, %66 : vector<13x128xf32>
    %68 = arith.addf %62, %67 : vector<13x128xf32>
    %c0_12 = arith.constant 0 : index
    %69 = arith.index_cast %56 : i32 to index
    %c2 = arith.constant 2 : index
    %c0_13 = arith.constant 0 : index
    %70 = vector.load %arg3[%c0_12, %69, %c2, %c0_13] : memref<1x16x16x128xf32, #tpu.memory_space<vmem>>, vector<1x1x13x128xf32>
    %71 = vector.shape_cast %70 : vector<1x1x13x128xf32> to vector<13x128xf32>
    %72 = vector.broadcast %10 : vector<1x128xf32> to vector<13x128xf32>
    %73 = arith.mulf %71, %72 : vector<13x128xf32>
    %74 = arith.addf %68, %73 : vector<13x128xf32>
    %c0_14 = arith.constant 0 : index
    %75 = arith.index_cast %56 : i32 to index
    %c3 = arith.constant 3 : index
    %c0_15 = arith.constant 0 : index
    %76 = vector.load %arg3[%c0_14, %75, %c3, %c0_15] : memref<1x16x16x128xf32, #tpu.memory_space<vmem>>, vector<1x1x13x128xf32>
    %77 = vector.shape_cast %76 : vector<1x1x13x128xf32> to vector<13x128xf32>
    %78 = vector.broadcast %13 : vector<1x128xf32> to vector<13x128xf32>
    %79 = arith.mulf %77, %78 : vector<13x128xf32>
    %80 = arith.addf %74, %79 : vector<13x128xf32>
    %c1_i32 = arith.constant 1 : i32
    %81 = arith.addi %51, %c1_i32 : i32
    %c0_16 = arith.constant 0 : index
    %82 = arith.index_cast %81 : i32 to index
    %c0_17 = arith.constant 0 : index
    %c0_18 = arith.constant 0 : index
    %83 = vector.load %arg3[%c0_16, %82, %c0_17, %c0_18] : memref<1x16x16x128xf32, #tpu.memory_space<vmem>>, vector<1x1x13x128xf32>
    %84 = vector.shape_cast %83 : vector<1x1x13x128xf32> to vector<13x128xf32>
    %85 = vector.broadcast %16 : vector<1x128xf32> to vector<13x128xf32>
    %86 = arith.mulf %84, %85 : vector<13x128xf32>
    %87 = arith.addf %80, %86 : vector<13x128xf32>
    %88 = vector.broadcast %4 : vector<1x128xf32> to vector<13x128xf32>
    %89 = arith.mulf %84, %88 : vector<13x128xf32>
    %90 = arith.addf %53, %89 : vector<13x128xf32>
    %c0_19 = arith.constant 0 : index
    %91 = arith.index_cast %81 : i32 to index
    %c1_20 = arith.constant 1 : index
    %c0_21 = arith.constant 0 : index
    %92 = vector.load %arg3[%c0_19, %91, %c1_20, %c0_21] : memref<1x16x16x128xf32, #tpu.memory_space<vmem>>, vector<1x1x13x128xf32>
    %93 = vector.shape_cast %92 : vector<1x1x13x128xf32> to vector<13x128xf32>
    %94 = vector.broadcast %19 : vector<1x128xf32> to vector<13x128xf32>
    %95 = arith.mulf %93, %94 : vector<13x128xf32>
    %96 = arith.addf %87, %95 : vector<13x128xf32>
    %97 = vector.broadcast %7 : vector<1x128xf32> to vector<13x128xf32>
    %98 = arith.mulf %93, %97 : vector<13x128xf32>
    %99 = arith.addf %90, %98 : vector<13x128xf32>
    %c0_22 = arith.constant 0 : index
    %100 = arith.index_cast %81 : i32 to index
    %c2_23 = arith.constant 2 : index
    %c0_24 = arith.constant 0 : index
    %101 = vector.load %arg3[%c0_22, %100, %c2_23, %c0_24] : memref<1x16x16x128xf32, #tpu.memory_space<vmem>>, vector<1x1x13x128xf32>
    %102 = vector.shape_cast %101 : vector<1x1x13x128xf32> to vector<13x128xf32>
    %103 = vector.broadcast %22 : vector<1x128xf32> to vector<13x128xf32>
    %104 = arith.mulf %102, %103 : vector<13x128xf32>
    %105 = arith.addf %96, %104 : vector<13x128xf32>
    %106 = vector.broadcast %10 : vector<1x128xf32> to vector<13x128xf32>
    %107 = arith.mulf %102, %106 : vector<13x128xf32>
    %108 = arith.addf %99, %107 : vector<13x128xf32>
    %c0_25 = arith.constant 0 : index
    %109 = arith.index_cast %81 : i32 to index
    %c3_26 = arith.constant 3 : index
    %c0_27 = arith.constant 0 : index
    %110 = vector.load %arg3[%c0_25, %109, %c3_26, %c0_27] : memref<1x16x16x128xf32, #tpu.memory_space<vmem>>, vector<1x1x13x128xf32>
    %111 = vector.shape_cast %110 : vector<1x1x13x128xf32> to vector<13x128xf32>
    %112 = vector.broadcast %25 : vector<1x128xf32> to vector<13x128xf32>
    %113 = arith.mulf %111, %112 : vector<13x128xf32>
    %114 = arith.addf %105, %113 : vector<13x128xf32>
    %115 = vector.broadcast %13 : vector<1x128xf32> to vector<13x128xf32>
    %116 = arith.mulf %111, %115 : vector<13x128xf32>
    %117 = arith.addf %108, %116 : vector<13x128xf32>
    %c2_i32 = arith.constant 2 : i32
    %118 = arith.addi %51, %c2_i32 : i32
    %c0_28 = arith.constant 0 : index
    %119 = arith.index_cast %118 : i32 to index
    %c0_29 = arith.constant 0 : index
    %c0_30 = arith.constant 0 : index
    %120 = vector.load %arg3[%c0_28, %119, %c0_29, %c0_30] : memref<1x16x16x128xf32, #tpu.memory_space<vmem>>, vector<1x1x13x128xf32>
    %121 = vector.shape_cast %120 : vector<1x1x13x128xf32> to vector<13x128xf32>
    %122 = vector.broadcast %28 : vector<1x128xf32> to vector<13x128xf32>
    %123 = arith.mulf %121, %122 : vector<13x128xf32>
    %124 = arith.addf %114, %123 : vector<13x128xf32>
    %125 = vector.broadcast %16 : vector<1x128xf32> to vector<13x128xf32>
    %126 = arith.mulf %121, %125 : vector<13x128xf32>
    %127 = arith.addf %117, %126 : vector<13x128xf32>
    %128 = vector.broadcast %4 : vector<1x128xf32> to vector<13x128xf32>
    %129 = arith.mulf %121, %128 : vector<13x128xf32>
    %130 = arith.addf %54, %129 : vector<13x128xf32>
    %c0_31 = arith.constant 0 : index
    %131 = arith.index_cast %118 : i32 to index
    %c1_32 = arith.constant 1 : index
    %c0_33 = arith.constant 0 : index
    %132 = vector.load %arg3[%c0_31, %131, %c1_32, %c0_33] : memref<1x16x16x128xf32, #tpu.memory_space<vmem>>, vector<1x1x13x128xf32>
    %133 = vector.shape_cast %132 : vector<1x1x13x128xf32> to vector<13x128xf32>
    %134 = vector.broadcast %31 : vector<1x128xf32> to vector<13x128xf32>
    %135 = arith.mulf %133, %134 : vector<13x128xf32>
    %136 = arith.addf %124, %135 : vector<13x128xf32>
    %137 = vector.broadcast %19 : vector<1x128xf32> to vector<13x128xf32>
    %138 = arith.mulf %133, %137 : vector<13x128xf32>
    %139 = arith.addf %127, %138 : vector<13x128xf32>
    %140 = vector.broadcast %7 : vector<1x128xf32> to vector<13x128xf32>
    %141 = arith.mulf %133, %140 : vector<13x128xf32>
    %142 = arith.addf %130, %141 : vector<13x128xf32>
    %c0_34 = arith.constant 0 : index
    %143 = arith.index_cast %118 : i32 to index
    %c2_35 = arith.constant 2 : index
    %c0_36 = arith.constant 0 : index
    %144 = vector.load %arg3[%c0_34, %143, %c2_35, %c0_36] : memref<1x16x16x128xf32, #tpu.memory_space<vmem>>, vector<1x1x13x128xf32>
    %145 = vector.shape_cast %144 : vector<1x1x13x128xf32> to vector<13x128xf32>
    %146 = vector.broadcast %34 : vector<1x128xf32> to vector<13x128xf32>
    %147 = arith.mulf %145, %146 : vector<13x128xf32>
    %148 = arith.addf %136, %147 : vector<13x128xf32>
    %149 = vector.broadcast %22 : vector<1x128xf32> to vector<13x128xf32>
    %150 = arith.mulf %145, %149 : vector<13x128xf32>
    %151 = arith.addf %139, %150 : vector<13x128xf32>
    %152 = vector.broadcast %10 : vector<1x128xf32> to vector<13x128xf32>
    %153 = arith.mulf %145, %152 : vector<13x128xf32>
    %154 = arith.addf %142, %153 : vector<13x128xf32>
    %c0_37 = arith.constant 0 : index
    %155 = arith.index_cast %118 : i32 to index
    %c3_38 = arith.constant 3 : index
    %c0_39 = arith.constant 0 : index
    %156 = vector.load %arg3[%c0_37, %155, %c3_38, %c0_39] : memref<1x16x16x128xf32, #tpu.memory_space<vmem>>, vector<1x1x13x128xf32>
    %157 = vector.shape_cast %156 : vector<1x1x13x128xf32> to vector<13x128xf32>
    %158 = vector.broadcast %37 : vector<1x128xf32> to vector<13x128xf32>
    %159 = arith.mulf %157, %158 : vector<13x128xf32>
    %160 = arith.addf %148, %159 : vector<13x128xf32>
    %161 = vector.broadcast %25 : vector<1x128xf32> to vector<13x128xf32>
    %162 = arith.mulf %157, %161 : vector<13x128xf32>
    %163 = arith.addf %151, %162 : vector<13x128xf32>
    %164 = vector.broadcast %13 : vector<1x128xf32> to vector<13x128xf32>
    %165 = arith.mulf %157, %164 : vector<13x128xf32>
    %166 = arith.addf %154, %165 : vector<13x128xf32>
    %c3_i32 = arith.constant 3 : i32
    %167 = arith.addi %51, %c3_i32 : i32
    %c0_40 = arith.constant 0 : index
    %168 = arith.index_cast %167 : i32 to index
    %c0_41 = arith.constant 0 : index
    %c0_42 = arith.constant 0 : index
    %169 = vector.load %arg3[%c0_40, %168, %c0_41, %c0_42] : memref<1x16x16x128xf32, #tpu.memory_space<vmem>>, vector<1x1x13x128xf32>
    %170 = vector.shape_cast %169 : vector<1x1x13x128xf32> to vector<13x128xf32>
    %171 = vector.broadcast %40 : vector<1x128xf32> to vector<13x128xf32>
    %172 = arith.mulf %170, %171 : vector<13x128xf32>
    %173 = arith.addf %160, %172 : vector<13x128xf32>
    %174 = vector.broadcast %28 : vector<1x128xf32> to vector<13x128xf32>
    %175 = arith.mulf %170, %174 : vector<13x128xf32>
    %176 = arith.addf %163, %175 : vector<13x128xf32>
    %177 = vector.broadcast %16 : vector<1x128xf32> to vector<13x128xf32>
    %178 = arith.mulf %170, %177 : vector<13x128xf32>
    %179 = arith.addf %166, %178 : vector<13x128xf32>
    %180 = vector.broadcast %4 : vector<1x128xf32> to vector<13x128xf32>
    %181 = arith.mulf %170, %180 : vector<13x128xf32>
    %182 = arith.addf %55, %181 : vector<13x128xf32>
    %c0_43 = arith.constant 0 : index
    %183 = arith.index_cast %167 : i32 to index
    %c1_44 = arith.constant 1 : index
    %c0_45 = arith.constant 0 : index
    %184 = vector.load %arg3[%c0_43, %183, %c1_44, %c0_45] : memref<1x16x16x128xf32, #tpu.memory_space<vmem>>, vector<1x1x13x128xf32>
    %185 = vector.shape_cast %184 : vector<1x1x13x128xf32> to vector<13x128xf32>
    %186 = vector.broadcast %43 : vector<1x128xf32> to vector<13x128xf32>
    %187 = arith.mulf %185, %186 : vector<13x128xf32>
    %188 = arith.addf %173, %187 : vector<13x128xf32>
    %189 = vector.broadcast %31 : vector<1x128xf32> to vector<13x128xf32>
    %190 = arith.mulf %185, %189 : vector<13x128xf32>
    %191 = arith.addf %176, %190 : vector<13x128xf32>
    %192 = vector.broadcast %19 : vector<1x128xf32> to vector<13x128xf32>
    %193 = arith.mulf %185, %192 : vector<13x128xf32>
    %194 = arith.addf %179, %193 : vector<13x128xf32>
    %195 = vector.broadcast %7 : vector<1x128xf32> to vector<13x128xf32>
    %196 = arith.mulf %185, %195 : vector<13x128xf32>
    %197 = arith.addf %182, %196 : vector<13x128xf32>
    %c0_46 = arith.constant 0 : index
    %198 = arith.index_cast %167 : i32 to index
    %c2_47 = arith.constant 2 : index
    %c0_48 = arith.constant 0 : index
    %199 = vector.load %arg3[%c0_46, %198, %c2_47, %c0_48] : memref<1x16x16x128xf32, #tpu.memory_space<vmem>>, vector<1x1x13x128xf32>
    %200 = vector.shape_cast %199 : vector<1x1x13x128xf32> to vector<13x128xf32>
    %201 = vector.broadcast %46 : vector<1x128xf32> to vector<13x128xf32>
    %202 = arith.mulf %200, %201 : vector<13x128xf32>
    %203 = arith.addf %188, %202 : vector<13x128xf32>
    %204 = vector.broadcast %34 : vector<1x128xf32> to vector<13x128xf32>
    %205 = arith.mulf %200, %204 : vector<13x128xf32>
    %206 = arith.addf %191, %205 : vector<13x128xf32>
    %207 = vector.broadcast %22 : vector<1x128xf32> to vector<13x128xf32>
    %208 = arith.mulf %200, %207 : vector<13x128xf32>
    %209 = arith.addf %194, %208 : vector<13x128xf32>
    %210 = vector.broadcast %10 : vector<1x128xf32> to vector<13x128xf32>
    %211 = arith.mulf %200, %210 : vector<13x128xf32>
    %212 = arith.addf %197, %211 : vector<13x128xf32>
    %c0_49 = arith.constant 0 : index
    %213 = arith.index_cast %167 : i32 to index
    %c3_50 = arith.constant 3 : index
    %c0_51 = arith.constant 0 : index
    %214 = vector.load %arg3[%c0_49, %213, %c3_50, %c0_51] : memref<1x16x16x128xf32, #tpu.memory_space<vmem>>, vector<1x1x13x128xf32>
    %215 = vector.shape_cast %214 : vector<1x1x13x128xf32> to vector<13x128xf32>
    %216 = vector.broadcast %49 : vector<1x128xf32> to vector<13x128xf32>
    %217 = arith.mulf %215, %216 : vector<13x128xf32>
    %218 = arith.addf %203, %217 : vector<13x128xf32>
    %219 = vector.broadcast %37 : vector<1x128xf32> to vector<13x128xf32>
    %220 = arith.mulf %215, %219 : vector<13x128xf32>
    %221 = arith.addf %206, %220 : vector<13x128xf32>
    %222 = vector.broadcast %25 : vector<1x128xf32> to vector<13x128xf32>
    %223 = arith.mulf %215, %222 : vector<13x128xf32>
    %224 = arith.addf %209, %223 : vector<13x128xf32>
    %225 = vector.broadcast %13 : vector<1x128xf32> to vector<13x128xf32>
    %226 = arith.mulf %215, %225 : vector<13x128xf32>
    %227 = arith.addf %212, %226 : vector<13x128xf32>
    %c4_i32_52 = arith.constant 4 : i32
    %228 = arith.addi %51, %c4_i32_52 : i32
    %c0_53 = arith.constant 0 : index
    %229 = arith.index_cast %228 : i32 to index
    %c0_54 = arith.constant 0 : index
    %c0_55 = arith.constant 0 : index
    %230 = vector.load %arg3[%c0_53, %229, %c0_54, %c0_55] : memref<1x16x16x128xf32, #tpu.memory_space<vmem>>, vector<1x1x13x128xf32>
    %231 = vector.shape_cast %230 : vector<1x1x13x128xf32> to vector<13x128xf32>
    %232 = vector.broadcast %40 : vector<1x128xf32> to vector<13x128xf32>
    %233 = arith.mulf %231, %232 : vector<13x128xf32>
    %234 = arith.addf %221, %233 : vector<13x128xf32>
    %235 = vector.broadcast %28 : vector<1x128xf32> to vector<13x128xf32>
    %236 = arith.mulf %231, %235 : vector<13x128xf32>
    %237 = arith.addf %224, %236 : vector<13x128xf32>
    %238 = vector.broadcast %16 : vector<1x128xf32> to vector<13x128xf32>
    %239 = arith.mulf %231, %238 : vector<13x128xf32>
    %240 = arith.addf %227, %239 : vector<13x128xf32>
    %c0_56 = arith.constant 0 : index
    %241 = arith.index_cast %228 : i32 to index
    %c1_57 = arith.constant 1 : index
    %c0_58 = arith.constant 0 : index
    %242 = vector.load %arg3[%c0_56, %241, %c1_57, %c0_58] : memref<1x16x16x128xf32, #tpu.memory_space<vmem>>, vector<1x1x13x128xf32>
    %243 = vector.shape_cast %242 : vector<1x1x13x128xf32> to vector<13x128xf32>
    %244 = vector.broadcast %43 : vector<1x128xf32> to vector<13x128xf32>
    %245 = arith.mulf %243, %244 : vector<13x128xf32>
    %246 = arith.addf %234, %245 : vector<13x128xf32>
    %247 = vector.broadcast %31 : vector<1x128xf32> to vector<13x128xf32>
    %248 = arith.mulf %243, %247 : vector<13x128xf32>
    %249 = arith.addf %237, %248 : vector<13x128xf32>
    %250 = vector.broadcast %19 : vector<1x128xf32> to vector<13x128xf32>
    %251 = arith.mulf %243, %250 : vector<13x128xf32>
    %252 = arith.addf %240, %251 : vector<13x128xf32>
    %c0_59 = arith.constant 0 : index
    %253 = arith.index_cast %228 : i32 to index
    %c2_60 = arith.constant 2 : index
    %c0_61 = arith.constant 0 : index
    %254 = vector.load %arg3[%c0_59, %253, %c2_60, %c0_61] : memref<1x16x16x128xf32, #tpu.memory_space<vmem>>, vector<1x1x13x128xf32>
    %255 = vector.shape_cast %254 : vector<1x1x13x128xf32> to vector<13x128xf32>
    %256 = vector.broadcast %46 : vector<1x128xf32> to vector<13x128xf32>
    %257 = arith.mulf %255, %256 : vector<13x128xf32>
    %258 = arith.addf %246, %257 : vector<13x128xf32>
    %259 = vector.broadcast %34 : vector<1x128xf32> to vector<13x128xf32>
    %260 = arith.mulf %255, %259 : vector<13x128xf32>
    %261 = arith.addf %249, %260 : vector<13x128xf32>
    %262 = vector.broadcast %22 : vector<1x128xf32> to vector<13x128xf32>
    %263 = arith.mulf %255, %262 : vector<13x128xf32>
    %264 = arith.addf %252, %263 : vector<13x128xf32>
    %c0_62 = arith.constant 0 : index
    %265 = arith.index_cast %228 : i32 to index
    %c3_63 = arith.constant 3 : index
    %c0_64 = arith.constant 0 : index
    %266 = vector.load %arg3[%c0_62, %265, %c3_63, %c0_64] : memref<1x16x16x128xf32, #tpu.memory_space<vmem>>, vector<1x1x13x128xf32>
    %267 = vector.shape_cast %266 : vector<1x1x13x128xf32> to vector<13x128xf32>
    %268 = vector.broadcast %49 : vector<1x128xf32> to vector<13x128xf32>
    %269 = arith.mulf %267, %268 : vector<13x128xf32>
    %270 = arith.addf %258, %269 : vector<13x128xf32>
    %271 = vector.broadcast %37 : vector<1x128xf32> to vector<13x128xf32>
    %272 = arith.mulf %267, %271 : vector<13x128xf32>
    %273 = arith.addf %261, %272 : vector<13x128xf32>
    %274 = vector.broadcast %25 : vector<1x128xf32> to vector<13x128xf32>
    %275 = arith.mulf %267, %274 : vector<13x128xf32>
    %276 = arith.addf %264, %275 : vector<13x128xf32>
    %c5_i32 = arith.constant 5 : i32
    %277 = arith.addi %51, %c5_i32 : i32
    %c0_65 = arith.constant 0 : index
    %278 = arith.index_cast %277 : i32 to index
    %c0_66 = arith.constant 0 : index
    %c0_67 = arith.constant 0 : index
    %279 = vector.load %arg3[%c0_65, %278, %c0_66, %c0_67] : memref<1x16x16x128xf32, #tpu.memory_space<vmem>>, vector<1x1x13x128xf32>
    %280 = vector.shape_cast %279 : vector<1x1x13x128xf32> to vector<13x128xf32>
    %281 = vector.broadcast %40 : vector<1x128xf32> to vector<13x128xf32>
    %282 = arith.mulf %280, %281 : vector<13x128xf32>
    %283 = arith.addf %273, %282 : vector<13x128xf32>
    %284 = vector.broadcast %28 : vector<1x128xf32> to vector<13x128xf32>
    %285 = arith.mulf %280, %284 : vector<13x128xf32>
    %286 = arith.addf %276, %285 : vector<13x128xf32>
    %c0_68 = arith.constant 0 : index
    %287 = arith.index_cast %277 : i32 to index
    %c1_69 = arith.constant 1 : index
    %c0_70 = arith.constant 0 : index
    %288 = vector.load %arg3[%c0_68, %287, %c1_69, %c0_70] : memref<1x16x16x128xf32, #tpu.memory_space<vmem>>, vector<1x1x13x128xf32>
    %289 = vector.shape_cast %288 : vector<1x1x13x128xf32> to vector<13x128xf32>
    %290 = vector.broadcast %43 : vector<1x128xf32> to vector<13x128xf32>
    %291 = arith.mulf %289, %290 : vector<13x128xf32>
    %292 = arith.addf %283, %291 : vector<13x128xf32>
    %293 = vector.broadcast %31 : vector<1x128xf32> to vector<13x128xf32>
    %294 = arith.mulf %289, %293 : vector<13x128xf32>
    %295 = arith.addf %286, %294 : vector<13x128xf32>
    %c0_71 = arith.constant 0 : index
    %296 = arith.index_cast %277 : i32 to index
    %c2_72 = arith.constant 2 : index
    %c0_73 = arith.constant 0 : index
    %297 = vector.load %arg3[%c0_71, %296, %c2_72, %c0_73] : memref<1x16x16x128xf32, #tpu.memory_space<vmem>>, vector<1x1x13x128xf32>
    %298 = vector.shape_cast %297 : vector<1x1x13x128xf32> to vector<13x128xf32>
    %299 = vector.broadcast %46 : vector<1x128xf32> to vector<13x128xf32>
    %300 = arith.mulf %298, %299 : vector<13x128xf32>
    %301 = arith.addf %292, %300 : vector<13x128xf32>
    %302 = vector.broadcast %34 : vector<1x128xf32> to vector<13x128xf32>
    %303 = arith.mulf %298, %302 : vector<13x128xf32>
    %304 = arith.addf %295, %303 : vector<13x128xf32>
    %c0_74 = arith.constant 0 : index
    %305 = arith.index_cast %277 : i32 to index
    %c3_75 = arith.constant 3 : index
    %c0_76 = arith.constant 0 : index
    %306 = vector.load %arg3[%c0_74, %305, %c3_75, %c0_76] : memref<1x16x16x128xf32, #tpu.memory_space<vmem>>, vector<1x1x13x128xf32>
    %307 = vector.shape_cast %306 : vector<1x1x13x128xf32> to vector<13x128xf32>
    %308 = vector.broadcast %49 : vector<1x128xf32> to vector<13x128xf32>
    %309 = arith.mulf %307, %308 : vector<13x128xf32>
    %310 = arith.addf %301, %309 : vector<13x128xf32>
    %311 = vector.broadcast %37 : vector<1x128xf32> to vector<13x128xf32>
    %312 = arith.mulf %307, %311 : vector<13x128xf32>
    %313 = arith.addf %304, %312 : vector<13x128xf32>
    %c6_i32 = arith.constant 6 : i32
    %314 = arith.addi %51, %c6_i32 : i32
    %c0_77 = arith.constant 0 : index
    %315 = arith.index_cast %314 : i32 to index
    %c0_78 = arith.constant 0 : index
    %c0_79 = arith.constant 0 : index
    %316 = vector.load %arg3[%c0_77, %315, %c0_78, %c0_79] : memref<1x16x16x128xf32, #tpu.memory_space<vmem>>, vector<1x1x13x128xf32>
    %317 = vector.shape_cast %316 : vector<1x1x13x128xf32> to vector<13x128xf32>
    %318 = vector.broadcast %40 : vector<1x128xf32> to vector<13x128xf32>
    %319 = arith.mulf %317, %318 : vector<13x128xf32>
    %320 = arith.addf %313, %319 : vector<13x128xf32>
    %c0_80 = arith.constant 0 : index
    %321 = arith.index_cast %314 : i32 to index
    %c1_81 = arith.constant 1 : index
    %c0_82 = arith.constant 0 : index
    %322 = vector.load %arg3[%c0_80, %321, %c1_81, %c0_82] : memref<1x16x16x128xf32, #tpu.memory_space<vmem>>, vector<1x1x13x128xf32>
    %323 = vector.shape_cast %322 : vector<1x1x13x128xf32> to vector<13x128xf32>
    %324 = vector.broadcast %43 : vector<1x128xf32> to vector<13x128xf32>
    %325 = arith.mulf %323, %324 : vector<13x128xf32>
    %326 = arith.addf %320, %325 : vector<13x128xf32>
    %c0_83 = arith.constant 0 : index
    %327 = arith.index_cast %314 : i32 to index
    %c2_84 = arith.constant 2 : index
    %c0_85 = arith.constant 0 : index
    %328 = vector.load %arg3[%c0_83, %327, %c2_84, %c0_85] : memref<1x16x16x128xf32, #tpu.memory_space<vmem>>, vector<1x1x13x128xf32>
    %329 = vector.shape_cast %328 : vector<1x1x13x128xf32> to vector<13x128xf32>
    %330 = vector.broadcast %46 : vector<1x128xf32> to vector<13x128xf32>
    %331 = arith.mulf %329, %330 : vector<13x128xf32>
    %332 = arith.addf %326, %331 : vector<13x128xf32>
    %c0_86 = arith.constant 0 : index
    %333 = arith.index_cast %314 : i32 to index
    %c3_87 = arith.constant 3 : index
    %c0_88 = arith.constant 0 : index
    %334 = vector.load %arg3[%c0_86, %333, %c3_87, %c0_88] : memref<1x16x16x128xf32, #tpu.memory_space<vmem>>, vector<1x1x13x128xf32>
    %335 = vector.shape_cast %334 : vector<1x1x13x128xf32> to vector<13x128xf32>
    %336 = vector.broadcast %49 : vector<1x128xf32> to vector<13x128xf32>
    %337 = arith.mulf %335, %336 : vector<13x128xf32>
    %338 = arith.addf %332, %337 : vector<13x128xf32>
    %c0_i32_89 = arith.constant 0 : i32
    %339 = arith.addi %51, %c0_i32_89 : i32
    %c0_90 = arith.constant 0 : index
    %340 = arith.index_cast %339 : i32 to index
    %c0_91 = arith.constant 0 : index
    %c0_92 = arith.constant 0 : index
    %341 = vector.load %arg4[%c0_90, %340, %c0_91, %c0_92] : memref<1x13x13x128xf32, #tpu.memory_space<vmem>>, vector<1x1x13x128xf32>
    %342 = vector.shape_cast %341 : vector<1x1x13x128xf32> to vector<13x128xf32>
    %343 = vector.shape_cast %218 : vector<13x128xf32> to vector<1x1x13x128xf32>
    tpu.vector_store %arg4[%c0_90, %340, %c0_91, %c0_92], %343 {strides = array<i32>} : memref<1x13x13x128xf32, #tpu.memory_space<vmem>>, vector<1x1x13x128xf32>,
    %c1_i32_93 = arith.constant 1 : i32
    %344 = arith.addi %51, %c1_i32_93 : i32
    %c0_94 = arith.constant 0 : index
    %345 = arith.index_cast %344 : i32 to index
    %c0_95 = arith.constant 0 : index
    %c0_96 = arith.constant 0 : index
    %346 = vector.load %arg4[%c0_94, %345, %c0_95, %c0_96] : memref<1x13x13x128xf32, #tpu.memory_space<vmem>>, vector<1x1x13x128xf32>
    %347 = vector.shape_cast %346 : vector<1x1x13x128xf32> to vector<13x128xf32>
    %348 = vector.shape_cast %270 : vector<13x128xf32> to vector<1x1x13x128xf32>
    tpu.vector_store %arg4[%c0_94, %345, %c0_95, %c0_96], %348 {strides = array<i32>} : memref<1x13x13x128xf32, #tpu.memory_space<vmem>>, vector<1x1x13x128xf32>,
    %c2_i32_97 = arith.constant 2 : i32
    %349 = arith.addi %51, %c2_i32_97 : i32
    %c0_98 = arith.constant 0 : index
    %350 = arith.index_cast %349 : i32 to index
    %c0_99 = arith.constant 0 : index
    %c0_100 = arith.constant 0 : index
    %351 = vector.load %arg4[%c0_98, %350, %c0_99, %c0_100] : memref<1x13x13x128xf32, #tpu.memory_space<vmem>>, vector<1x1x13x128xf32>
    %352 = vector.shape_cast %351 : vector<1x1x13x128xf32> to vector<13x128xf32>
    %353 = vector.shape_cast %310 : vector<13x128xf32> to vector<1x1x13x128xf32>
    tpu.vector_store %arg4[%c0_98, %350, %c0_99, %c0_100], %353 {strides = array<i32>} : memref<1x13x13x128xf32, #tpu.memory_space<vmem>>, vector<1x1x13x128xf32>,
    %c3_i32_101 = arith.constant 3 : i32
    %354 = arith.addi %51, %c3_i32_101 : i32
    %c0_102 = arith.constant 0 : index
    %355 = arith.index_cast %354 : i32 to index
    %c0_103 = arith.constant 0 : index
    %c0_104 = arith.constant 0 : index
    %356 = vector.load %arg4[%c0_102, %355, %c0_103, %c0_104] : memref<1x13x13x128xf32, #tpu.memory_space<vmem>>, vector<1x1x13x128xf32>
    %357 = vector.shape_cast %356 : vector<1x1x13x128xf32> to vector<13x128xf32>
    %358 = vector.shape_cast %338 : vector<13x128xf32> to vector<1x1x13x128xf32>
    tpu.vector_store %arg4[%c0_102, %355, %c0_103, %c0_104], %358 {strides = array<i32>} : memref<1x13x13x128xf32, #tpu.memory_space<vmem>>, vector<1x1x13x128xf32>,
    %c1_i32_105 = arith.constant 1 : i32
    %c4_i32_106 = arith.constant 4 : i32
    %359 = arith.muli %c1_i32_105, %c4_i32_106 : i32
    %c9_i32_107 = arith.constant 9 : i32
    %360 = arith.minsi %359, %c9_i32_107 : i32
    %cst_108 = arith.constant 0.000000e+00 : f32
    %361 = vector.broadcast %cst_108 : f32 to vector<13x128xf32>
    %cst_109 = arith.constant 0.000000e+00 : f32
    %362 = vector.broadcast %cst_109 : f32 to vector<13x128xf32>
    %cst_110 = arith.constant 0.000000e+00 : f32
    %363 = vector.broadcast %cst_110 : f32 to vector<13x128xf32>
    %cst_111 = arith.constant 0.000000e+00 : f32
    %364 = vector.broadcast %cst_111 : f32 to vector<13x128xf32>
    %c0_i32_112 = arith.constant 0 : i32
    %365 = arith.addi %360, %c0_i32_112 : i32
    %c0_113 = arith.constant 0 : index
    %366 = arith.index_cast %365 : i32 to index
    %c0_114 = arith.constant 0 : index
    %c0_115 = arith.constant 0 : index
    %367 = vector.load %arg3[%c0_113, %366, %c0_114, %c0_115] : memref<1x16x16x128xf32, #tpu.memory_space<vmem>>, vector<1x1x13x128xf32>
    %368 = vector.shape_cast %367 : vector<1x1x13x128xf32> to vector<13x128xf32>
    %369 = vector.broadcast %4 : vector<1x128xf32> to vector<13x128xf32>
    %370 = arith.mulf %368, %369 : vector<13x128xf32>
    %371 = arith.addf %361, %370 : vector<13x128xf32>
    %c0_116 = arith.constant 0 : index
    %372 = arith.index_cast %365 : i32 to index
    %c1_117 = arith.constant 1 : index
    %c0_118 = arith.constant 0 : index
    %373 = vector.load %arg3[%c0_116, %372, %c1_117, %c0_118] : memref<1x16x16x128xf32, #tpu.memory_space<vmem>>, vector<1x1x13x128xf32>
    %374 = vector.shape_cast %373 : vector<1x1x13x128xf32> to vector<13x128xf32>
    %375 = vector.broadcast %7 : vector<1x128xf32> to vector<13x128xf32>
    %376 = arith.mulf %374, %375 : vector<13x128xf32>
    %377 = arith.addf %371, %376 : vector<13x128xf32>
    %c0_119 = arith.constant 0 : index
    %378 = arith.index_cast %365 : i32 to index
    %c2_120 = arith.constant 2 : index
    %c0_121 = arith.constant 0 : index
    %379 = vector.load %arg3[%c0_119, %378, %c2_120, %c0_121] : memref<1x16x16x128xf32, #tpu.memory_space<vmem>>, vector<1x1x13x128xf32>
    %380 = vector.shape_cast %379 : vector<1x1x13x128xf32> to vector<13x128xf32>
    %381 = vector.broadcast %10 : vector<1x128xf32> to vector<13x128xf32>
    %382 = arith.mulf %380, %381 : vector<13x128xf32>
    %383 = arith.addf %377, %382 : vector<13x128xf32>
    %c0_122 = arith.constant 0 : index
    %384 = arith.index_cast %365 : i32 to index
    %c3_123 = arith.constant 3 : index
    %c0_124 = arith.constant 0 : index
    %385 = vector.load %arg3[%c0_122, %384, %c3_123, %c0_124] : memref<1x16x16x128xf32, #tpu.memory_space<vmem>>, vector<1x1x13x128xf32>
    %386 = vector.shape_cast %385 : vector<1x1x13x128xf32> to vector<13x128xf32>
    %387 = vector.broadcast %13 : vector<1x128xf32> to vector<13x128xf32>
    %388 = arith.mulf %386, %387 : vector<13x128xf32>
    %389 = arith.addf %383, %388 : vector<13x128xf32>
    %c1_i32_125 = arith.constant 1 : i32
    %390 = arith.addi %360, %c1_i32_125 : i32
    %c0_126 = arith.constant 0 : index
    %391 = arith.index_cast %390 : i32 to index
    %c0_127 = arith.constant 0 : index
    %c0_128 = arith.constant 0 : index
    %392 = vector.load %arg3[%c0_126, %391, %c0_127, %c0_128] : memref<1x16x16x128xf32, #tpu.memory_space<vmem>>, vector<1x1x13x128xf32>
    %393 = vector.shape_cast %392 : vector<1x1x13x128xf32> to vector<13x128xf32>
    %394 = vector.broadcast %16 : vector<1x128xf32> to vector<13x128xf32>
    %395 = arith.mulf %393, %394 : vector<13x128xf32>
    %396 = arith.addf %389, %395 : vector<13x128xf32>
    %397 = vector.broadcast %4 : vector<1x128xf32> to vector<13x128xf32>
    %398 = arith.mulf %393, %397 : vector<13x128xf32>
    %399 = arith.addf %362, %398 : vector<13x128xf32>
    %c0_129 = arith.constant 0 : index
    %400 = arith.index_cast %390 : i32 to index
    %c1_130 = arith.constant 1 : index
    %c0_131 = arith.constant 0 : index
    %401 = vector.load %arg3[%c0_129, %400, %c1_130, %c0_131] : memref<1x16x16x128xf32, #tpu.memory_space<vmem>>, vector<1x1x13x128xf32>
    %402 = vector.shape_cast %401 : vector<1x1x13x128xf32> to vector<13x128xf32>
    %403 = vector.broadcast %19 : vector<1x128xf32> to vector<13x128xf32>
    %404 = arith.mulf %402, %403 : vector<13x128xf32>
    %405 = arith.addf %396, %404 : vector<13x128xf32>
    %406 = vector.broadcast %7 : vector<1x128xf32> to vector<13x128xf32>
    %407 = arith.mulf %402, %406 : vector<13x128xf32>
    %408 = arith.addf %399, %407 : vector<13x128xf32>
    %c0_132 = arith.constant 0 : index
    %409 = arith.index_cast %390 : i32 to index
    %c2_133 = arith.constant 2 : index
    %c0_134 = arith.constant 0 : index
    %410 = vector.load %arg3[%c0_132, %409, %c2_133, %c0_134] : memref<1x16x16x128xf32, #tpu.memory_space<vmem>>, vector<1x1x13x128xf32>
    %411 = vector.shape_cast %410 : vector<1x1x13x128xf32> to vector<13x128xf32>
    %412 = vector.broadcast %22 : vector<1x128xf32> to vector<13x128xf32>
    %413 = arith.mulf %411, %412 : vector<13x128xf32>
    %414 = arith.addf %405, %413 : vector<13x128xf32>
    %415 = vector.broadcast %10 : vector<1x128xf32> to vector<13x128xf32>
    %416 = arith.mulf %411, %415 : vector<13x128xf32>
    %417 = arith.addf %408, %416 : vector<13x128xf32>
    %c0_135 = arith.constant 0 : index
    %418 = arith.index_cast %390 : i32 to index
    %c3_136 = arith.constant 3 : index
    %c0_137 = arith.constant 0 : index
    %419 = vector.load %arg3[%c0_135, %418, %c3_136, %c0_137] : memref<1x16x16x128xf32, #tpu.memory_space<vmem>>, vector<1x1x13x128xf32>
    %420 = vector.shape_cast %419 : vector<1x1x13x128xf32> to vector<13x128xf32>
    %421 = vector.broadcast %25 : vector<1x128xf32> to vector<13x128xf32>
    %422 = arith.mulf %420, %421 : vector<13x128xf32>
    %423 = arith.addf %414, %422 : vector<13x128xf32>
    %424 = vector.broadcast %13 : vector<1x128xf32> to vector<13x128xf32>
    %425 = arith.mulf %420, %424 : vector<13x128xf32>
    %426 = arith.addf %417, %425 : vector<13x128xf32>
    %c2_i32_138 = arith.constant 2 : i32
    %427 = arith.addi %360, %c2_i32_138 : i32
    %c0_139 = arith.constant 0 : index
    %428 = arith.index_cast %427 : i32 to index
    %c0_140 = arith.constant 0 : index
    %c0_141 = arith.constant 0 : index
    %429 = vector.load %arg3[%c0_139, %428, %c0_140, %c0_141] : memref<1x16x16x128xf32, #tpu.memory_space<vmem>>, vector<1x1x13x128xf32>
    %430 = vector.shape_cast %429 : vector<1x1x13x128xf32> to vector<13x128xf32>
    %431 = vector.broadcast %28 : vector<1x128xf32> to vector<13x128xf32>
    %432 = arith.mulf %430, %431 : vector<13x128xf32>
    %433 = arith.addf %423, %432 : vector<13x128xf32>
    %434 = vector.broadcast %16 : vector<1x128xf32> to vector<13x128xf32>
    %435 = arith.mulf %430, %434 : vector<13x128xf32>
    %436 = arith.addf %426, %435 : vector<13x128xf32>
    %437 = vector.broadcast %4 : vector<1x128xf32> to vector<13x128xf32>
    %438 = arith.mulf %430, %437 : vector<13x128xf32>
    %439 = arith.addf %363, %438 : vector<13x128xf32>
    %c0_142 = arith.constant 0 : index
    %440 = arith.index_cast %427 : i32 to index
    %c1_143 = arith.constant 1 : index
    %c0_144 = arith.constant 0 : index
    %441 = vector.load %arg3[%c0_142, %440, %c1_143, %c0_144] : memref<1x16x16x128xf32, #tpu.memory_space<vmem>>, vector<1x1x13x128xf32>
    %442 = vector.shape_cast %441 : vector<1x1x13x128xf32> to vector<13x128xf32>
    %443 = vector.broadcast %31 : vector<1x128xf32> to vector<13x128xf32>
    %444 = arith.mulf %442, %443 : vector<13x128xf32>
    %445 = arith.addf %433, %444 : vector<13x128xf32>
    %446 = vector.broadcast %19 : vector<1x128xf32> to vector<13x128xf32>
    %447 = arith.mulf %442, %446 : vector<13x128xf32>
    %448 = arith.addf %436, %447 : vector<13x128xf32>
    %449 = vector.broadcast %7 : vector<1x128xf32> to vector<13x128xf32>
    %450 = arith.mulf %442, %449 : vector<13x128xf32>
    %451 = arith.addf %439, %450 : vector<13x128xf32>
    %c0_145 = arith.constant 0 : index
    %452 = arith.index_cast %427 : i32 to index
    %c2_146 = arith.constant 2 : index
    %c0_147 = arith.constant 0 : index
    %453 = vector.load %arg3[%c0_145, %452, %c2_146, %c0_147] : memref<1x16x16x128xf32, #tpu.memory_space<vmem>>, vector<1x1x13x128xf32>
    %454 = vector.shape_cast %453 : vector<1x1x13x128xf32> to vector<13x128xf32>
    %455 = vector.broadcast %34 : vector<1x128xf32> to vector<13x128xf32>
    %456 = arith.mulf %454, %455 : vector<13x128xf32>
    %457 = arith.addf %445, %456 : vector<13x128xf32>
    %458 = vector.broadcast %22 : vector<1x128xf32> to vector<13x128xf32>
    %459 = arith.mulf %454, %458 : vector<13x128xf32>
    %460 = arith.addf %448, %459 : vector<13x128xf32>
    %461 = vector.broadcast %10 : vector<1x128xf32> to vector<13x128xf32>
    %462 = arith.mulf %454, %461 : vector<13x128xf32>
    %463 = arith.addf %451, %462 : vector<13x128xf32>
    %c0_148 = arith.constant 0 : index
    %464 = arith.index_cast %427 : i32 to index
    %c3_149 = arith.constant 3 : index
    %c0_150 = arith.constant 0 : index
    %465 = vector.load %arg3[%c0_148, %464, %c3_149, %c0_150] : memref<1x16x16x128xf32, #tpu.memory_space<vmem>>, vector<1x1x13x128xf32>
    %466 = vector.shape_cast %465 : vector<1x1x13x128xf32> to vector<13x128xf32>
    %467 = vector.broadcast %37 : vector<1x128xf32> to vector<13x128xf32>
    %468 = arith.mulf %466, %467 : vector<13x128xf32>
    %469 = arith.addf %457, %468 : vector<13x128xf32>
    %470 = vector.broadcast %25 : vector<1x128xf32> to vector<13x128xf32>
    %471 = arith.mulf %466, %470 : vector<13x128xf32>
    %472 = arith.addf %460, %471 : vector<13x128xf32>
    %473 = vector.broadcast %13 : vector<1x128xf32> to vector<13x128xf32>
    %474 = arith.mulf %466, %473 : vector<13x128xf32>
    %475 = arith.addf %463, %474 : vector<13x128xf32>
    %c3_i32_151 = arith.constant 3 : i32
    %476 = arith.addi %360, %c3_i32_151 : i32
    %c0_152 = arith.constant 0 : index
    %477 = arith.index_cast %476 : i32 to index
    %c0_153 = arith.constant 0 : index
    %c0_154 = arith.constant 0 : index
    %478 = vector.load %arg3[%c0_152, %477, %c0_153, %c0_154] : memref<1x16x16x128xf32, #tpu.memory_space<vmem>>, vector<1x1x13x128xf32>
    %479 = vector.shape_cast %478 : vector<1x1x13x128xf32> to vector<13x128xf32>
    %480 = vector.broadcast %40 : vector<1x128xf32> to vector<13x128xf32>
    %481 = arith.mulf %479, %480 : vector<13x128xf32>
    %482 = arith.addf %469, %481 : vector<13x128xf32>
    %483 = vector.broadcast %28 : vector<1x128xf32> to vector<13x128xf32>
    %484 = arith.mulf %479, %483 : vector<13x128xf32>
    %485 = arith.addf %472, %484 : vector<13x128xf32>
    %486 = vector.broadcast %16 : vector<1x128xf32> to vector<13x128xf32>
    %487 = arith.mulf %479, %486 : vector<13x128xf32>
    %488 = arith.addf %475, %487 : vector<13x128xf32>
    %489 = vector.broadcast %4 : vector<1x128xf32> to vector<13x128xf32>
    %490 = arith.mulf %479, %489 : vector<13x128xf32>
    %491 = arith.addf %364, %490 : vector<13x128xf32>
    %c0_155 = arith.constant 0 : index
    %492 = arith.index_cast %476 : i32 to index
    %c1_156 = arith.constant 1 : index
    %c0_157 = arith.constant 0 : index
    %493 = vector.load %arg3[%c0_155, %492, %c1_156, %c0_157] : memref<1x16x16x128xf32, #tpu.memory_space<vmem>>, vector<1x1x13x128xf32>
    %494 = vector.shape_cast %493 : vector<1x1x13x128xf32> to vector<13x128xf32>
    %495 = vector.broadcast %43 : vector<1x128xf32> to vector<13x128xf32>
    %496 = arith.mulf %494, %495 : vector<13x128xf32>
    %497 = arith.addf %482, %496 : vector<13x128xf32>
    %498 = vector.broadcast %31 : vector<1x128xf32> to vector<13x128xf32>
    %499 = arith.mulf %494, %498 : vector<13x128xf32>
    %500 = arith.addf %485, %499 : vector<13x128xf32>
    %501 = vector.broadcast %19 : vector<1x128xf32> to vector<13x128xf32>
    %502 = arith.mulf %494, %501 : vector<13x128xf32>
    %503 = arith.addf %488, %502 : vector<13x128xf32>
    %504 = vector.broadcast %7 : vector<1x128xf32> to vector<13x128xf32>
    %505 = arith.mulf %494, %504 : vector<13x128xf32>
    %506 = arith.addf %491, %505 : vector<13x128xf32>
    %c0_158 = arith.constant 0 : index
    %507 = arith.index_cast %476 : i32 to index
    %c2_159 = arith.constant 2 : index
    %c0_160 = arith.constant 0 : index
    %508 = vector.load %arg3[%c0_158, %507, %c2_159, %c0_160] : memref<1x16x16x128xf32, #tpu.memory_space<vmem>>, vector<1x1x13x128xf32>
    %509 = vector.shape_cast %508 : vector<1x1x13x128xf32> to vector<13x128xf32>
    %510 = vector.broadcast %46 : vector<1x128xf32> to vector<13x128xf32>
    %511 = arith.mulf %509, %510 : vector<13x128xf32>
    %512 = arith.addf %497, %511 : vector<13x128xf32>
    %513 = vector.broadcast %34 : vector<1x128xf32> to vector<13x128xf32>
    %514 = arith.mulf %509, %513 : vector<13x128xf32>
    %515 = arith.addf %500, %514 : vector<13x128xf32>
    %516 = vector.broadcast %22 : vector<1x128xf32> to vector<13x128xf32>
    %517 = arith.mulf %509, %516 : vector<13x128xf32>
    %518 = arith.addf %503, %517 : vector<13x128xf32>
    %519 = vector.broadcast %10 : vector<1x128xf32> to vector<13x128xf32>
    %520 = arith.mulf %509, %519 : vector<13x128xf32>
    %521 = arith.addf %506, %520 : vector<13x128xf32>
    %c0_161 = arith.constant 0 : index
    %522 = arith.index_cast %476 : i32 to index
    %c3_162 = arith.constant 3 : index
    %c0_163 = arith.constant 0 : index
    %523 = vector.load %arg3[%c0_161, %522, %c3_162, %c0_163] : memref<1x16x16x128xf32, #tpu.memory_space<vmem>>, vector<1x1x13x128xf32>
    %524 = vector.shape_cast %523 : vector<1x1x13x128xf32> to vector<13x128xf32>
    %525 = vector.broadcast %49 : vector<1x128xf32> to vector<13x128xf32>
    %526 = arith.mulf %524, %525 : vector<13x128xf32>
    %527 = arith.addf %512, %526 : vector<13x128xf32>
    %528 = vector.broadcast %37 : vector<1x128xf32> to vector<13x128xf32>
    %529 = arith.mulf %524, %528 : vector<13x128xf32>
    %530 = arith.addf %515, %529 : vector<13x128xf32>
    %531 = vector.broadcast %25 : vector<1x128xf32> to vector<13x128xf32>
    %532 = arith.mulf %524, %531 : vector<13x128xf32>
    %533 = arith.addf %518, %532 : vector<13x128xf32>
    %534 = vector.broadcast %13 : vector<1x128xf32> to vector<13x128xf32>
    %535 = arith.mulf %524, %534 : vector<13x128xf32>
    %536 = arith.addf %521, %535 : vector<13x128xf32>
    %c4_i32_164 = arith.constant 4 : i32
    %537 = arith.addi %360, %c4_i32_164 : i32
    %c0_165 = arith.constant 0 : index
    %538 = arith.index_cast %537 : i32 to index
    %c0_166 = arith.constant 0 : index
    %c0_167 = arith.constant 0 : index
    %539 = vector.load %arg3[%c0_165, %538, %c0_166, %c0_167] : memref<1x16x16x128xf32, #tpu.memory_space<vmem>>, vector<1x1x13x128xf32>
    %540 = vector.shape_cast %539 : vector<1x1x13x128xf32> to vector<13x128xf32>
    %541 = vector.broadcast %40 : vector<1x128xf32> to vector<13x128xf32>
    %542 = arith.mulf %540, %541 : vector<13x128xf32>
    %543 = arith.addf %530, %542 : vector<13x128xf32>
    %544 = vector.broadcast %28 : vector<1x128xf32> to vector<13x128xf32>
    %545 = arith.mulf %540, %544 : vector<13x128xf32>
    %546 = arith.addf %533, %545 : vector<13x128xf32>
    %547 = vector.broadcast %16 : vector<1x128xf32> to vector<13x128xf32>
    %548 = arith.mulf %540, %547 : vector<13x128xf32>
    %549 = arith.addf %536, %548 : vector<13x128xf32>
    %c0_168 = arith.constant 0 : index
    %550 = arith.index_cast %537 : i32 to index
    %c1_169 = arith.constant 1 : index
    %c0_170 = arith.constant 0 : index
    %551 = vector.load %arg3[%c0_168, %550, %c1_169, %c0_170] : memref<1x16x16x128xf32, #tpu.memory_space<vmem>>, vector<1x1x13x128xf32>
    %552 = vector.shape_cast %551 : vector<1x1x13x128xf32> to vector<13x128xf32>
    %553 = vector.broadcast %43 : vector<1x128xf32> to vector<13x128xf32>
    %554 = arith.mulf %552, %553 : vector<13x128xf32>
    %555 = arith.addf %543, %554 : vector<13x128xf32>
    %556 = vector.broadcast %31 : vector<1x128xf32> to vector<13x128xf32>
    %557 = arith.mulf %552, %556 : vector<13x128xf32>
    %558 = arith.addf %546, %557 : vector<13x128xf32>
    %559 = vector.broadcast %19 : vector<1x128xf32> to vector<13x128xf32>
    %560 = arith.mulf %552, %559 : vector<13x128xf32>
    %561 = arith.addf %549, %560 : vector<13x128xf32>
    %c0_171 = arith.constant 0 : index
    %562 = arith.index_cast %537 : i32 to index
    %c2_172 = arith.constant 2 : index
    %c0_173 = arith.constant 0 : index
    %563 = vector.load %arg3[%c0_171, %562, %c2_172, %c0_173] : memref<1x16x16x128xf32, #tpu.memory_space<vmem>>, vector<1x1x13x128xf32>
    %564 = vector.shape_cast %563 : vector<1x1x13x128xf32> to vector<13x128xf32>
    %565 = vector.broadcast %46 : vector<1x128xf32> to vector<13x128xf32>
    %566 = arith.mulf %564, %565 : vector<13x128xf32>
    %567 = arith.addf %555, %566 : vector<13x128xf32>
    %568 = vector.broadcast %34 : vector<1x128xf32> to vector<13x128xf32>
    %569 = arith.mulf %564, %568 : vector<13x128xf32>
    %570 = arith.addf %558, %569 : vector<13x128xf32>
    %571 = vector.broadcast %22 : vector<1x128xf32> to vector<13x128xf32>
    %572 = arith.mulf %564, %571 : vector<13x128xf32>
    %573 = arith.addf %561, %572 : vector<13x128xf32>
    %c0_174 = arith.constant 0 : index
    %574 = arith.index_cast %537 : i32 to index
    %c3_175 = arith.constant 3 : index
    %c0_176 = arith.constant 0 : index
    %575 = vector.load %arg3[%c0_174, %574, %c3_175, %c0_176] : memref<1x16x16x128xf32, #tpu.memory_space<vmem>>, vector<1x1x13x128xf32>
    %576 = vector.shape_cast %575 : vector<1x1x13x128xf32> to vector<13x128xf32>
    %577 = vector.broadcast %49 : vector<1x128xf32> to vector<13x128xf32>
    %578 = arith.mulf %576, %577 : vector<13x128xf32>
    %579 = arith.addf %567, %578 : vector<13x128xf32>
    %580 = vector.broadcast %37 : vector<1x128xf32> to vector<13x128xf32>
    %581 = arith.mulf %576, %580 : vector<13x128xf32>
    %582 = arith.addf %570, %581 : vector<13x128xf32>
    %583 = vector.broadcast %25 : vector<1x128xf32> to vector<13x128xf32>
    %584 = arith.mulf %576, %583 : vector<13x128xf32>
    %585 = arith.addf %573, %584 : vector<13x128xf32>
    %c5_i32_177 = arith.constant 5 : i32
    %586 = arith.addi %360, %c5_i32_177 : i32
    %c0_178 = arith.constant 0 : index
    %587 = arith.index_cast %586 : i32 to index
    %c0_179 = arith.constant 0 : index
    %c0_180 = arith.constant 0 : index
    %588 = vector.load %arg3[%c0_178, %587, %c0_179, %c0_180] : memref<1x16x16x128xf32, #tpu.memory_space<vmem>>, vector<1x1x13x128xf32>
    %589 = vector.shape_cast %588 : vector<1x1x13x128xf32> to vector<13x128xf32>
    %590 = vector.broadcast %40 : vector<1x128xf32> to vector<13x128xf32>
    %591 = arith.mulf %589, %590 : vector<13x128xf32>
    %592 = arith.addf %582, %591 : vector<13x128xf32>
    %593 = vector.broadcast %28 : vector<1x128xf32> to vector<13x128xf32>
    %594 = arith.mulf %589, %593 : vector<13x128xf32>
    %595 = arith.addf %585, %594 : vector<13x128xf32>
    %c0_181 = arith.constant 0 : index
    %596 = arith.index_cast %586 : i32 to index
    %c1_182 = arith.constant 1 : index
    %c0_183 = arith.constant 0 : index
    %597 = vector.load %arg3[%c0_181, %596, %c1_182, %c0_183] : memref<1x16x16x128xf32, #tpu.memory_space<vmem>>, vector<1x1x13x128xf32>
    %598 = vector.shape_cast %597 : vector<1x1x13x128xf32> to vector<13x128xf32>
    %599 = vector.broadcast %43 : vector<1x128xf32> to vector<13x128xf32>
    %600 = arith.mulf %598, %599 : vector<13x128xf32>
    %601 = arith.addf %592, %600 : vector<13x128xf32>
    %602 = vector.broadcast %31 : vector<1x128xf32> to vector<13x128xf32>
    %603 = arith.mulf %598, %602 : vector<13x128xf32>
    %604 = arith.addf %595, %603 : vector<13x128xf32>
    %c0_184 = arith.constant 0 : index
    %605 = arith.index_cast %586 : i32 to index
    %c2_185 = arith.constant 2 : index
    %c0_186 = arith.constant 0 : index
    %606 = vector.load %arg3[%c0_184, %605, %c2_185, %c0_186] : memref<1x16x16x128xf32, #tpu.memory_space<vmem>>, vector<1x1x13x128xf32>
    %607 = vector.shape_cast %606 : vector<1x1x13x128xf32> to vector<13x128xf32>
    %608 = vector.broadcast %46 : vector<1x128xf32> to vector<13x128xf32>
    %609 = arith.mulf %607, %608 : vector<13x128xf32>
    %610 = arith.addf %601, %609 : vector<13x128xf32>
    %611 = vector.broadcast %34 : vector<1x128xf32> to vector<13x128xf32>
    %612 = arith.mulf %607, %611 : vector<13x128xf32>
    %613 = arith.addf %604, %612 : vector<13x128xf32>
    %c0_187 = arith.constant 0 : index
    %614 = arith.index_cast %586 : i32 to index
    %c3_188 = arith.constant 3 : index
    %c0_189 = arith.constant 0 : index
    %615 = vector.load %arg3[%c0_187, %614, %c3_188, %c0_189] : memref<1x16x16x128xf32, #tpu.memory_space<vmem>>, vector<1x1x13x128xf32>
    %616 = vector.shape_cast %615 : vector<1x1x13x128xf32> to vector<13x128xf32>
    %617 = vector.broadcast %49 : vector<1x128xf32> to vector<13x128xf32>
    %618 = arith.mulf %616, %617 : vector<13x128xf32>
    %619 = arith.addf %610, %618 : vector<13x128xf32>
    %620 = vector.broadcast %37 : vector<1x128xf32> to vector<13x128xf32>
    %621 = arith.mulf %616, %620 : vector<13x128xf32>
    %622 = arith.addf %613, %621 : vector<13x128xf32>
    %c6_i32_190 = arith.constant 6 : i32
    %623 = arith.addi %360, %c6_i32_190 : i32
    %c0_191 = arith.constant 0 : index
    %624 = arith.index_cast %623 : i32 to index
    %c0_192 = arith.constant 0 : index
    %c0_193 = arith.constant 0 : index
    %625 = vector.load %arg3[%c0_191, %624, %c0_192, %c0_193] : memref<1x16x16x128xf32, #tpu.memory_space<vmem>>, vector<1x1x13x128xf32>
    %626 = vector.shape_cast %625 : vector<1x1x13x128xf32> to vector<13x128xf32>
    %627 = vector.broadcast %40 : vector<1x128xf32> to vector<13x128xf32>
    %628 = arith.mulf %626, %627 : vector<13x128xf32>
    %629 = arith.addf %622, %628 : vector<13x128xf32>
    %c0_194 = arith.constant 0 : index
    %630 = arith.index_cast %623 : i32 to index
    %c1_195 = arith.constant 1 : index
    %c0_196 = arith.constant 0 : index
    %631 = vector.load %arg3[%c0_194, %630, %c1_195, %c0_196] : memref<1x16x16x128xf32, #tpu.memory_space<vmem>>, vector<1x1x13x128xf32>
    %632 = vector.shape_cast %631 : vector<1x1x13x128xf32> to vector<13x128xf32>
    %633 = vector.broadcast %43 : vector<1x128xf32> to vector<13x128xf32>
    %634 = arith.mulf %632, %633 : vector<13x128xf32>
    %635 = arith.addf %629, %634 : vector<13x128xf32>
    %c0_197 = arith.constant 0 : index
    %636 = arith.index_cast %623 : i32 to index
    %c2_198 = arith.constant 2 : index
    %c0_199 = arith.constant 0 : index
    %637 = vector.load %arg3[%c0_197, %636, %c2_198, %c0_199] : memref<1x16x16x128xf32, #tpu.memory_space<vmem>>, vector<1x1x13x128xf32>
    %638 = vector.shape_cast %637 : vector<1x1x13x128xf32> to vector<13x128xf32>
    %639 = vector.broadcast %46 : vector<1x128xf32> to vector<13x128xf32>
    %640 = arith.mulf %638, %639 : vector<13x128xf32>
    %641 = arith.addf %635, %640 : vector<13x128xf32>
    %c0_200 = arith.constant 0 : index
    %642 = arith.index_cast %623 : i32 to index
    %c3_201 = arith.constant 3 : index
    %c0_202 = arith.constant 0 : index
    %643 = vector.load %arg3[%c0_200, %642, %c3_201, %c0_202] : memref<1x16x16x128xf32, #tpu.memory_space<vmem>>, vector<1x1x13x128xf32>
    %644 = vector.shape_cast %643 : vector<1x1x13x128xf32> to vector<13x128xf32>
    %645 = vector.broadcast %49 : vector<1x128xf32> to vector<13x128xf32>
    %646 = arith.mulf %644, %645 : vector<13x128xf32>
    %647 = arith.addf %641, %646 : vector<13x128xf32>
    %c0_i32_203 = arith.constant 0 : i32
    %648 = arith.addi %360, %c0_i32_203 : i32
    %c0_204 = arith.constant 0 : index
    %649 = arith.index_cast %648 : i32 to index
    %c0_205 = arith.constant 0 : index
    %c0_206 = arith.constant 0 : index
    %650 = vector.load %arg4[%c0_204, %649, %c0_205, %c0_206] : memref<1x13x13x128xf32, #tpu.memory_space<vmem>>, vector<1x1x13x128xf32>
    %651 = vector.shape_cast %650 : vector<1x1x13x128xf32> to vector<13x128xf32>
    %652 = vector.shape_cast %527 : vector<13x128xf32> to vector<1x1x13x128xf32>
    tpu.vector_store %arg4[%c0_204, %649, %c0_205, %c0_206], %652 {strides = array<i32>} : memref<1x13x13x128xf32, #tpu.memory_space<vmem>>, vector<1x1x13x128xf32>,
    %c1_i32_207 = arith.constant 1 : i32
    %653 = arith.addi %360, %c1_i32_207 : i32
    %c0_208 = arith.constant 0 : index
    %654 = arith.index_cast %653 : i32 to index
    %c0_209 = arith.constant 0 : index
    %c0_210 = arith.constant 0 : index
    %655 = vector.load %arg4[%c0_208, %654, %c0_209, %c0_210] : memref<1x13x13x128xf32, #tpu.memory_space<vmem>>, vector<1x1x13x128xf32>
    %656 = vector.shape_cast %655 : vector<1x1x13x128xf32> to vector<13x128xf32>
    %657 = vector.shape_cast %579 : vector<13x128xf32> to vector<1x1x13x128xf32>
    tpu.vector_store %arg4[%c0_208, %654, %c0_209, %c0_210], %657 {strides = array<i32>} : memref<1x13x13x128xf32, #tpu.memory_space<vmem>>, vector<1x1x13x128xf32>,
    %c2_i32_211 = arith.constant 2 : i32
    %658 = arith.addi %360, %c2_i32_211 : i32
    %c0_212 = arith.constant 0 : index
    %659 = arith.index_cast %658 : i32 to index
    %c0_213 = arith.constant 0 : index
    %c0_214 = arith.constant 0 : index
    %660 = vector.load %arg4[%c0_212, %659, %c0_213, %c0_214] : memref<1x13x13x128xf32, #tpu.memory_space<vmem>>, vector<1x1x13x128xf32>
    %661 = vector.shape_cast %660 : vector<1x1x13x128xf32> to vector<13x128xf32>
    %662 = vector.shape_cast %619 : vector<13x128xf32> to vector<1x1x13x128xf32>
    tpu.vector_store %arg4[%c0_212, %659, %c0_213, %c0_214], %662 {strides = array<i32>} : memref<1x13x13x128xf32, #tpu.memory_space<vmem>>, vector<1x1x13x128xf32>,
    %c3_i32_215 = arith.constant 3 : i32
    %663 = arith.addi %360, %c3_i32_215 : i32
    %c0_216 = arith.constant 0 : index
    %664 = arith.index_cast %663 : i32 to index
    %c0_217 = arith.constant 0 : index
    %c0_218 = arith.constant 0 : index
    %665 = vector.load %arg4[%c0_216, %664, %c0_217, %c0_218] : memref<1x13x13x128xf32, #tpu.memory_space<vmem>>, vector<1x1x13x128xf32>
    %666 = vector.shape_cast %665 : vector<1x1x13x128xf32> to vector<13x128xf32>
    %667 = vector.shape_cast %647 : vector<13x128xf32> to vector<1x1x13x128xf32>
    tpu.vector_store %arg4[%c0_216, %664, %c0_217, %c0_218], %667 {strides = array<i32>} : memref<1x13x13x128xf32, #tpu.memory_space<vmem>>, vector<1x1x13x128xf32>,
    %c2_i32_219 = arith.constant 2 : i32
    %c4_i32_220 = arith.constant 4 : i32
    %668 = arith.muli %c2_i32_219, %c4_i32_220 : i32
    %c9_i32_221 = arith.constant 9 : i32
    %669 = arith.minsi %668, %c9_i32_221 : i32
    %cst_222 = arith.constant 0.000000e+00 : f32
    %670 = vector.broadcast %cst_222 : f32 to vector<13x128xf32>
    %cst_223 = arith.constant 0.000000e+00 : f32
    %671 = vector.broadcast %cst_223 : f32 to vector<13x128xf32>
    %cst_224 = arith.constant 0.000000e+00 : f32
    %672 = vector.broadcast %cst_224 : f32 to vector<13x128xf32>
    %cst_225 = arith.constant 0.000000e+00 : f32
    %673 = vector.broadcast %cst_225 : f32 to vector<13x128xf32>
    %c0_i32_226 = arith.constant 0 : i32
    %674 = arith.addi %669, %c0_i32_226 : i32
    %c0_227 = arith.constant 0 : index
    %675 = arith.index_cast %674 : i32 to index
    %c0_228 = arith.constant 0 : index
    %c0_229 = arith.constant 0 : index
    %676 = vector.load %arg3[%c0_227, %675, %c0_228, %c0_229] : memref<1x16x16x128xf32, #tpu.memory_space<vmem>>, vector<1x1x13x128xf32>
    %677 = vector.shape_cast %676 : vector<1x1x13x128xf32> to vector<13x128xf32>
    %678 = vector.broadcast %4 : vector<1x128xf32> to vector<13x128xf32>
    %679 = arith.mulf %677, %678 : vector<13x128xf32>
    %680 = arith.addf %670, %679 : vector<13x128xf32>
    %c0_230 = arith.constant 0 : index
    %681 = arith.index_cast %674 : i32 to index
    %c1_231 = arith.constant 1 : index
    %c0_232 = arith.constant 0 : index
    %682 = vector.load %arg3[%c0_230, %681, %c1_231, %c0_232] : memref<1x16x16x128xf32, #tpu.memory_space<vmem>>, vector<1x1x13x128xf32>
    %683 = vector.shape_cast %682 : vector<1x1x13x128xf32> to vector<13x128xf32>
    %684 = vector.broadcast %7 : vector<1x128xf32> to vector<13x128xf32>
    %685 = arith.mulf %683, %684 : vector<13x128xf32>
    %686 = arith.addf %680, %685 : vector<13x128xf32>
    %c0_233 = arith.constant 0 : index
    %687 = arith.index_cast %674 : i32 to index
    %c2_234 = arith.constant 2 : index
    %c0_235 = arith.constant 0 : index
    %688 = vector.load %arg3[%c0_233, %687, %c2_234, %c0_235] : memref<1x16x16x128xf32, #tpu.memory_space<vmem>>, vector<1x1x13x128xf32>
    %689 = vector.shape_cast %688 : vector<1x1x13x128xf32> to vector<13x128xf32>
    %690 = vector.broadcast %10 : vector<1x128xf32> to vector<13x128xf32>
    %691 = arith.mulf %689, %690 : vector<13x128xf32>
    %692 = arith.addf %686, %691 : vector<13x128xf32>
    %c0_236 = arith.constant 0 : index
    %693 = arith.index_cast %674 : i32 to index
    %c3_237 = arith.constant 3 : index
    %c0_238 = arith.constant 0 : index
    %694 = vector.load %arg3[%c0_236, %693, %c3_237, %c0_238] : memref<1x16x16x128xf32, #tpu.memory_space<vmem>>, vector<1x1x13x128xf32>
    %695 = vector.shape_cast %694 : vector<1x1x13x128xf32> to vector<13x128xf32>
    %696 = vector.broadcast %13 : vector<1x128xf32> to vector<13x128xf32>
    %697 = arith.mulf %695, %696 : vector<13x128xf32>
    %698 = arith.addf %692, %697 : vector<13x128xf32>
    %c1_i32_239 = arith.constant 1 : i32
    %699 = arith.addi %669, %c1_i32_239 : i32
    %c0_240 = arith.constant 0 : index
    %700 = arith.index_cast %699 : i32 to index
    %c0_241 = arith.constant 0 : index
    %c0_242 = arith.constant 0 : index
    %701 = vector.load %arg3[%c0_240, %700, %c0_241, %c0_242] : memref<1x16x16x128xf32, #tpu.memory_space<vmem>>, vector<1x1x13x128xf32>
    %702 = vector.shape_cast %701 : vector<1x1x13x128xf32> to vector<13x128xf32>
    %703 = vector.broadcast %16 : vector<1x128xf32> to vector<13x128xf32>
    %704 = arith.mulf %702, %703 : vector<13x128xf32>
    %705 = arith.addf %698, %704 : vector<13x128xf32>
    %706 = vector.broadcast %4 : vector<1x128xf32> to vector<13x128xf32>
    %707 = arith.mulf %702, %706 : vector<13x128xf32>
    %708 = arith.addf %671, %707 : vector<13x128xf32>
    %c0_243 = arith.constant 0 : index
    %709 = arith.index_cast %699 : i32 to index
    %c1_244 = arith.constant 1 : index
    %c0_245 = arith.constant 0 : index
    %710 = vector.load %arg3[%c0_243, %709, %c1_244, %c0_245] : memref<1x16x16x128xf32, #tpu.memory_space<vmem>>, vector<1x1x13x128xf32>
    %711 = vector.shape_cast %710 : vector<1x1x13x128xf32> to vector<13x128xf32>
    %712 = vector.broadcast %19 : vector<1x128xf32> to vector<13x128xf32>
    %713 = arith.mulf %711, %712 : vector<13x128xf32>
    %714 = arith.addf %705, %713 : vector<13x128xf32>
    %715 = vector.broadcast %7 : vector<1x128xf32> to vector<13x128xf32>
    %716 = arith.mulf %711, %715 : vector<13x128xf32>
    %717 = arith.addf %708, %716 : vector<13x128xf32>
    %c0_246 = arith.constant 0 : index
    %718 = arith.index_cast %699 : i32 to index
    %c2_247 = arith.constant 2 : index
    %c0_248 = arith.constant 0 : index
    %719 = vector.load %arg3[%c0_246, %718, %c2_247, %c0_248] : memref<1x16x16x128xf32, #tpu.memory_space<vmem>>, vector<1x1x13x128xf32>
    %720 = vector.shape_cast %719 : vector<1x1x13x128xf32> to vector<13x128xf32>
    %721 = vector.broadcast %22 : vector<1x128xf32> to vector<13x128xf32>
    %722 = arith.mulf %720, %721 : vector<13x128xf32>
    %723 = arith.addf %714, %722 : vector<13x128xf32>
    %724 = vector.broadcast %10 : vector<1x128xf32> to vector<13x128xf32>
    %725 = arith.mulf %720, %724 : vector<13x128xf32>
    %726 = arith.addf %717, %725 : vector<13x128xf32>
    %c0_249 = arith.constant 0 : index
    %727 = arith.index_cast %699 : i32 to index
    %c3_250 = arith.constant 3 : index
    %c0_251 = arith.constant 0 : index
    %728 = vector.load %arg3[%c0_249, %727, %c3_250, %c0_251] : memref<1x16x16x128xf32, #tpu.memory_space<vmem>>, vector<1x1x13x128xf32>
    %729 = vector.shape_cast %728 : vector<1x1x13x128xf32> to vector<13x128xf32>
    %730 = vector.broadcast %25 : vector<1x128xf32> to vector<13x128xf32>
    %731 = arith.mulf %729, %730 : vector<13x128xf32>
    %732 = arith.addf %723, %731 : vector<13x128xf32>
    %733 = vector.broadcast %13 : vector<1x128xf32> to vector<13x128xf32>
    %734 = arith.mulf %729, %733 : vector<13x128xf32>
    %735 = arith.addf %726, %734 : vector<13x128xf32>
    %c2_i32_252 = arith.constant 2 : i32
    %736 = arith.addi %669, %c2_i32_252 : i32
    %c0_253 = arith.constant 0 : index
    %737 = arith.index_cast %736 : i32 to index
    %c0_254 = arith.constant 0 : index
    %c0_255 = arith.constant 0 : index
    %738 = vector.load %arg3[%c0_253, %737, %c0_254, %c0_255] : memref<1x16x16x128xf32, #tpu.memory_space<vmem>>, vector<1x1x13x128xf32>
    %739 = vector.shape_cast %738 : vector<1x1x13x128xf32> to vector<13x128xf32>
    %740 = vector.broadcast %28 : vector<1x128xf32> to vector<13x128xf32>
    %741 = arith.mulf %739, %740 : vector<13x128xf32>
    %742 = arith.addf %732, %741 : vector<13x128xf32>
    %743 = vector.broadcast %16 : vector<1x128xf32> to vector<13x128xf32>
    %744 = arith.mulf %739, %743 : vector<13x128xf32>
    %745 = arith.addf %735, %744 : vector<13x128xf32>
    %746 = vector.broadcast %4 : vector<1x128xf32> to vector<13x128xf32>
    %747 = arith.mulf %739, %746 : vector<13x128xf32>
    %748 = arith.addf %672, %747 : vector<13x128xf32>
    %c0_256 = arith.constant 0 : index
    %749 = arith.index_cast %736 : i32 to index
    %c1_257 = arith.constant 1 : index
    %c0_258 = arith.constant 0 : index
    %750 = vector.load %arg3[%c0_256, %749, %c1_257, %c0_258] : memref<1x16x16x128xf32, #tpu.memory_space<vmem>>, vector<1x1x13x128xf32>
    %751 = vector.shape_cast %750 : vector<1x1x13x128xf32> to vector<13x128xf32>
    %752 = vector.broadcast %31 : vector<1x128xf32> to vector<13x128xf32>
    %753 = arith.mulf %751, %752 : vector<13x128xf32>
    %754 = arith.addf %742, %753 : vector<13x128xf32>
    %755 = vector.broadcast %19 : vector<1x128xf32> to vector<13x128xf32>
    %756 = arith.mulf %751, %755 : vector<13x128xf32>
    %757 = arith.addf %745, %756 : vector<13x128xf32>
    %758 = vector.broadcast %7 : vector<1x128xf32> to vector<13x128xf32>
    %759 = arith.mulf %751, %758 : vector<13x128xf32>
    %760 = arith.addf %748, %759 : vector<13x128xf32>
    %c0_259 = arith.constant 0 : index
    %761 = arith.index_cast %736 : i32 to index
    %c2_260 = arith.constant 2 : index
    %c0_261 = arith.constant 0 : index
    %762 = vector.load %arg3[%c0_259, %761, %c2_260, %c0_261] : memref<1x16x16x128xf32, #tpu.memory_space<vmem>>, vector<1x1x13x128xf32>
    %763 = vector.shape_cast %762 : vector<1x1x13x128xf32> to vector<13x128xf32>
    %764 = vector.broadcast %34 : vector<1x128xf32> to vector<13x128xf32>
    %765 = arith.mulf %763, %764 : vector<13x128xf32>
    %766 = arith.addf %754, %765 : vector<13x128xf32>
    %767 = vector.broadcast %22 : vector<1x128xf32> to vector<13x128xf32>
    %768 = arith.mulf %763, %767 : vector<13x128xf32>
    %769 = arith.addf %757, %768 : vector<13x128xf32>
    %770 = vector.broadcast %10 : vector<1x128xf32> to vector<13x128xf32>
    %771 = arith.mulf %763, %770 : vector<13x128xf32>
    %772 = arith.addf %760, %771 : vector<13x128xf32>
    %c0_262 = arith.constant 0 : index
    %773 = arith.index_cast %736 : i32 to index
    %c3_263 = arith.constant 3 : index
    %c0_264 = arith.constant 0 : index
    %774 = vector.load %arg3[%c0_262, %773, %c3_263, %c0_264] : memref<1x16x16x128xf32, #tpu.memory_space<vmem>>, vector<1x1x13x128xf32>
    %775 = vector.shape_cast %774 : vector<1x1x13x128xf32> to vector<13x128xf32>
    %776 = vector.broadcast %37 : vector<1x128xf32> to vector<13x128xf32>
    %777 = arith.mulf %775, %776 : vector<13x128xf32>
    %778 = arith.addf %766, %777 : vector<13x128xf32>
    %779 = vector.broadcast %25 : vector<1x128xf32> to vector<13x128xf32>
    %780 = arith.mulf %775, %779 : vector<13x128xf32>
    %781 = arith.addf %769, %780 : vector<13x128xf32>
    %782 = vector.broadcast %13 : vector<1x128xf32> to vector<13x128xf32>
    %783 = arith.mulf %775, %782 : vector<13x128xf32>
    %784 = arith.addf %772, %783 : vector<13x128xf32>
    %c3_i32_265 = arith.constant 3 : i32
    %785 = arith.addi %669, %c3_i32_265 : i32
    %c0_266 = arith.constant 0 : index
    %786 = arith.index_cast %785 : i32 to index
    %c0_267 = arith.constant 0 : index
    %c0_268 = arith.constant 0 : index
    %787 = vector.load %arg3[%c0_266, %786, %c0_267, %c0_268] : memref<1x16x16x128xf32, #tpu.memory_space<vmem>>, vector<1x1x13x128xf32>
    %788 = vector.shape_cast %787 : vector<1x1x13x128xf32> to vector<13x128xf32>
    %789 = vector.broadcast %40 : vector<1x128xf32> to vector<13x128xf32>
    %790 = arith.mulf %788, %789 : vector<13x128xf32>
    %791 = arith.addf %778, %790 : vector<13x128xf32>
    %792 = vector.broadcast %28 : vector<1x128xf32> to vector<13x128xf32>
    %793 = arith.mulf %788, %792 : vector<13x128xf32>
    %794 = arith.addf %781, %793 : vector<13x128xf32>
    %795 = vector.broadcast %16 : vector<1x128xf32> to vector<13x128xf32>
    %796 = arith.mulf %788, %795 : vector<13x128xf32>
    %797 = arith.addf %784, %796 : vector<13x128xf32>
    %798 = vector.broadcast %4 : vector<1x128xf32> to vector<13x128xf32>
    %799 = arith.mulf %788, %798 : vector<13x128xf32>
    %800 = arith.addf %673, %799 : vector<13x128xf32>
    %c0_269 = arith.constant 0 : index
    %801 = arith.index_cast %785 : i32 to index
    %c1_270 = arith.constant 1 : index
    %c0_271 = arith.constant 0 : index
    %802 = vector.load %arg3[%c0_269, %801, %c1_270, %c0_271] : memref<1x16x16x128xf32, #tpu.memory_space<vmem>>, vector<1x1x13x128xf32>
    %803 = vector.shape_cast %802 : vector<1x1x13x128xf32> to vector<13x128xf32>
    %804 = vector.broadcast %43 : vector<1x128xf32> to vector<13x128xf32>
    %805 = arith.mulf %803, %804 : vector<13x128xf32>
    %806 = arith.addf %791, %805 : vector<13x128xf32>
    %807 = vector.broadcast %31 : vector<1x128xf32> to vector<13x128xf32>
    %808 = arith.mulf %803, %807 : vector<13x128xf32>
    %809 = arith.addf %794, %808 : vector<13x128xf32>
    %810 = vector.broadcast %19 : vector<1x128xf32> to vector<13x128xf32>
    %811 = arith.mulf %803, %810 : vector<13x128xf32>
    %812 = arith.addf %797, %811 : vector<13x128xf32>
    %813 = vector.broadcast %7 : vector<1x128xf32> to vector<13x128xf32>
    %814 = arith.mulf %803, %813 : vector<13x128xf32>
    %815 = arith.addf %800, %814 : vector<13x128xf32>
    %c0_272 = arith.constant 0 : index
    %816 = arith.index_cast %785 : i32 to index
    %c2_273 = arith.constant 2 : index
    %c0_274 = arith.constant 0 : index
    %817 = vector.load %arg3[%c0_272, %816, %c2_273, %c0_274] : memref<1x16x16x128xf32, #tpu.memory_space<vmem>>, vector<1x1x13x128xf32>
    %818 = vector.shape_cast %817 : vector<1x1x13x128xf32> to vector<13x128xf32>
    %819 = vector.broadcast %46 : vector<1x128xf32> to vector<13x128xf32>
    %820 = arith.mulf %818, %819 : vector<13x128xf32>
    %821 = arith.addf %806, %820 : vector<13x128xf32>
    %822 = vector.broadcast %34 : vector<1x128xf32> to vector<13x128xf32>
    %823 = arith.mulf %818, %822 : vector<13x128xf32>
    %824 = arith.addf %809, %823 : vector<13x128xf32>
    %825 = vector.broadcast %22 : vector<1x128xf32> to vector<13x128xf32>
    %826 = arith.mulf %818, %825 : vector<13x128xf32>
    %827 = arith.addf %812, %826 : vector<13x128xf32>
    %828 = vector.broadcast %10 : vector<1x128xf32> to vector<13x128xf32>
    %829 = arith.mulf %818, %828 : vector<13x128xf32>
    %830 = arith.addf %815, %829 : vector<13x128xf32>
    %c0_275 = arith.constant 0 : index
    %831 = arith.index_cast %785 : i32 to index
    %c3_276 = arith.constant 3 : index
    %c0_277 = arith.constant 0 : index
    %832 = vector.load %arg3[%c0_275, %831, %c3_276, %c0_277] : memref<1x16x16x128xf32, #tpu.memory_space<vmem>>, vector<1x1x13x128xf32>
    %833 = vector.shape_cast %832 : vector<1x1x13x128xf32> to vector<13x128xf32>
    %834 = vector.broadcast %49 : vector<1x128xf32> to vector<13x128xf32>
    %835 = arith.mulf %833, %834 : vector<13x128xf32>
    %836 = arith.addf %821, %835 : vector<13x128xf32>
    %837 = vector.broadcast %37 : vector<1x128xf32> to vector<13x128xf32>
    %838 = arith.mulf %833, %837 : vector<13x128xf32>
    %839 = arith.addf %824, %838 : vector<13x128xf32>
    %840 = vector.broadcast %25 : vector<1x128xf32> to vector<13x128xf32>
    %841 = arith.mulf %833, %840 : vector<13x128xf32>
    %842 = arith.addf %827, %841 : vector<13x128xf32>
    %843 = vector.broadcast %13 : vector<1x128xf32> to vector<13x128xf32>
    %844 = arith.mulf %833, %843 : vector<13x128xf32>
    %845 = arith.addf %830, %844 : vector<13x128xf32>
    %c4_i32_278 = arith.constant 4 : i32
    %846 = arith.addi %669, %c4_i32_278 : i32
    %c0_279 = arith.constant 0 : index
    %847 = arith.index_cast %846 : i32 to index
    %c0_280 = arith.constant 0 : index
    %c0_281 = arith.constant 0 : index
    %848 = vector.load %arg3[%c0_279, %847, %c0_280, %c0_281] : memref<1x16x16x128xf32, #tpu.memory_space<vmem>>, vector<1x1x13x128xf32>
    %849 = vector.shape_cast %848 : vector<1x1x13x128xf32> to vector<13x128xf32>
    %850 = vector.broadcast %40 : vector<1x128xf32> to vector<13x128xf32>
    %851 = arith.mulf %849, %850 : vector<13x128xf32>
    %852 = arith.addf %839, %851 : vector<13x128xf32>
    %853 = vector.broadcast %28 : vector<1x128xf32> to vector<13x128xf32>
    %854 = arith.mulf %849, %853 : vector<13x128xf32>
    %855 = arith.addf %842, %854 : vector<13x128xf32>
    %856 = vector.broadcast %16 : vector<1x128xf32> to vector<13x128xf32>
    %857 = arith.mulf %849, %856 : vector<13x128xf32>
    %858 = arith.addf %845, %857 : vector<13x128xf32>
    %c0_282 = arith.constant 0 : index
    %859 = arith.index_cast %846 : i32 to index
    %c1_283 = arith.constant 1 : index
    %c0_284 = arith.constant 0 : index
    %860 = vector.load %arg3[%c0_282, %859, %c1_283, %c0_284] : memref<1x16x16x128xf32, #tpu.memory_space<vmem>>, vector<1x1x13x128xf32>
    %861 = vector.shape_cast %860 : vector<1x1x13x128xf32> to vector<13x128xf32>
    %862 = vector.broadcast %43 : vector<1x128xf32> to vector<13x128xf32>
    %863 = arith.mulf %861, %862 : vector<13x128xf32>
    %864 = arith.addf %852, %863 : vector<13x128xf32>
    %865 = vector.broadcast %31 : vector<1x128xf32> to vector<13x128xf32>
    %866 = arith.mulf %861, %865 : vector<13x128xf32>
    %867 = arith.addf %855, %866 : vector<13x128xf32>
    %868 = vector.broadcast %19 : vector<1x128xf32> to vector<13x128xf32>
    %869 = arith.mulf %861, %868 : vector<13x128xf32>
    %870 = arith.addf %858, %869 : vector<13x128xf32>
    %c0_285 = arith.constant 0 : index
    %871 = arith.index_cast %846 : i32 to index
    %c2_286 = arith.constant 2 : index
    %c0_287 = arith.constant 0 : index
    %872 = vector.load %arg3[%c0_285, %871, %c2_286, %c0_287] : memref<1x16x16x128xf32, #tpu.memory_space<vmem>>, vector<1x1x13x128xf32>
    %873 = vector.shape_cast %872 : vector<1x1x13x128xf32> to vector<13x128xf32>
    %874 = vector.broadcast %46 : vector<1x128xf32> to vector<13x128xf32>
    %875 = arith.mulf %873, %874 : vector<13x128xf32>
    %876 = arith.addf %864, %875 : vector<13x128xf32>
    %877 = vector.broadcast %34 : vector<1x128xf32> to vector<13x128xf32>
    %878 = arith.mulf %873, %877 : vector<13x128xf32>
    %879 = arith.addf %867, %878 : vector<13x128xf32>
    %880 = vector.broadcast %22 : vector<1x128xf32> to vector<13x128xf32>
    %881 = arith.mulf %873, %880 : vector<13x128xf32>
    %882 = arith.addf %870, %881 : vector<13x128xf32>
    %c0_288 = arith.constant 0 : index
    %883 = arith.index_cast %846 : i32 to index
    %c3_289 = arith.constant 3 : index
    %c0_290 = arith.constant 0 : index
    %884 = vector.load %arg3[%c0_288, %883, %c3_289, %c0_290] : memref<1x16x16x128xf32, #tpu.memory_space<vmem>>, vector<1x1x13x128xf32>
    %885 = vector.shape_cast %884 : vector<1x1x13x128xf32> to vector<13x128xf32>
    %886 = vector.broadcast %49 : vector<1x128xf32> to vector<13x128xf32>
    %887 = arith.mulf %885, %886 : vector<13x128xf32>
    %888 = arith.addf %876, %887 : vector<13x128xf32>
    %889 = vector.broadcast %37 : vector<1x128xf32> to vector<13x128xf32>
    %890 = arith.mulf %885, %889 : vector<13x128xf32>
    %891 = arith.addf %879, %890 : vector<13x128xf32>
    %892 = vector.broadcast %25 : vector<1x128xf32> to vector<13x128xf32>
    %893 = arith.mulf %885, %892 : vector<13x128xf32>
    %894 = arith.addf %882, %893 : vector<13x128xf32>
    %c5_i32_291 = arith.constant 5 : i32
    %895 = arith.addi %669, %c5_i32_291 : i32
    %c0_292 = arith.constant 0 : index
    %896 = arith.index_cast %895 : i32 to index
    %c0_293 = arith.constant 0 : index
    %c0_294 = arith.constant 0 : index
    %897 = vector.load %arg3[%c0_292, %896, %c0_293, %c0_294] : memref<1x16x16x128xf32, #tpu.memory_space<vmem>>, vector<1x1x13x128xf32>
    %898 = vector.shape_cast %897 : vector<1x1x13x128xf32> to vector<13x128xf32>
    %899 = vector.broadcast %40 : vector<1x128xf32> to vector<13x128xf32>
    %900 = arith.mulf %898, %899 : vector<13x128xf32>
    %901 = arith.addf %891, %900 : vector<13x128xf32>
    %902 = vector.broadcast %28 : vector<1x128xf32> to vector<13x128xf32>
    %903 = arith.mulf %898, %902 : vector<13x128xf32>
    %904 = arith.addf %894, %903 : vector<13x128xf32>
    %c0_295 = arith.constant 0 : index
    %905 = arith.index_cast %895 : i32 to index
    %c1_296 = arith.constant 1 : index
    %c0_297 = arith.constant 0 : index
    %906 = vector.load %arg3[%c0_295, %905, %c1_296, %c0_297] : memref<1x16x16x128xf32, #tpu.memory_space<vmem>>, vector<1x1x13x128xf32>
    %907 = vector.shape_cast %906 : vector<1x1x13x128xf32> to vector<13x128xf32>
    %908 = vector.broadcast %43 : vector<1x128xf32> to vector<13x128xf32>
    %909 = arith.mulf %907, %908 : vector<13x128xf32>
    %910 = arith.addf %901, %909 : vector<13x128xf32>
    %911 = vector.broadcast %31 : vector<1x128xf32> to vector<13x128xf32>
    %912 = arith.mulf %907, %911 : vector<13x128xf32>
    %913 = arith.addf %904, %912 : vector<13x128xf32>
    %c0_298 = arith.constant 0 : index
    %914 = arith.index_cast %895 : i32 to index
    %c2_299 = arith.constant 2 : index
    %c0_300 = arith.constant 0 : index
    %915 = vector.load %arg3[%c0_298, %914, %c2_299, %c0_300] : memref<1x16x16x128xf32, #tpu.memory_space<vmem>>, vector<1x1x13x128xf32>
    %916 = vector.shape_cast %915 : vector<1x1x13x128xf32> to vector<13x128xf32>
    %917 = vector.broadcast %46 : vector<1x128xf32> to vector<13x128xf32>
    %918 = arith.mulf %916, %917 : vector<13x128xf32>
    %919 = arith.addf %910, %918 : vector<13x128xf32>
    %920 = vector.broadcast %34 : vector<1x128xf32> to vector<13x128xf32>
    %921 = arith.mulf %916, %920 : vector<13x128xf32>
    %922 = arith.addf %913, %921 : vector<13x128xf32>
    %c0_301 = arith.constant 0 : index
    %923 = arith.index_cast %895 : i32 to index
    %c3_302 = arith.constant 3 : index
    %c0_303 = arith.constant 0 : index
    %924 = vector.load %arg3[%c0_301, %923, %c3_302, %c0_303] : memref<1x16x16x128xf32, #tpu.memory_space<vmem>>, vector<1x1x13x128xf32>
    %925 = vector.shape_cast %924 : vector<1x1x13x128xf32> to vector<13x128xf32>
    %926 = vector.broadcast %49 : vector<1x128xf32> to vector<13x128xf32>
    %927 = arith.mulf %925, %926 : vector<13x128xf32>
    %928 = arith.addf %919, %927 : vector<13x128xf32>
    %929 = vector.broadcast %37 : vector<1x128xf32> to vector<13x128xf32>
    %930 = arith.mulf %925, %929 : vector<13x128xf32>
    %931 = arith.addf %922, %930 : vector<13x128xf32>
    %c6_i32_304 = arith.constant 6 : i32
    %932 = arith.addi %669, %c6_i32_304 : i32
    %c0_305 = arith.constant 0 : index
    %933 = arith.index_cast %932 : i32 to index
    %c0_306 = arith.constant 0 : index
    %c0_307 = arith.constant 0 : index
    %934 = vector.load %arg3[%c0_305, %933, %c0_306, %c0_307] : memref<1x16x16x128xf32, #tpu.memory_space<vmem>>, vector<1x1x13x128xf32>
    %935 = vector.shape_cast %934 : vector<1x1x13x128xf32> to vector<13x128xf32>
    %936 = vector.broadcast %40 : vector<1x128xf32> to vector<13x128xf32>
    %937 = arith.mulf %935, %936 : vector<13x128xf32>
    %938 = arith.addf %931, %937 : vector<13x128xf32>
    %c0_308 = arith.constant 0 : index
    %939 = arith.index_cast %932 : i32 to index
    %c1_309 = arith.constant 1 : index
    %c0_310 = arith.constant 0 : index
    %940 = vector.load %arg3[%c0_308, %939, %c1_309, %c0_310] : memref<1x16x16x128xf32, #tpu.memory_space<vmem>>, vector<1x1x13x128xf32>
    %941 = vector.shape_cast %940 : vector<1x1x13x128xf32> to vector<13x128xf32>
    %942 = vector.broadcast %43 : vector<1x128xf32> to vector<13x128xf32>
    %943 = arith.mulf %941, %942 : vector<13x128xf32>
    %944 = arith.addf %938, %943 : vector<13x128xf32>
    %c0_311 = arith.constant 0 : index
    %945 = arith.index_cast %932 : i32 to index
    %c2_312 = arith.constant 2 : index
    %c0_313 = arith.constant 0 : index
    %946 = vector.load %arg3[%c0_311, %945, %c2_312, %c0_313] : memref<1x16x16x128xf32, #tpu.memory_space<vmem>>, vector<1x1x13x128xf32>
    %947 = vector.shape_cast %946 : vector<1x1x13x128xf32> to vector<13x128xf32>
    %948 = vector.broadcast %46 : vector<1x128xf32> to vector<13x128xf32>
    %949 = arith.mulf %947, %948 : vector<13x128xf32>
    %950 = arith.addf %944, %949 : vector<13x128xf32>
    %c0_314 = arith.constant 0 : index
    %951 = arith.index_cast %932 : i32 to index
    %c3_315 = arith.constant 3 : index
    %c0_316 = arith.constant 0 : index
    %952 = vector.load %arg3[%c0_314, %951, %c3_315, %c0_316] : memref<1x16x16x128xf32, #tpu.memory_space<vmem>>, vector<1x1x13x128xf32>
    %953 = vector.shape_cast %952 : vector<1x1x13x128xf32> to vector<13x128xf32>
    %954 = vector.broadcast %49 : vector<1x128xf32> to vector<13x128xf32>
    %955 = arith.mulf %953, %954 : vector<13x128xf32>
    %956 = arith.addf %950, %955 : vector<13x128xf32>
    %c0_i32_317 = arith.constant 0 : i32
    %957 = arith.addi %669, %c0_i32_317 : i32
    %c0_318 = arith.constant 0 : index
    %958 = arith.index_cast %957 : i32 to index
    %c0_319 = arith.constant 0 : index
    %c0_320 = arith.constant 0 : index
    %959 = vector.load %arg4[%c0_318, %958, %c0_319, %c0_320] : memref<1x13x13x128xf32, #tpu.memory_space<vmem>>, vector<1x1x13x128xf32>
    %960 = vector.shape_cast %959 : vector<1x1x13x128xf32> to vector<13x128xf32>
    %961 = vector.shape_cast %836 : vector<13x128xf32> to vector<1x1x13x128xf32>
    tpu.vector_store %arg4[%c0_318, %958, %c0_319, %c0_320], %961 {strides = array<i32>} : memref<1x13x13x128xf32, #tpu.memory_space<vmem>>, vector<1x1x13x128xf32>,
    %c1_i32_321 = arith.constant 1 : i32
    %962 = arith.addi %669, %c1_i32_321 : i32
    %c0_322 = arith.constant 0 : index
    %963 = arith.index_cast %962 : i32 to index
    %c0_323 = arith.constant 0 : index
    %c0_324 = arith.constant 0 : index
    %964 = vector.load %arg4[%c0_322, %963, %c0_323, %c0_324] : memref<1x13x13x128xf32, #tpu.memory_space<vmem>>, vector<1x1x13x128xf32>
    %965 = vector.shape_cast %964 : vector<1x1x13x128xf32> to vector<13x128xf32>
    %966 = vector.shape_cast %888 : vector<13x128xf32> to vector<1x1x13x128xf32>
    tpu.vector_store %arg4[%c0_322, %963, %c0_323, %c0_324], %966 {strides = array<i32>} : memref<1x13x13x128xf32, #tpu.memory_space<vmem>>, vector<1x1x13x128xf32>,
    %c2_i32_325 = arith.constant 2 : i32
    %967 = arith.addi %669, %c2_i32_325 : i32
    %c0_326 = arith.constant 0 : index
    %968 = arith.index_cast %967 : i32 to index
    %c0_327 = arith.constant 0 : index
    %c0_328 = arith.constant 0 : index
    %969 = vector.load %arg4[%c0_326, %968, %c0_327, %c0_328] : memref<1x13x13x128xf32, #tpu.memory_space<vmem>>, vector<1x1x13x128xf32>
    %970 = vector.shape_cast %969 : vector<1x1x13x128xf32> to vector<13x128xf32>
    %971 = vector.shape_cast %928 : vector<13x128xf32> to vector<1x1x13x128xf32>
    tpu.vector_store %arg4[%c0_326, %968, %c0_327, %c0_328], %971 {strides = array<i32>} : memref<1x13x13x128xf32, #tpu.memory_space<vmem>>, vector<1x1x13x128xf32>,
    %c3_i32_329 = arith.constant 3 : i32
    %972 = arith.addi %669, %c3_i32_329 : i32
    %c0_330 = arith.constant 0 : index
    %973 = arith.index_cast %972 : i32 to index
    %c0_331 = arith.constant 0 : index
    %c0_332 = arith.constant 0 : index
    %974 = vector.load %arg4[%c0_330, %973, %c0_331, %c0_332] : memref<1x13x13x128xf32, #tpu.memory_space<vmem>>, vector<1x1x13x128xf32>
    %975 = vector.shape_cast %974 : vector<1x1x13x128xf32> to vector<13x128xf32>
    %976 = vector.shape_cast %956 : vector<13x128xf32> to vector<1x1x13x128xf32>
    tpu.vector_store %arg4[%c0_330, %973, %c0_331, %c0_332], %976 {strides = array<i32>} : memref<1x13x13x128xf32, #tpu.memory_space<vmem>>, vector<1x1x13x128xf32>,
    %c3_i32_333 = arith.constant 3 : i32
    %c4_i32_334 = arith.constant 4 : i32
    %977 = arith.muli %c3_i32_333, %c4_i32_334 : i32
    %c9_i32_335 = arith.constant 9 : i32
    %978 = arith.minsi %977, %c9_i32_335 : i32
    %cst_336 = arith.constant 0.000000e+00 : f32
    %979 = vector.broadcast %cst_336 : f32 to vector<13x128xf32>
    %cst_337 = arith.constant 0.000000e+00 : f32
    %980 = vector.broadcast %cst_337 : f32 to vector<13x128xf32>
    %cst_338 = arith.constant 0.000000e+00 : f32
    %981 = vector.broadcast %cst_338 : f32 to vector<13x128xf32>
    %cst_339 = arith.constant 0.000000e+00 : f32
    %982 = vector.broadcast %cst_339 : f32 to vector<13x128xf32>
    %c0_i32_340 = arith.constant 0 : i32
    %983 = arith.addi %978, %c0_i32_340 : i32
    %c0_341 = arith.constant 0 : index
    %984 = arith.index_cast %983 : i32 to index
    %c0_342 = arith.constant 0 : index
    %c0_343 = arith.constant 0 : index
    %985 = vector.load %arg3[%c0_341, %984, %c0_342, %c0_343] : memref<1x16x16x128xf32, #tpu.memory_space<vmem>>, vector<1x1x13x128xf32>
    %986 = vector.shape_cast %985 : vector<1x1x13x128xf32> to vector<13x128xf32>
    %987 = vector.broadcast %4 : vector<1x128xf32> to vector<13x128xf32>
    %988 = arith.mulf %986, %987 : vector<13x128xf32>
    %989 = arith.addf %979, %988 : vector<13x128xf32>
    %c0_344 = arith.constant 0 : index
    %990 = arith.index_cast %983 : i32 to index
    %c1_345 = arith.constant 1 : index
    %c0_346 = arith.constant 0 : index
    %991 = vector.load %arg3[%c0_344, %990, %c1_345, %c0_346] : memref<1x16x16x128xf32, #tpu.memory_space<vmem>>, vector<1x1x13x128xf32>
    %992 = vector.shape_cast %991 : vector<1x1x13x128xf32> to vector<13x128xf32>
    %993 = vector.broadcast %7 : vector<1x128xf32> to vector<13x128xf32>
    %994 = arith.mulf %992, %993 : vector<13x128xf32>
    %995 = arith.addf %989, %994 : vector<13x128xf32>
    %c0_347 = arith.constant 0 : index
    %996 = arith.index_cast %983 : i32 to index
    %c2_348 = arith.constant 2 : index
    %c0_349 = arith.constant 0 : index
    %997 = vector.load %arg3[%c0_347, %996, %c2_348, %c0_349] : memref<1x16x16x128xf32, #tpu.memory_space<vmem>>, vector<1x1x13x128xf32>
    %998 = vector.shape_cast %997 : vector<1x1x13x128xf32> to vector<13x128xf32>
    %999 = vector.broadcast %10 : vector<1x128xf32> to vector<13x128xf32>
    %1000 = arith.mulf %998, %999 : vector<13x128xf32>
    %1001 = arith.addf %995, %1000 : vector<13x128xf32>
    %c0_350 = arith.constant 0 : index
    %1002 = arith.index_cast %983 : i32 to index
    %c3_351 = arith.constant 3 : index
    %c0_352 = arith.constant 0 : index
    %1003 = vector.load %arg3[%c0_350, %1002, %c3_351, %c0_352] : memref<1x16x16x128xf32, #tpu.memory_space<vmem>>, vector<1x1x13x128xf32>
    %1004 = vector.shape_cast %1003 : vector<1x1x13x128xf32> to vector<13x128xf32>
    %1005 = vector.broadcast %13 : vector<1x128xf32> to vector<13x128xf32>
    %1006 = arith.mulf %1004, %1005 : vector<13x128xf32>
    %1007 = arith.addf %1001, %1006 : vector<13x128xf32>
    %c1_i32_353 = arith.constant 1 : i32
    %1008 = arith.addi %978, %c1_i32_353 : i32
    %c0_354 = arith.constant 0 : index
    %1009 = arith.index_cast %1008 : i32 to index
    %c0_355 = arith.constant 0 : index
    %c0_356 = arith.constant 0 : index
    %1010 = vector.load %arg3[%c0_354, %1009, %c0_355, %c0_356] : memref<1x16x16x128xf32, #tpu.memory_space<vmem>>, vector<1x1x13x128xf32>
    %1011 = vector.shape_cast %1010 : vector<1x1x13x128xf32> to vector<13x128xf32>
    %1012 = vector.broadcast %16 : vector<1x128xf32> to vector<13x128xf32>
    %1013 = arith.mulf %1011, %1012 : vector<13x128xf32>
    %1014 = arith.addf %1007, %1013 : vector<13x128xf32>
    %1015 = vector.broadcast %4 : vector<1x128xf32> to vector<13x128xf32>
    %1016 = arith.mulf %1011, %1015 : vector<13x128xf32>
    %1017 = arith.addf %980, %1016 : vector<13x128xf32>
    %c0_357 = arith.constant 0 : index
    %1018 = arith.index_cast %1008 : i32 to index
    %c1_358 = arith.constant 1 : index
    %c0_359 = arith.constant 0 : index
    %1019 = vector.load %arg3[%c0_357, %1018, %c1_358, %c0_359] : memref<1x16x16x128xf32, #tpu.memory_space<vmem>>, vector<1x1x13x128xf32>
    %1020 = vector.shape_cast %1019 : vector<1x1x13x128xf32> to vector<13x128xf32>
    %1021 = vector.broadcast %19 : vector<1x128xf32> to vector<13x128xf32>
    %1022 = arith.mulf %1020, %1021 : vector<13x128xf32>
    %1023 = arith.addf %1014, %1022 : vector<13x128xf32>
    %1024 = vector.broadcast %7 : vector<1x128xf32> to vector<13x128xf32>
    %1025 = arith.mulf %1020, %1024 : vector<13x128xf32>
    %1026 = arith.addf %1017, %1025 : vector<13x128xf32>
    %c0_360 = arith.constant 0 : index
    %1027 = arith.index_cast %1008 : i32 to index
    %c2_361 = arith.constant 2 : index
    %c0_362 = arith.constant 0 : index
    %1028 = vector.load %arg3[%c0_360, %1027, %c2_361, %c0_362] : memref<1x16x16x128xf32, #tpu.memory_space<vmem>>, vector<1x1x13x128xf32>
    %1029 = vector.shape_cast %1028 : vector<1x1x13x128xf32> to vector<13x128xf32>
    %1030 = vector.broadcast %22 : vector<1x128xf32> to vector<13x128xf32>
    %1031 = arith.mulf %1029, %1030 : vector<13x128xf32>
    %1032 = arith.addf %1023, %1031 : vector<13x128xf32>
    %1033 = vector.broadcast %10 : vector<1x128xf32> to vector<13x128xf32>
    %1034 = arith.mulf %1029, %1033 : vector<13x128xf32>
    %1035 = arith.addf %1026, %1034 : vector<13x128xf32>
    %c0_363 = arith.constant 0 : index
    %1036 = arith.index_cast %1008 : i32 to index
    %c3_364 = arith.constant 3 : index
    %c0_365 = arith.constant 0 : index
    %1037 = vector.load %arg3[%c0_363, %1036, %c3_364, %c0_365] : memref<1x16x16x128xf32, #tpu.memory_space<vmem>>, vector<1x1x13x128xf32>
    %1038 = vector.shape_cast %1037 : vector<1x1x13x128xf32> to vector<13x128xf32>
    %1039 = vector.broadcast %25 : vector<1x128xf32> to vector<13x128xf32>
    %1040 = arith.mulf %1038, %1039 : vector<13x128xf32>
    %1041 = arith.addf %1032, %1040 : vector<13x128xf32>
    %1042 = vector.broadcast %13 : vector<1x128xf32> to vector<13x128xf32>
    %1043 = arith.mulf %1038, %1042 : vector<13x128xf32>
    %1044 = arith.addf %1035, %1043 : vector<13x128xf32>
    %c2_i32_366 = arith.constant 2 : i32
    %1045 = arith.addi %978, %c2_i32_366 : i32
    %c0_367 = arith.constant 0 : index
    %1046 = arith.index_cast %1045 : i32 to index
    %c0_368 = arith.constant 0 : index
    %c0_369 = arith.constant 0 : index
    %1047 = vector.load %arg3[%c0_367, %1046, %c0_368, %c0_369] : memref<1x16x16x128xf32, #tpu.memory_space<vmem>>, vector<1x1x13x128xf32>
    %1048 = vector.shape_cast %1047 : vector<1x1x13x128xf32> to vector<13x128xf32>
    %1049 = vector.broadcast %28 : vector<1x128xf32> to vector<13x128xf32>
    %1050 = arith.mulf %1048, %1049 : vector<13x128xf32>
    %1051 = arith.addf %1041, %1050 : vector<13x128xf32>
    %1052 = vector.broadcast %16 : vector<1x128xf32> to vector<13x128xf32>
    %1053 = arith.mulf %1048, %1052 : vector<13x128xf32>
    %1054 = arith.addf %1044, %1053 : vector<13x128xf32>
    %1055 = vector.broadcast %4 : vector<1x128xf32> to vector<13x128xf32>
    %1056 = arith.mulf %1048, %1055 : vector<13x128xf32>
    %1057 = arith.addf %981, %1056 : vector<13x128xf32>
    %c0_370 = arith.constant 0 : index
    %1058 = arith.index_cast %1045 : i32 to index
    %c1_371 = arith.constant 1 : index
    %c0_372 = arith.constant 0 : index
    %1059 = vector.load %arg3[%c0_370, %1058, %c1_371, %c0_372] : memref<1x16x16x128xf32, #tpu.memory_space<vmem>>, vector<1x1x13x128xf32>
    %1060 = vector.shape_cast %1059 : vector<1x1x13x128xf32> to vector<13x128xf32>
    %1061 = vector.broadcast %31 : vector<1x128xf32> to vector<13x128xf32>
    %1062 = arith.mulf %1060, %1061 : vector<13x128xf32>
    %1063 = arith.addf %1051, %1062 : vector<13x128xf32>
    %1064 = vector.broadcast %19 : vector<1x128xf32> to vector<13x128xf32>
    %1065 = arith.mulf %1060, %1064 : vector<13x128xf32>
    %1066 = arith.addf %1054, %1065 : vector<13x128xf32>
    %1067 = vector.broadcast %7 : vector<1x128xf32> to vector<13x128xf32>
    %1068 = arith.mulf %1060, %1067 : vector<13x128xf32>
    %1069 = arith.addf %1057, %1068 : vector<13x128xf32>
    %c0_373 = arith.constant 0 : index
    %1070 = arith.index_cast %1045 : i32 to index
    %c2_374 = arith.constant 2 : index
    %c0_375 = arith.constant 0 : index
    %1071 = vector.load %arg3[%c0_373, %1070, %c2_374, %c0_375] : memref<1x16x16x128xf32, #tpu.memory_space<vmem>>, vector<1x1x13x128xf32>
    %1072 = vector.shape_cast %1071 : vector<1x1x13x128xf32> to vector<13x128xf32>
    %1073 = vector.broadcast %34 : vector<1x128xf32> to vector<13x128xf32>
    %1074 = arith.mulf %1072, %1073 : vector<13x128xf32>
    %1075 = arith.addf %1063, %1074 : vector<13x128xf32>
    %1076 = vector.broadcast %22 : vector<1x128xf32> to vector<13x128xf32>
    %1077 = arith.mulf %1072, %1076 : vector<13x128xf32>
    %1078 = arith.addf %1066, %1077 : vector<13x128xf32>
    %1079 = vector.broadcast %10 : vector<1x128xf32> to vector<13x128xf32>
    %1080 = arith.mulf %1072, %1079 : vector<13x128xf32>
    %1081 = arith.addf %1069, %1080 : vector<13x128xf32>
    %c0_376 = arith.constant 0 : index
    %1082 = arith.index_cast %1045 : i32 to index
    %c3_377 = arith.constant 3 : index
    %c0_378 = arith.constant 0 : index
    %1083 = vector.load %arg3[%c0_376, %1082, %c3_377, %c0_378] : memref<1x16x16x128xf32, #tpu.memory_space<vmem>>, vector<1x1x13x128xf32>
    %1084 = vector.shape_cast %1083 : vector<1x1x13x128xf32> to vector<13x128xf32>
    %1085 = vector.broadcast %37 : vector<1x128xf32> to vector<13x128xf32>
    %1086 = arith.mulf %1084, %1085 : vector<13x128xf32>
    %1087 = arith.addf %1075, %1086 : vector<13x128xf32>
    %1088 = vector.broadcast %25 : vector<1x128xf32> to vector<13x128xf32>
    %1089 = arith.mulf %1084, %1088 : vector<13x128xf32>
    %1090 = arith.addf %1078, %1089 : vector<13x128xf32>
    %1091 = vector.broadcast %13 : vector<1x128xf32> to vector<13x128xf32>
    %1092 = arith.mulf %1084, %1091 : vector<13x128xf32>
    %1093 = arith.addf %1081, %1092 : vector<13x128xf32>
    %c3_i32_379 = arith.constant 3 : i32
    %1094 = arith.addi %978, %c3_i32_379 : i32
    %c0_380 = arith.constant 0 : index
    %1095 = arith.index_cast %1094 : i32 to index
    %c0_381 = arith.constant 0 : index
    %c0_382 = arith.constant 0 : index
    %1096 = vector.load %arg3[%c0_380, %1095, %c0_381, %c0_382] : memref<1x16x16x128xf32, #tpu.memory_space<vmem>>, vector<1x1x13x128xf32>
    %1097 = vector.shape_cast %1096 : vector<1x1x13x128xf32> to vector<13x128xf32>
    %1098 = vector.broadcast %40 : vector<1x128xf32> to vector<13x128xf32>
    %1099 = arith.mulf %1097, %1098 : vector<13x128xf32>
    %1100 = arith.addf %1087, %1099 : vector<13x128xf32>
    %1101 = vector.broadcast %28 : vector<1x128xf32> to vector<13x128xf32>
    %1102 = arith.mulf %1097, %1101 : vector<13x128xf32>
    %1103 = arith.addf %1090, %1102 : vector<13x128xf32>
    %1104 = vector.broadcast %16 : vector<1x128xf32> to vector<13x128xf32>
    %1105 = arith.mulf %1097, %1104 : vector<13x128xf32>
    %1106 = arith.addf %1093, %1105 : vector<13x128xf32>
    %1107 = vector.broadcast %4 : vector<1x128xf32> to vector<13x128xf32>
    %1108 = arith.mulf %1097, %1107 : vector<13x128xf32>
    %1109 = arith.addf %982, %1108 : vector<13x128xf32>
    %c0_383 = arith.constant 0 : index
    %1110 = arith.index_cast %1094 : i32 to index
    %c1_384 = arith.constant 1 : index
    %c0_385 = arith.constant 0 : index
    %1111 = vector.load %arg3[%c0_383, %1110, %c1_384, %c0_385] : memref<1x16x16x128xf32, #tpu.memory_space<vmem>>, vector<1x1x13x128xf32>
    %1112 = vector.shape_cast %1111 : vector<1x1x13x128xf32> to vector<13x128xf32>
    %1113 = vector.broadcast %43 : vector<1x128xf32> to vector<13x128xf32>
    %1114 = arith.mulf %1112, %1113 : vector<13x128xf32>
    %1115 = arith.addf %1100, %1114 : vector<13x128xf32>
    %1116 = vector.broadcast %31 : vector<1x128xf32> to vector<13x128xf32>
    %1117 = arith.mulf %1112, %1116 : vector<13x128xf32>
    %1118 = arith.addf %1103, %1117 : vector<13x128xf32>
    %1119 = vector.broadcast %19 : vector<1x128xf32> to vector<13x128xf32>
    %1120 = arith.mulf %1112, %1119 : vector<13x128xf32>
    %1121 = arith.addf %1106, %1120 : vector<13x128xf32>
    %1122 = vector.broadcast %7 : vector<1x128xf32> to vector<13x128xf32>
    %1123 = arith.mulf %1112, %1122 : vector<13x128xf32>
    %1124 = arith.addf %1109, %1123 : vector<13x128xf32>
    %c0_386 = arith.constant 0 : index
    %1125 = arith.index_cast %1094 : i32 to index
    %c2_387 = arith.constant 2 : index
    %c0_388 = arith.constant 0 : index
    %1126 = vector.load %arg3[%c0_386, %1125, %c2_387, %c0_388] : memref<1x16x16x128xf32, #tpu.memory_space<vmem>>, vector<1x1x13x128xf32>
    %1127 = vector.shape_cast %1126 : vector<1x1x13x128xf32> to vector<13x128xf32>
    %1128 = vector.broadcast %46 : vector<1x128xf32> to vector<13x128xf32>
    %1129 = arith.mulf %1127, %1128 : vector<13x128xf32>
    %1130 = arith.addf %1115, %1129 : vector<13x128xf32>
    %1131 = vector.broadcast %34 : vector<1x128xf32> to vector<13x128xf32>
    %1132 = arith.mulf %1127, %1131 : vector<13x128xf32>
    %1133 = arith.addf %1118, %1132 : vector<13x128xf32>
    %1134 = vector.broadcast %22 : vector<1x128xf32> to vector<13x128xf32>
    %1135 = arith.mulf %1127, %1134 : vector<13x128xf32>
    %1136 = arith.addf %1121, %1135 : vector<13x128xf32>
    %1137 = vector.broadcast %10 : vector<1x128xf32> to vector<13x128xf32>
    %1138 = arith.mulf %1127, %1137 : vector<13x128xf32>
    %1139 = arith.addf %1124, %1138 : vector<13x128xf32>
    %c0_389 = arith.constant 0 : index
    %1140 = arith.index_cast %1094 : i32 to index
    %c3_390 = arith.constant 3 : index
    %c0_391 = arith.constant 0 : index
    %1141 = vector.load %arg3[%c0_389, %1140, %c3_390, %c0_391] : memref<1x16x16x128xf32, #tpu.memory_space<vmem>>, vector<1x1x13x128xf32>
    %1142 = vector.shape_cast %1141 : vector<1x1x13x128xf32> to vector<13x128xf32>
    %1143 = vector.broadcast %49 : vector<1x128xf32> to vector<13x128xf32>
    %1144 = arith.mulf %1142, %1143 : vector<13x128xf32>
    %1145 = arith.addf %1130, %1144 : vector<13x128xf32>
    %1146 = vector.broadcast %37 : vector<1x128xf32> to vector<13x128xf32>
    %1147 = arith.mulf %1142, %1146 : vector<13x128xf32>
    %1148 = arith.addf %1133, %1147 : vector<13x128xf32>
    %1149 = vector.broadcast %25 : vector<1x128xf32> to vector<13x128xf32>
    %1150 = arith.mulf %1142, %1149 : vector<13x128xf32>
    %1151 = arith.addf %1136, %1150 : vector<13x128xf32>
    %1152 = vector.broadcast %13 : vector<1x128xf32> to vector<13x128xf32>
    %1153 = arith.mulf %1142, %1152 : vector<13x128xf32>
    %1154 = arith.addf %1139, %1153 : vector<13x128xf32>
    %c4_i32_392 = arith.constant 4 : i32
    %1155 = arith.addi %978, %c4_i32_392 : i32
    %c0_393 = arith.constant 0 : index
    %1156 = arith.index_cast %1155 : i32 to index
    %c0_394 = arith.constant 0 : index
    %c0_395 = arith.constant 0 : index
    %1157 = vector.load %arg3[%c0_393, %1156, %c0_394, %c0_395] : memref<1x16x16x128xf32, #tpu.memory_space<vmem>>, vector<1x1x13x128xf32>
    %1158 = vector.shape_cast %1157 : vector<1x1x13x128xf32> to vector<13x128xf32>
    %1159 = vector.broadcast %40 : vector<1x128xf32> to vector<13x128xf32>
    %1160 = arith.mulf %1158, %1159 : vector<13x128xf32>
    %1161 = arith.addf %1148, %1160 : vector<13x128xf32>
    %1162 = vector.broadcast %28 : vector<1x128xf32> to vector<13x128xf32>
    %1163 = arith.mulf %1158, %1162 : vector<13x128xf32>
    %1164 = arith.addf %1151, %1163 : vector<13x128xf32>
    %1165 = vector.broadcast %16 : vector<1x128xf32> to vector<13x128xf32>
    %1166 = arith.mulf %1158, %1165 : vector<13x128xf32>
    %1167 = arith.addf %1154, %1166 : vector<13x128xf32>
    %c0_396 = arith.constant 0 : index
    %1168 = arith.index_cast %1155 : i32 to index
    %c1_397 = arith.constant 1 : index
    %c0_398 = arith.constant 0 : index
    %1169 = vector.load %arg3[%c0_396, %1168, %c1_397, %c0_398] : memref<1x16x16x128xf32, #tpu.memory_space<vmem>>, vector<1x1x13x128xf32>
    %1170 = vector.shape_cast %1169 : vector<1x1x13x128xf32> to vector<13x128xf32>
    %1171 = vector.broadcast %43 : vector<1x128xf32> to vector<13x128xf32>
    %1172 = arith.mulf %1170, %1171 : vector<13x128xf32>
    %1173 = arith.addf %1161, %1172 : vector<13x128xf32>
    %1174 = vector.broadcast %31 : vector<1x128xf32> to vector<13x128xf32>
    %1175 = arith.mulf %1170, %1174 : vector<13x128xf32>
    %1176 = arith.addf %1164, %1175 : vector<13x128xf32>
    %1177 = vector.broadcast %19 : vector<1x128xf32> to vector<13x128xf32>
    %1178 = arith.mulf %1170, %1177 : vector<13x128xf32>
    %1179 = arith.addf %1167, %1178 : vector<13x128xf32>
    %c0_399 = arith.constant 0 : index
    %1180 = arith.index_cast %1155 : i32 to index
    %c2_400 = arith.constant 2 : index
    %c0_401 = arith.constant 0 : index
    %1181 = vector.load %arg3[%c0_399, %1180, %c2_400, %c0_401] : memref<1x16x16x128xf32, #tpu.memory_space<vmem>>, vector<1x1x13x128xf32>
    %1182 = vector.shape_cast %1181 : vector<1x1x13x128xf32> to vector<13x128xf32>
    %1183 = vector.broadcast %46 : vector<1x128xf32> to vector<13x128xf32>
    %1184 = arith.mulf %1182, %1183 : vector<13x128xf32>
    %1185 = arith.addf %1173, %1184 : vector<13x128xf32>
    %1186 = vector.broadcast %34 : vector<1x128xf32> to vector<13x128xf32>
    %1187 = arith.mulf %1182, %1186 : vector<13x128xf32>
    %1188 = arith.addf %1176, %1187 : vector<13x128xf32>
    %1189 = vector.broadcast %22 : vector<1x128xf32> to vector<13x128xf32>
    %1190 = arith.mulf %1182, %1189 : vector<13x128xf32>
    %1191 = arith.addf %1179, %1190 : vector<13x128xf32>
    %c0_402 = arith.constant 0 : index
    %1192 = arith.index_cast %1155 : i32 to index
    %c3_403 = arith.constant 3 : index
    %c0_404 = arith.constant 0 : index
    %1193 = vector.load %arg3[%c0_402, %1192, %c3_403, %c0_404] : memref<1x16x16x128xf32, #tpu.memory_space<vmem>>, vector<1x1x13x128xf32>
    %1194 = vector.shape_cast %1193 : vector<1x1x13x128xf32> to vector<13x128xf32>
    %1195 = vector.broadcast %49 : vector<1x128xf32> to vector<13x128xf32>
    %1196 = arith.mulf %1194, %1195 : vector<13x128xf32>
    %1197 = arith.addf %1185, %1196 : vector<13x128xf32>
    %1198 = vector.broadcast %37 : vector<1x128xf32> to vector<13x128xf32>
    %1199 = arith.mulf %1194, %1198 : vector<13x128xf32>
    %1200 = arith.addf %1188, %1199 : vector<13x128xf32>
    %1201 = vector.broadcast %25 : vector<1x128xf32> to vector<13x128xf32>
    %1202 = arith.mulf %1194, %1201 : vector<13x128xf32>
    %1203 = arith.addf %1191, %1202 : vector<13x128xf32>
    %c5_i32_405 = arith.constant 5 : i32
    %1204 = arith.addi %978, %c5_i32_405 : i32
    %c0_406 = arith.constant 0 : index
    %1205 = arith.index_cast %1204 : i32 to index
    %c0_407 = arith.constant 0 : index
    %c0_408 = arith.constant 0 : index
    %1206 = vector.load %arg3[%c0_406, %1205, %c0_407, %c0_408] : memref<1x16x16x128xf32, #tpu.memory_space<vmem>>, vector<1x1x13x128xf32>
    %1207 = vector.shape_cast %1206 : vector<1x1x13x128xf32> to vector<13x128xf32>
    %1208 = vector.broadcast %40 : vector<1x128xf32> to vector<13x128xf32>
    %1209 = arith.mulf %1207, %1208 : vector<13x128xf32>
    %1210 = arith.addf %1200, %1209 : vector<13x128xf32>
    %1211 = vector.broadcast %28 : vector<1x128xf32> to vector<13x128xf32>
    %1212 = arith.mulf %1207, %1211 : vector<13x128xf32>
    %1213 = arith.addf %1203, %1212 : vector<13x128xf32>
    %c0_409 = arith.constant 0 : index
    %1214 = arith.index_cast %1204 : i32 to index
    %c1_410 = arith.constant 1 : index
    %c0_411 = arith.constant 0 : index
    %1215 = vector.load %arg3[%c0_409, %1214, %c1_410, %c0_411] : memref<1x16x16x128xf32, #tpu.memory_space<vmem>>, vector<1x1x13x128xf32>
    %1216 = vector.shape_cast %1215 : vector<1x1x13x128xf32> to vector<13x128xf32>
    %1217 = vector.broadcast %43 : vector<1x128xf32> to vector<13x128xf32>
    %1218 = arith.mulf %1216, %1217 : vector<13x128xf32>
    %1219 = arith.addf %1210, %1218 : vector<13x128xf32>
    %1220 = vector.broadcast %31 : vector<1x128xf32> to vector<13x128xf32>
    %1221 = arith.mulf %1216, %1220 : vector<13x128xf32>
    %1222 = arith.addf %1213, %1221 : vector<13x128xf32>
    %c0_412 = arith.constant 0 : index
    %1223 = arith.index_cast %1204 : i32 to index
    %c2_413 = arith.constant 2 : index
    %c0_414 = arith.constant 0 : index
    %1224 = vector.load %arg3[%c0_412, %1223, %c2_413, %c0_414] : memref<1x16x16x128xf32, #tpu.memory_space<vmem>>, vector<1x1x13x128xf32>
    %1225 = vector.shape_cast %1224 : vector<1x1x13x128xf32> to vector<13x128xf32>
    %1226 = vector.broadcast %46 : vector<1x128xf32> to vector<13x128xf32>
    %1227 = arith.mulf %1225, %1226 : vector<13x128xf32>
    %1228 = arith.addf %1219, %1227 : vector<13x128xf32>
    %1229 = vector.broadcast %34 : vector<1x128xf32> to vector<13x128xf32>
    %1230 = arith.mulf %1225, %1229 : vector<13x128xf32>
    %1231 = arith.addf %1222, %1230 : vector<13x128xf32>
    %c0_415 = arith.constant 0 : index
    %1232 = arith.index_cast %1204 : i32 to index
    %c3_416 = arith.constant 3 : index
    %c0_417 = arith.constant 0 : index
    %1233 = vector.load %arg3[%c0_415, %1232, %c3_416, %c0_417] : memref<1x16x16x128xf32, #tpu.memory_space<vmem>>, vector<1x1x13x128xf32>
    %1234 = vector.shape_cast %1233 : vector<1x1x13x128xf32> to vector<13x128xf32>
    %1235 = vector.broadcast %49 : vector<1x128xf32> to vector<13x128xf32>
    %1236 = arith.mulf %1234, %1235 : vector<13x128xf32>
    %1237 = arith.addf %1228, %1236 : vector<13x128xf32>
    %1238 = vector.broadcast %37 : vector<1x128xf32> to vector<13x128xf32>
    %1239 = arith.mulf %1234, %1238 : vector<13x128xf32>
    %1240 = arith.addf %1231, %1239 : vector<13x128xf32>
    %c6_i32_418 = arith.constant 6 : i32
    %1241 = arith.addi %978, %c6_i32_418 : i32
    %c0_419 = arith.constant 0 : index
    %1242 = arith.index_cast %1241 : i32 to index
    %c0_420 = arith.constant 0 : index
    %c0_421 = arith.constant 0 : index
    %1243 = vector.load %arg3[%c0_419, %1242, %c0_420, %c0_421] : memref<1x16x16x128xf32, #tpu.memory_space<vmem>>, vector<1x1x13x128xf32>
    %1244 = vector.shape_cast %1243 : vector<1x1x13x128xf32> to vector<13x128xf32>
    %1245 = vector.broadcast %40 : vector<1x128xf32> to vector<13x128xf32>
    %1246 = arith.mulf %1244, %1245 : vector<13x128xf32>
    %1247 = arith.addf %1240, %1246 : vector<13x128xf32>
    %c0_422 = arith.constant 0 : index
    %1248 = arith.index_cast %1241 : i32 to index
    %c1_423 = arith.constant 1 : index
    %c0_424 = arith.constant 0 : index
    %1249 = vector.load %arg3[%c0_422, %1248, %c1_423, %c0_424] : memref<1x16x16x128xf32, #tpu.memory_space<vmem>>, vector<1x1x13x128xf32>
    %1250 = vector.shape_cast %1249 : vector<1x1x13x128xf32> to vector<13x128xf32>
    %1251 = vector.broadcast %43 : vector<1x128xf32> to vector<13x128xf32>
    %1252 = arith.mulf %1250, %1251 : vector<13x128xf32>
    %1253 = arith.addf %1247, %1252 : vector<13x128xf32>
    %c0_425 = arith.constant 0 : index
    %1254 = arith.index_cast %1241 : i32 to index
    %c2_426 = arith.constant 2 : index
    %c0_427 = arith.constant 0 : index
    %1255 = vector.load %arg3[%c0_425, %1254, %c2_426, %c0_427] : memref<1x16x16x128xf32, #tpu.memory_space<vmem>>, vector<1x1x13x128xf32>
    %1256 = vector.shape_cast %1255 : vector<1x1x13x128xf32> to vector<13x128xf32>
    %1257 = vector.broadcast %46 : vector<1x128xf32> to vector<13x128xf32>
    %1258 = arith.mulf %1256, %1257 : vector<13x128xf32>
    %1259 = arith.addf %1253, %1258 : vector<13x128xf32>
    %c0_428 = arith.constant 0 : index
    %1260 = arith.index_cast %1241 : i32 to index
    %c3_429 = arith.constant 3 : index
    %c0_430 = arith.constant 0 : index
    %1261 = vector.load %arg3[%c0_428, %1260, %c3_429, %c0_430] : memref<1x16x16x128xf32, #tpu.memory_space<vmem>>, vector<1x1x13x128xf32>
    %1262 = vector.shape_cast %1261 : vector<1x1x13x128xf32> to vector<13x128xf32>
    %1263 = vector.broadcast %49 : vector<1x128xf32> to vector<13x128xf32>
    %1264 = arith.mulf %1262, %1263 : vector<13x128xf32>
    %1265 = arith.addf %1259, %1264 : vector<13x128xf32>
    %c0_i32_431 = arith.constant 0 : i32
    %1266 = arith.addi %978, %c0_i32_431 : i32
    %c0_432 = arith.constant 0 : index
    %1267 = arith.index_cast %1266 : i32 to index
    %c0_433 = arith.constant 0 : index
    %c0_434 = arith.constant 0 : index
    %1268 = vector.load %arg4[%c0_432, %1267, %c0_433, %c0_434] : memref<1x13x13x128xf32, #tpu.memory_space<vmem>>, vector<1x1x13x128xf32>
    %1269 = vector.shape_cast %1268 : vector<1x1x13x128xf32> to vector<13x128xf32>
    %1270 = vector.shape_cast %1145 : vector<13x128xf32> to vector<1x1x13x128xf32>
    tpu.vector_store %arg4[%c0_432, %1267, %c0_433, %c0_434], %1270 {strides = array<i32>} : memref<1x13x13x128xf32, #tpu.memory_space<vmem>>, vector<1x1x13x128xf32>,
    %c1_i32_435 = arith.constant 1 : i32
    %1271 = arith.addi %978, %c1_i32_435 : i32
    %c0_436 = arith.constant 0 : index
    %1272 = arith.index_cast %1271 : i32 to index
    %c0_437 = arith.constant 0 : index
    %c0_438 = arith.constant 0 : index
    %1273 = vector.load %arg4[%c0_436, %1272, %c0_437, %c0_438] : memref<1x13x13x128xf32, #tpu.memory_space<vmem>>, vector<1x1x13x128xf32>
    %1274 = vector.shape_cast %1273 : vector<1x1x13x128xf32> to vector<13x128xf32>
    %1275 = vector.shape_cast %1197 : vector<13x128xf32> to vector<1x1x13x128xf32>
    tpu.vector_store %arg4[%c0_436, %1272, %c0_437, %c0_438], %1275 {strides = array<i32>} : memref<1x13x13x128xf32, #tpu.memory_space<vmem>>, vector<1x1x13x128xf32>,
    %c2_i32_439 = arith.constant 2 : i32
    %1276 = arith.addi %978, %c2_i32_439 : i32
    %c0_440 = arith.constant 0 : index
    %1277 = arith.index_cast %1276 : i32 to index
    %c0_441 = arith.constant 0 : index
    %c0_442 = arith.constant 0 : index
    %1278 = vector.load %arg4[%c0_440, %1277, %c0_441, %c0_442] : memref<1x13x13x128xf32, #tpu.memory_space<vmem>>, vector<1x1x13x128xf32>
    %1279 = vector.shape_cast %1278 : vector<1x1x13x128xf32> to vector<13x128xf32>
    %1280 = vector.shape_cast %1237 : vector<13x128xf32> to vector<1x1x13x128xf32>
    tpu.vector_store %arg4[%c0_440, %1277, %c0_441, %c0_442], %1280 {strides = array<i32>} : memref<1x13x13x128xf32, #tpu.memory_space<vmem>>, vector<1x1x13x128xf32>,
    %c3_i32_443 = arith.constant 3 : i32
    %1281 = arith.addi %978, %c3_i32_443 : i32
    %c0_444 = arith.constant 0 : index
    %1282 = arith.index_cast %1281 : i32 to index
    %c0_445 = arith.constant 0 : index
    %c0_446 = arith.constant 0 : index
    %1283 = vector.load %arg4[%c0_444, %1282, %c0_445, %c0_446] : memref<1x13x13x128xf32, #tpu.memory_space<vmem>>, vector<1x1x13x128xf32>
    %1284 = vector.shape_cast %1283 : vector<1x1x13x128xf32> to vector<13x128xf32>
    %1285 = vector.shape_cast %1265 : vector<13x128xf32> to vector<1x1x13x128xf32>
    tpu.vector_store %arg4[%c0_444, %1282, %c0_445, %c0_446], %1285 {strides = array<i32>} : memref<1x13x13x128xf32, #tpu.memory_space<vmem>>, vector<1x1x13x128xf32>,
    %c4_i32_447 = arith.constant 4 : i32
    return
  }
  func.func @transform_0(%arg0: i32, %arg1: i32) -> (i32, i32, i32, i32) {
    %c0_i32 = arith.constant 0 : i32
    %c0_i32_0 = arith.constant 0 : i32
    %c0_i32_1 = arith.constant 0 : i32
    return %arg1, %c0_i32, %c0_i32_0, %arg0 : i32, i32, i32, i32
  }
  func.func @transform_1(%arg0: i32, %arg1: i32) -> (i32, i32, i32, i32) {
    %c0_i32 = arith.constant 0 : i32
    %c0_i32_0 = arith.constant 0 : i32
    %c0_i32_1 = arith.constant 0 : i32
    return %arg1, %c0_i32, %c0_i32_0, %arg0 : i32, i32, i32, i32
  }
  func.func @transform_2(%arg0: i32, %arg1: i32) -> (i32, i32, i32, i32) {
    %c0_i32 = arith.constant 0 : i32
    %c0_i32_0 = arith.constant 0 : i32
    %c0_i32_1 = arith.constant 0 : i32
    return %arg1, %c0_i32, %c0_i32_0, %arg0 : i32, i32, i32, i32
  }
}

</mosaic_0001>

<bundles_post_ra>
// kernel: tpu_custom_call.1
= control target key start
LH: loop header
LB: loop body
LE: loop exit
PB: predicated region body
PF: predicated region fallthrough
CT: control target
= control target key end

     0   :  { %7 = vsyncpa [#allocation3], 0  ;;  %s3603_s0 = inlined_call_operand.hbm [shape: f32[2,4,4,128], index: 0, kind: input, shape index: {}]   ;;  %s3604_s1 = inlined_call_operand.hbm [shape: f32[2,16,16,128], index: 1, kind: input, shape index: {}]   ;;  %s3605_s2 = inlined_call_operand.vmem [shape: f32[2,13,13,128], index: 2, kind: output, shape index: {}]  }
   0x1   :  { %9 = vsyncpa [#allocation3 + $0x1], 0 }
   0x2   :  { %10 = vsyncpa [#allocation5], 0 }
   0x3   :  { %12 = vsyncpa [#allocation5 + $0x1], 0  ;;  %s2199_s9 = smov 0   ;;  %s2201_s10 = smov 0  }
   0x4   :  { %s2203_s11 = smov 0   ;;  %s2205_s12 = smov 0  }
   0x5   :  { %s2207_s13 = smov 0   ;;  %s2209_s14 = smov 0  }
   0x6 LB: > { %s1721_s15 = sadd.s32 4294967295, %s2176_s14   ;;  %s27_s16 = sadd.s32 1, %s2172_s13  ;;  %s2176_s14 = sphi %s2209_s14, %s18_s14   ;;  %s2172_s13 = sphi %s2207_s13, %s3620_s13   ;;  %s2168_s12 = sphi %s2205_s12, %s3619_s12   ;;  %s2164_s11 = sphi %s2203_s11, %s3618_s11   ;;  %s2160_s10 = sphi %s2201_s10, %s3617_s10   ;;  %s2156_s9 = sphi %s2199_s9, %s3616_s9  }
   0x7   : > { %p28_p0 = scmp.ge.s32.totalorder %s27_s16, 2  ;;  %s39_s17 = sadd.s32 1, %s2164_s11 }
   0x8   : > { %p46_p1 = scmp.ne.s32.totalorder %s2164_s11, %s2160_s10  ;;  %p47_p2 = scmp.eq.s32.totalorder %s2176_s14, 0 }
   0x9   : > { %s3622_s16 = smov (%p28_p0, %s27_s16), 0  ;;  %p52_p4 = scmp.ne.s32.totalorder %s2160_s10, %s2156_s9 }
   0xa   : > { %p2235_p3 = por %p47_p2, %p46_p1  ;;  %s34_s19 = ssub.s32 %s2172_s13, %s3622_s16 }
   0xb   : > { %p53_p5 = scmp.eq.s32.totalorder %s1721_s15, 0  ;;  %p37_p6 = scmp.eq.s32.totalorder %s34_s19, 0 }
   0xc   : > { %p1997_p8 = scmp.lt.s32.totalorder %s2176_s14, 2  ;;  %s2251_s22 = sand.u32 1, %s2164_s11  }
   0xd   : > { %p2242_p7 = por %p53_p5, %p52_p4  ;;  %s1983_s23 = sshll.u32 %s2172_s13, 8 }
   0xe   : > { %s2248_s21 = scalar_select %p37_p6, %s2164_s11, %s39_s17  }
   0xf   : > { %s3610_s20 = scalar_select %p2242_p7, 1, 0 }
  0x10   : > { %s1725_s24 = sshll.u32 %s2251_s22, 4  ;;  %s2258_s27 = scalar_lea.hbm %s3603_s0, %s1983_s23 }
  0x11   : > { %s136_s28 = scalar_lea.vmem [#allocation2], %s1725_s24  ;;  %p2262_p9 = pnand %p1997_p8, %p2235_p3 }
  0x12   : > { %s144_s29 = sshll.u32 %s136_s28, 4  ;;  %s133_s3 = scalar_lea.sflag [#allocation3], %s2251_s22  ;;  %s2266_s29 = int_to_ptr.vmem [resolvable:$true] %s144_s29 }
  0x13   : > { %s2062_s4 = scalar_lea.hbm %s2258_s27, 256  ;;  %p2064_p11 = pneg %p2262_p9 }
  0x14   : > { %p2063_p10 = scmp.ne.s32.totalorder %s2258_s27, %s2062_s4  ;;  %s2067_s7 = scalar_lea.hbm %s3603_s0, 512 }
  0x15   : > { %p2068_p0 = scmp.lt.u32.totalorder %s2258_s27, %s3603_s0  ;;  %p2069_p1 = scmp.lt.u32.totalorder %s2067_s7, %s2062_s4 }
  0x16   : > { %p2065_p12 = pnand %p2064_p11, %p2063_p10  ;;  %p2071_p3 = scmp.lt.u32.totalorder %s2062_s4, %s2258_s27 }
  0x17   : > { %p2070_p2 = por %p2069_p1, %p2068_p0 }
  0x18   : > { %p2066_p13 = pneg %p2065_p12 }
  0x19   : > { %p2072_p4 = por %p2071_p3, %p2070_p2 }
  0x1b   : > { %p2073_p5 = pnand %p2072_p4, %p2066_p13 }
  0x1d   : > { %2076 = shalt.err (!%p2073_p5)
}
  0x1e   : > { %s2077_s15 = scalar_lea.vmem %s2266_s29, 256  ;;  %s2178_s17 = smov [#allocation2]  }
  0x1f   : > { %p2078_p6 = scmp.ne.s32.totalorder %s2266_s29, %s2077_s15  ;;  %s2082_s18 = sshll.u32 %s2178_s17, 4  ;;  %s2083_s18 = int_to_ptr.vmem [resolvable:$false] %s2082_s18 }
  0x20   : > { %s2084_s19 = scalar_lea.vmem %s2083_s18, 512  ;;  %p2085_p12 = scmp.lt.s32.totalorder %s2266_s29, %s2083_s18 }
  0x21   : > { %p2080_p8 = pnand %p2078_p6, %p2064_p11  ;;  %p2086_p0 = scmp.lt.s32.totalorder %s2084_s19, %s2077_s15 }
  0x23   : > { %p2081_p10 = pneg %p2080_p8  ;;  %p2087_p1 = por %p2086_p0, %p2085_p12 }
  0x25   : > { %p2088_p2 = pnand %p2087_p1, %p2081_p10 }
  0x27   : > { %2091 = shalt.err (!%p2088_p2)
}
  0x28   : > { %s2179_s23 = smov 64   ;;  %s2180_s24 = smov 4  }
  0x29   : > { %1993 = dma.hbm_to_vmem [thread:$0]  (!%p2262_p9), %s2258_s27, 256, %s2266_s29, %s133_s3, %s2179_s23, %s2179_s23, %s2180_s24  }
  0x2a   : > { %p1731_p13 = scmp.ge.s32.totalorder %s2176_s14, 1  ;;  %p174_p3 = scmp.lt.s32.totalorder %s2176_s14, 3 }
  0x2b   : > { %s1728_s25 = sshll.u32 %s2251_s22, 8  ;;  %s1984_s28 = sshll.u32 %s2172_s13, 12 }
  0x2c   : > { %p2299_p4 = pnand %p1731_p13, %p174_p3  ;;  %s158_s4 = scalar_lea.vmem [#allocation4], %s1728_s25 }
  0x2d   : > { %s166_s5 = sshll.u32 %s158_s4, 4  ;;  %s2307_s8 = scalar_lea.hbm %s3604_s1, %s1984_s28  ;;  %s2309_s5 = int_to_ptr.vmem [resolvable:$true] %s166_s5 }
  0x2e   : > { %s155_s27 = scalar_lea.sflag [#allocation5], %s2251_s22  ;;  %s2092_s29 = scalar_lea.hbm %s2307_s8, 4096 }
  0x2f   : > { %p2093_p5 = scmp.ne.s32.totalorder %s2307_s8, %s2092_s29  ;;  %s2097_s15 = scalar_lea.hbm %s3604_s1, 8192 }
  0x30   : > { %p2098_p10 = scmp.lt.u32.totalorder %s2307_s8, %s3604_s1  ;;  %p2099_p12 = scmp.lt.u32.totalorder %s2097_s15, %s2092_s29 }
  0x31   : > { %p2095_p6 = pnand %p2093_p5, %p2064_p11  ;;  %p2101_p1 = scmp.lt.u32.totalorder %s2092_s29, %s2307_s8 }
  0x32   : > { %p2100_p0 = por %p2099_p12, %p2098_p10 }
  0x33   : > { %p2096_p8 = pneg %p2095_p6 }
  0x34   : > { %p2102_p2 = por %p2101_p1, %p2100_p0 }
  0x36   : > { %p2103_p13 = pnand %p2102_p2, %p2096_p8 }
  0x38   : > { %2106 = shalt.err (!%p2103_p13)
}
  0x39   : > { %s2107_s19 = scalar_lea.vmem %s2309_s5, 4096  ;;  %s2181_s23 = smov [#allocation4]  }
  0x3a   : > { %p2108_p3 = scmp.ne.s32.totalorder %s2309_s5, %s2107_s19  ;;  %s2112_s24 = sshll.u32 %s2181_s23, 4  ;;  %s2113_s24 = int_to_ptr.vmem [resolvable:$false] %s2112_s24 }
  0x3b   : > { %s2114_s25 = scalar_lea.vmem %s2113_s24, 8192  ;;  %p2115_p7 = scmp.lt.s32.totalorder %s2309_s5, %s2113_s24 }
  0x3c   : > { %p2110_p5 = pnand %p2108_p3, %p2064_p11  ;;  %p2116_p10 = scmp.lt.s32.totalorder %s2114_s25, %s2107_s19 }
  0x3e   : > { %p2111_p6 = pneg %p2110_p5  ;;  %p2117_p12 = por %p2116_p10, %p2115_p7 }
  0x40   : > { %p2118_p0 = pnand %p2117_p12, %p2111_p6 }
  0x42   : > { %2121 = shalt.err (!%p2118_p0)
}
  0x43   : > { %s2182_s28 = smov 128   ;;  %s2183_s4 = smov 8  }
  0x44   : > { %1996 = dma.hbm_to_vmem [thread:$0]  (!%p2262_p9), %s2307_s8, 4096, %s2309_s5, %s155_s27, %s2182_s28, %s2182_s28, %s2183_s4  }
  0x45   : > { %178 = sbr.rel (%p2299_p4) target bundleno = 326 (0x146), region = 28 }
  0x4c   : > { %s180_s6 = sand.u32 1, %s2160_s10   ;;  %p3613_p7 = scmp.ne.s32.totalorder %s3610_s20, 0 }
  0x4d   : > { %s1732_s7 = sshll.u32 %s180_s6, 4  ;;  %s181_s29 = scalar_lea.sflag [#allocation3], %s180_s6 }
  0x4e   : > { %s184_s3 = scalar_lea.vmem [#allocation2], %s1732_s7 }
  0x4f   : > { %2147 = dma.done.wait (%p3613_p7), %s181_s29, 256  }
  0x50   : > { %2149 = vsyncadd (%p3613_p7), %s181_s29, 4294967040  ;;  %s1733_s9 = sshll.u32 %s180_s6, 8  ;;  %s190_s15 = scalar_lea.sflag [#allocation5], %s180_s6 }
  0x51   : > { %s2344_s30 = scalar_lea.vmem [#allocation4], %s1733_s9 }
  0x52   : > { %2151 = dma.done.wait (%p3613_p7), %s190_s15, 4096  }
  0x53   : > { %2153 = vsyncadd (%p3613_p7), %s190_s15, 4294963200  ;;  %v236_v0 = vlaneseq  ;;  %v230_v6 = vld [vmem:[%s184_s3] sm:$0xf]  ;;  %v231_v7 = vld [vmem:[%s184_s3 + $0x4] sm:$0xf]  ;;  %p222_p9 = scmp.lt.s32.totalorder %s2168_s12, 1 }
  0x54   : > { %v232_v8 = vld [vmem:[%s184_s3 + $0x8] sm:$0xf]  ;;  %v233_v11 = vld [vmem:[%s184_s3 + $0xc] sm:$0xf] }
  0x55   : > { %v237_v1 = vshrl.u32 %v236_v0, 7  ;;  %v1862_v22 = vld [vmem:[%s2344_s30 + $0x98] sm:$0x1f]  ;;  %v1870_v30 = vld [vmem:[%s2344_s30 + $0xa8] sm:$0x1f]  ;;  %s3624_s12 = smov (!%p222_p9, %s2168_s12), 1 }
  0x56   : > { %v1864_v23 = vld [vmem:[%s2344_s30 + $0x99] sm:$0x1f]  ;;  %v1872_v35 = vld [vmem:[%s2344_s30 + $0xa9] sm:$0x1f]  ;;  %s1985_s20 = smul.u32 208, %s3624_s12 }
  0x57   : > { %v238_v2 = vsub.s32 0, %v237_v1  ;;  %v248_v3 = vsub.s32 1, %v237_v1  ;;  %v258_v4 = vsub.s32 2, %v237_v1  ;;  %v268_v5 = vsub.s32 3, %v237_v1  ;;  %v1866_v28 = vld [vmem:[%s2344_s30 + $0x9a] sm:$0x1f] }
  0x58   : > { %v1868_v29 = vld [vmem:[%s2344_s30 + $0x9b] sm:$0x1f]  ;;  %v1874_v36 = vld [vmem:[%s2344_s30 + $0xaa] sm:$0x1f]  ;;  %s2552_s26 = scalar_lea.vmem %s3605_s2, %s1985_s20 }
  0x59   : > { %v2350_v9 = vrot.slane %v230_v6, %v238_v2  ;;  %v2352_v10 = vrot.slane %v230_v6, %v248_v3  ;;  %v2354_v12 = vrot.slane %v230_v6, %v258_v4  ;;  %v2356_v13 = vrot.slane %v230_v6, %v268_v5  ;;  %v1876_v37 = vld [vmem:[%s2344_s30 + $0xab] sm:$0x1f]  ;;  %v1878_v42 = vld [vmem:[%s2344_s30 + $0xb8] sm:$0x1f] }
  0x5a   : > { %v2358_v14 = vrot.slane %v231_v7, %v238_v2  ;;  %v2360_v15 = vrot.slane %v231_v7, %v248_v3  ;;  %v2362_v16 = vrot.slane %v231_v7, %v258_v4  ;;  %v2364_v17 = vrot.slane %v231_v7, %v268_v5  ;;  %v1880_v43 = vld [vmem:[%s2344_s30 + $0xb9] sm:$0x1f]  ;;  %v1886_v54 = vld [vmem:[%s2344_s30 + $0xc8] sm:$0x1f] }
  0x5b   : > { %v2366_v18 = vrot.slane %v232_v8, %v238_v2  ;;  %v2368_v19 = vrot.slane %v232_v8, %v248_v3  ;;  %v2370_v20 = vrot.slane %v232_v8, %v258_v4  ;;  %v2372_v21 = vrot.slane %v232_v8, %v268_v5  ;;  %v1882_v44 = vld [vmem:[%s2344_s30 + $0xba] sm:$0x1f]  ;;  %v1888_v59 = vld [vmem:[%s2344_s30 + $0xc9] sm:$0x1f] }
  0x5c   : > { %v2376_v24 = vrot.slane %v233_v11, %v238_v2  ;;  %v2378_v25 = vrot.slane %v233_v11, %v248_v3  ;;  %v986_v26 = vmul.f32 %v1862_v22, %v2350_v9  ;;  %v996_v27 = vmul.f32 %v1864_v23, %v2352_v10  ;;  %v1884_v49 = vld [vmem:[%s2344_s30 + $0xbb] sm:$0x1f]  ;;  %v1890_v0 = vld [vmem:[%s2344_s30 + $0xca] sm:$0x1f] }
  0x5d   : > { %v2385_v31 = vrot.slane %v233_v11, %v258_v4  ;;  %v2387_v32 = vrot.slane %v233_v11, %v268_v5  ;;  %v1006_v33 = vmul.f32 %v1866_v28, %v2354_v12  ;;  %v1016_v34 = vmul.f32 %v1868_v29, %v2356_v13  ;;  %v1892_v11 = vld [vmem:[%s2344_s30 + $0xcb] sm:$0x1f] }
  0x5e   : > { %v998_v38 = vadd.f32 %v996_v27, %v986_v26  ;;  %v1026_v39 = vmul.f32 %v1870_v30, %v2358_v14  ;;  %v1030_v40 = vmul.f32 %v1870_v30, %v2350_v9  ;;  %v1040_v41 = vmul.f32 %v1872_v35, %v2360_v15 }
  0x5f   : > { %3614 = vst [vmem:[#allocation8_spill] sm:$0xff] %v2385_v31  ;;  %v1044_v45 = vmul.f32 %v1872_v35, %v2352_v10  ;;  %v1054_v46 = vmul.f32 %v1874_v36, %v2362_v16  ;;  %v1058_v47 = vmul.f32 %v1874_v36, %v2354_v12  ;;  %v1068_v48 = vmul.f32 %v1876_v37, %v2364_v17  ;;  %v1896_v35 = vld [vmem:[%s2344_s30 + $0xd9] sm:$0x1f] }
  0x60   : > { %v1008_v50 = vadd.f32 %v1006_v33, %v998_v38  ;;  %v1072_v51 = vmul.f32 %v1876_v37, %v2356_v13  ;;  %v1091_v52 = vmul.f32 %v1878_v42, %v2350_v9  ;;  %v1109_v53 = vmul.f32 %v1880_v43, %v2352_v10 }
  0x61   : > { %v1083_v55 = vmul.f32 %v1878_v42, %v2366_v18  ;;  %v2411_v56 = vmul.f32 %v1880_v43, %v2368_v19  ;;  %v2414_v57 = vmul.f32 %v1882_v44, %v2370_v20  ;;  %v1127_v58 = vmul.f32 %v1882_v44, %v2354_v12 }
  0x62   : > { %v1018_v60 = vadd.f32 %v1016_v34, %v1008_v50  ;;  %v1111_v61 = vadd.f32 %v1109_v53, %v1091_v52  ;;  %v2419_v62 = vmul.f32 %v1884_v49, %v2372_v21  ;;  %v1145_v63 = vmul.f32 %v1884_v49, %v2356_v13  ;;  %v1894_v34 = vld [vmem:[%s2344_s30 + $0xd8] sm:$0x1f] }
  0x63   : > { %v2424_v1 = vmul.f32 %v1886_v54, %v2376_v24  ;;  %v2427_v2 = vmul.f32 %v1886_v54, %v2366_v18  ;;  %v1160_v3 = vmul.f32 %v1886_v54, %v2358_v14  ;;  %v2431_v4 = vmul.f32 %v1888_v59, %v2378_v25  ;;  %v1902_v54 = vld [vmem:[%s2344_s30 + $0xe8] sm:$0x1f] }
  0x64   : > { %v1028_v5 = vadd.f32 %v1026_v39, %v1018_v60  ;;  %v1129_v6 = vadd.f32 %v1127_v58, %v1111_v61  ;;  %v2434_v7 = vmul.f32 %v1888_v59, %v2368_v19  ;;  %v1174_v8 = vmul.f32 %v1888_v59, %v2360_v15 }
  0x65   : > { %v2439_v22 = vmul.f32 %v1890_v0, %v2385_v31  ;;  %v2442_v23 = vmul.f32 %v1890_v0, %v2370_v20  ;;  %v1188_v26 = vmul.f32 %v1890_v0, %v2362_v16  ;;  %v2446_v27 = vmul.f32 %v1892_v11, %v2387_v32  ;;  %v244_v0 = vld [vmem:[%s2344_s30 + $0x1] sm:$0xff] }
  0x66   : > { %v1042_v28 = vadd.f32 %v1040_v41, %v1028_v5  ;;  %v1147_v29 = vadd.f32 %v1145_v63, %v1129_v6  ;;  %v2449_v30 = vmul.f32 %v1892_v11, %v2372_v21  ;;  %v1046_v33 = vadd.f32 %v1044_v45, %v1030_v40  ;;  %v1898_v40 = vld [vmem:[%s2344_s30 + $0xda] sm:$0x1f]  ;;  %v234_v63 = vld [vmem:[%s2344_s30] sm:$0xff] }
  0x67   : > { %v1202_v36 = vmul.f32 %v1892_v11, %v2364_v17  ;;  %v1087_v37 = vmul.f32 %v1878_v42, %v2358_v14  ;;  %v1105_v38 = vmul.f32 %v1880_v43, %v2360_v15  ;;  %v1123_v39 = vmul.f32 %v1882_v44, %v2362_v16  ;;  %v1900_v45 = vld [vmem:[%s2344_s30 + $0xdb] sm:$0x1f] }
  0x68   : > { %v1056_v50 = vadd.f32 %v1054_v46, %v1042_v28  ;;  %v1162_v41 = vadd.f32 %v1160_v3, %v1147_v29  ;;  %v1060_v52 = vadd.f32 %v1058_v47, %v1046_v33  ;;  %v1141_v53 = vmul.f32 %v1884_v49, %v2364_v17  ;;  %v1904_v46 = vld [vmem:[%s2344_s30 + $0xe9] sm:$0x1f] }
  0x69   : > { %v2462_v58 = vmul.f32 %v1894_v34, %v2376_v24  ;;  %v1213_v42 = vmul.f32 %v1894_v34, %v2366_v18  ;;  %v2466_v43 = vmul.f32 %v1896_v35, %v2378_v25  ;;  %v1223_v44 = vmul.f32 %v1896_v35, %v2368_v19  ;;  %v1906_v47 = vld [vmem:[%s2344_s30 + $0xea] sm:$0x1f]  ;;  %v254_v3 = vld [vmem:[%s2344_s30 + $0x2] sm:$0xff]  ;;  %v1735_v35 = vld [vmem:[%s2344_s30 + $0x10] sm:$0xff] }
  0x6a   : > { %v1070_v59 = vadd.f32 %v1068_v48, %v1056_v50  ;;  %v1176_v49 = vadd.f32 %v1174_v8, %v1162_v41  ;;  %v1074_v60 = vadd.f32 %v1072_v51, %v1060_v52  ;;  %v2472_v61 = vmul.f32 %v1898_v40, %v2385_v31  ;;  %v1908_v8 = vld [vmem:[%s2344_s30 + $0xeb] sm:$0x1f]  ;;  %v264_v34 = vld [vmem:[%s2344_s30 + $0x3] sm:$0xff]  ;;  %v1737_v50 = vld [vmem:[%s2344_s30 + $0x11] sm:$0xff] }
  0x6b   : > { %v1233_v5 = vmul.f32 %v1898_v40, %v2370_v20  ;;  %v2479_v6 = vmul.f32 %v1900_v45, %v2387_v32  ;;  %v1243_v11 = vmul.f32 %v1900_v45, %v2372_v21  ;;  %v2483_v48 = vmul.f32 %v1902_v54, %v2376_v24 }
  0x6c   : > { %v1085_v51 = vadd.f32 %v1083_v55, %v1070_v59  ;;  %v1190_v28 = vadd.f32 %v1188_v26, %v1176_v49  ;;  %v1089_v29 = vadd.f32 %v1087_v37, %v1074_v60  ;;  %v2487_v33 = vmul.f32 %v1904_v46, %v2378_v25  ;;  %v1739_v46 = vld [vmem:[%s2344_s30 + $0x12] sm:$0xff] }
  0x6d   : > { %v2494_v41 = vmul.f32 %v1906_v47, %v2385_v31  ;;  %v240_v52 = vmul.f32 %v2350_v9, %v234_v63  ;;  %v250_v40 = vmul.f32 %v2352_v10, %v244_v0  ;;  %v260_v55 = vmul.f32 %v2354_v12, %v254_v3  ;;  %v1741_v63 = vld [vmem:[%s2344_s30 + $0x13] sm:$0xff] }
  0x6e   : > { %v1103_v26 = vadd.f32 %v2411_v56, %v1085_v51  ;;  %v1204_v37 = vadd.f32 %v1202_v36, %v1190_v28  ;;  %v1107_v45 = vadd.f32 %v1105_v38, %v1089_v29  ;;  %v2501_v54 = vmul.f32 %v1908_v8, %v2387_v32  ;;  %v1743_v28 = vld [vmem:[%s2344_s30 + $0x20] sm:$0xff] }
  0x6f   : > { %v252_v59 = vadd.f32 %v250_v40, %v240_v52  ;;  %v270_v47 = vmul.f32 %v2356_v13, %v264_v34  ;;  %v285_v49 = vmul.f32 %v1735_v35, %v2350_v9  ;;  %v299_v60 = vmul.f32 %v1737_v50, %v2352_v10 }
  0x70   : > { %v1121_v0 = vadd.f32 %v2414_v57, %v1103_v26  ;;  %v1125_v3 = vadd.f32 %v1123_v39, %v1107_v45  ;;  %v1215_v31 = vadd.f32 %v1213_v42, %v1204_v37  ;;  %v281_v56 = vmul.f32 %v1735_v35, %v2358_v14 }
  0x71   : > { %v262_v36 = vadd.f32 %v260_v55, %v252_v59  ;;  %v295_v38 = vmul.f32 %v1737_v50, %v2360_v15  ;;  %v301_v8 = vadd.f32 %v299_v60, %v285_v49  ;;  %v313_v51 = vmul.f32 %v1739_v46, %v2354_v12  ;;  %v1745_v50 = vld [vmem:[%s2344_s30 + $0x21] sm:$0xff] }
  0x72   : > { %v1139_v29 = vadd.f32 %v2419_v62, %v1121_v0  ;;  %v1143_v57 = vadd.f32 %v1141_v53, %v1125_v3  ;;  %v1225_v39 = vadd.f32 %v1223_v44, %v1215_v31  ;;  %v327_v42 = vmul.f32 %v1741_v63, %v2356_v13  ;;  %v1747_v62 = vld [vmem:[%s2344_s30 + $0x22] sm:$0xff] }
  0x73   : > { %v272_v34 = vadd.f32 %v270_v47, %v262_v36  ;;  %v309_v35 = vmul.f32 %v1739_v46, %v2362_v16  ;;  %v315_v52 = vadd.f32 %v313_v51, %v301_v8  ;;  %v323_v40 = vmul.f32 %v1741_v63, %v2364_v17 }
  0x74   : > { %v1154_v55 = vadd.f32 %v2424_v1, %v1139_v29  ;;  %v1158_v26 = vadd.f32 %v2427_v2, %v1143_v57  ;;  %v1235_v37 = vadd.f32 %v1233_v5, %v1225_v39  ;;  %v346_v45 = vmul.f32 %v1743_v28, %v2350_v9  ;;  %v1749_v5 = vld [vmem:[%s2344_s30 + $0x23] sm:$0xff]  ;;  %v2563_v29 = vld [vmem:[%s2344_s30 + $0x31] sm:$0xff] }
  0x75   : > { %v283_v31 = vadd.f32 %v281_v56, %v272_v34  ;;  %v2528_v53 = vadd.f32 %v327_v42, %v315_v52  ;;  %v338_v44 = vmul.f32 %v1743_v28, %v2366_v18  ;;  %v2532_v46 = vmul.f32 %v1743_v28, %v2358_v14  ;;  %v2577_v52 = vld [vmem:[%s2344_s30 + $0x32] sm:$0xff] }
  0x76   : > { %v1168_v59 = vadd.f32 %v2431_v4, %v1154_v55  ;;  %v1172_v1 = vadd.f32 %v2434_v7, %v1158_v26  ;;  %v1245_v47 = vadd.f32 %v1243_v11, %v1235_v37  ;;  %v364_v2 = vmul.f32 %v1745_v50, %v2352_v10  ;;  %v2547_v11 = vld [vmem:[%s2344_s30 + $0x30] sm:$0xff] }
  0x77   : > { %v297_v49 = vadd.f32 %v295_v38, %v283_v31  ;;  %v356_v60 = vmul.f32 %v1745_v50, %v2368_v19  ;;  %v2540_v63 = vmul.f32 %v1745_v50, %v2360_v15  ;;  %v382_v0 = vmul.f32 %v1747_v62, %v2354_v12  ;;  %v2586_v26 = vld [vmem:[%s2344_s30 + $0x33] sm:$0xff]  ;;  %v235_v31 = vld [vmem:[%s2344_s30 + $0x8] sm:$0x1f] }
  0x78   : > { %v1182_v3 = vadd.f32 %v2439_v22, %v1168_v59  ;;  %v1186_v56 = vadd.f32 %v2442_v23, %v1172_v1  ;;  %v1252_v4 = vadd.f32 %v2483_v48, %v1245_v47  ;;  %v366_v7 = vadd.f32 %v364_v2, %v346_v45 }
  0x79   : > { %v311_v36 = vadd.f32 %v309_v35, %v297_v49  ;;  %v374_v38 = vmul.f32 %v1747_v62, %v2370_v20  ;;  %v2556_v8 = vmul.f32 %v1747_v62, %v2362_v16  ;;  %v400_v22 = vmul.f32 %v1749_v5, %v2356_v13 }
  0x7a   : > { %v1196_v23 = vadd.f32 %v2446_v27, %v1182_v3  ;;  %v1200_v48 = vadd.f32 %v2449_v30, %v1186_v56  ;;  %v1258_v51 = vadd.f32 %v2487_v33, %v1252_v4  ;;  %v384_v28 = vadd.f32 %v382_v0, %v366_v7  ;;  %v265_v0 = vld [vmem:[%s2344_s30 + $0xb] sm:$0x1f] }
  0x7b   : > { %v325_v57 = vadd.f32 %v323_v40, %v311_v36  ;;  %v392_v39 = vmul.f32 %v1749_v5, %v2372_v21  ;;  %v419_v42 = vmul.f32 %v2547_v11, %v2358_v14  ;;  %v423_v34 = vmul.f32 %v2547_v11, %v2350_v9  ;;  %v1736_v36 = vld [vmem:[%s2344_s30 + $0x18] sm:$0x1f] }
  0x7c   : > { %1912 = vst [vmem:[%s2552_s26 + $0x98] sm:$0x1f] %v1196_v23  ;;  %v1211_v27 = vadd.f32 %v2462_v58, %v1200_v48  ;;  %v1264_v30 = vadd.f32 %v2494_v41, %v1258_v51  ;;  %v2574_v33 = vmul.f32 %v1749_v5, %v2364_v17  ;;  %v402_v35 = vadd.f32 %v400_v22, %v384_v28  ;;  %v3615_v23 = vld [vmem:[#allocation8_spill] sm:$0xff] }
  0x7d   : > { %v340_v40 = vadd.f32 %v338_v44, %v325_v57  ;;  %v411_v50 = vmul.f32 %v2547_v11, %v2376_v24  ;;  %v441_v55 = vmul.f32 %v2563_v29, %v2360_v15  ;;  %v445_v58 = vmul.f32 %v2563_v29, %v2352_v10  ;;  %v245_v44 = vld [vmem:[%s2344_s30 + $0x9] sm:$0x1f]  ;;  %v1740_v57 = vld [vmem:[%s2344_s30 + $0x1a] sm:$0x1f] }
  0x7e   : > { %v1221_v41 = vadd.f32 %v2466_v43, %v1211_v27  ;;  %v1270_v37 = vadd.f32 %v2501_v54, %v1264_v30  ;;  %v421_v45 = vadd.f32 %v419_v42, %v402_v35  ;;  %v463_v62 = vmul.f32 %v2577_v52, %v2362_v16  ;;  %v255_v43 = vld [vmem:[%s2344_s30 + $0xa] sm:$0x1f] }
  0x7f   : > { %v358_v59 = vadd.f32 %v356_v60, %v340_v40  ;;  %v433_v1 = vmul.f32 %v2563_v29, %v2378_v25  ;;  %v447_v47 = vadd.f32 %v445_v58, %v423_v34  ;;  %v467_v2 = vmul.f32 %v2577_v52, %v2354_v12  ;;  %v1744_v58 = vld [vmem:[%s2344_s30 + $0x28] sm:$0x1f] }
  0x80   : > { %v1231_v5 = vadd.f32 %v2472_v61, %v1221_v41  ;;  %1916 = vst [vmem:[%s2552_s26 + $0xb8] sm:$0x1f] %v1270_v37  ;;  %v443_v54 = vadd.f32 %v441_v55, %v421_v45  ;;  %v485_v49 = vmul.f32 %v2586_v26, %v2364_v17  ;;  %v489_v60 = vmul.f32 %v2586_v26, %v2356_v13  ;;  %v1738_v61 = vld [vmem:[%s2344_s30 + $0x19] sm:$0x1f] }
  0x81   : > { %v376_v3 = vadd.f32 %v374_v38, %v358_v59  ;;  %v469_v56 = vadd.f32 %v467_v2, %v447_v47  ;;  %v241_v4 = vmul.f32 %v2350_v9, %v235_v31  ;;  %v251_v7 = vmul.f32 %v2352_v10, %v245_v44  ;;  %v1742_v55 = vld [vmem:[%s2344_s30 + $0x1b] sm:$0x1f] }
  0x82   : > { %v1241_v22 = vadd.f32 %v2479_v6, %v1231_v5  ;;  %v455_v48 = vmul.f32 %v2577_v52, %v3615_v23  ;;  %v465_v51 = vadd.f32 %v463_v62, %v443_v54  ;;  %v261_v28 = vmul.f32 %v2354_v12, %v255_v43  ;;  %v1746_v62 = vld [vmem:[%s2344_s30 + $0x29] sm:$0x1f] }
  0x83   : > { %v394_v38 = vadd.f32 %v392_v39, %v376_v3  ;;  %v477_v42 = vmul.f32 %v2586_v26, %v2387_v32  ;;  %v253_v34 = vadd.f32 %v251_v7, %v241_v4  ;;  %v271_v27 = vmul.f32 %v2356_v13, %v265_v0  ;;  %v1748_v54 = vld [vmem:[%s2344_s30 + $0x2a] sm:$0x1f] }
  0x84   : > { %1914 = vst [vmem:[%s2552_s26 + $0xa8] sm:$0x1f] %v1241_v22  ;;  %v2619_v30 = vadd.f32 %v489_v60, %v469_v56  ;;  %v282_v6 = vmul.f32 %v1736_v36, %v2358_v14  ;;  %v286_v35 = vmul.f32 %v1736_v36, %v2350_v9  ;;  %v300_v40 = vmul.f32 %v1738_v61, %v2352_v10  ;;  %v1750_v56 = vld [vmem:[%s2344_s30 + $0x2b] sm:$0x1f] }
  0x85   : > { %v413_v41 = vadd.f32 %v411_v50, %v394_v38  ;;  %v2626_v39 = vadd.f32 %v485_v49, %v465_v51  ;;  %v263_v37 = vadd.f32 %v261_v28, %v253_v34  ;;  %v314_v45 = vmul.f32 %v1740_v57, %v2354_v12  ;;  %v2655_v38 = vld [vmem:[%s2344_s30 + $0x39] sm:$0x1f] }
  0x86   : > { %v296_v31 = vmul.f32 %v1738_v61, %v2360_v15  ;;  %v302_v44 = vadd.f32 %v300_v40, %v286_v35  ;;  %v310_v59 = vmul.f32 %v1740_v57, %v2362_v16  ;;  %v324_v47 = vmul.f32 %v1742_v55, %v2364_v17  ;;  %v2647_v61 = vld [vmem:[%s2344_s30 + $0x38] sm:$0x1f] }
  0x87   : > { %v435_v2 = vadd.f32 %v433_v1, %v413_v41  ;;  %v273_v43 = vadd.f32 %v271_v27, %v263_v37  ;;  %v328_v5 = vmul.f32 %v1742_v55, %v2356_v13  ;;  %v347_v50 = vmul.f32 %v1744_v58, %v2350_v9  ;;  %v2659_v35 = vld [vmem:[%s2344_s30 + $0x3a] sm:$0x1f] }
  0x88   : > { %v316_v49 = vadd.f32 %v314_v45, %v302_v44  ;;  %v339_v60 = vmul.f32 %v1744_v58, %v2366_v18  ;;  %v2638_v0 = vmul.f32 %v1744_v58, %v2358_v14  ;;  %v365_v3 = vmul.f32 %v1746_v62, %v2352_v10 }
  0x89   : > { %v457_v4 = vadd.f32 %v455_v48, %v435_v2  ;;  %v284_v7 = vadd.f32 %v282_v6, %v273_v43  ;;  %v357_v1 = vmul.f32 %v1746_v62, %v2368_v19  ;;  %v2644_v36 = vmul.f32 %v1746_v62, %v2360_v15 }
  0x8a   : > { %v367_v22 = vadd.f32 %v365_v3, %v347_v50  ;;  %v375_v51 = vmul.f32 %v1748_v54, %v2370_v20  ;;  %v2651_v28 = vmul.f32 %v1748_v54, %v2362_v16  ;;  %v383_v57 = vmul.f32 %v1748_v54, %v2354_v12 }
  0x8b   : > { %v479_v48 = vadd.f32 %v477_v42, %v457_v4  ;;  %v298_v34 = vadd.f32 %v296_v31, %v284_v7  ;;  %v330_v27 = vadd.f32 %v328_v5, %v316_v49  ;;  %v401_v6 = vmul.f32 %v1750_v56, %v2356_v13  ;;  %v1758_v31 = vld [vmem:[%s2344_s30 + $0x3b] sm:$0x1f] }
  0x8c   : > { %v385_v40 = vadd.f32 %v383_v57, %v367_v22  ;;  %v393_v55 = vmul.f32 %v1750_v56, %v2372_v21  ;;  %v420_v58 = vmul.f32 %v2647_v61, %v2358_v14  ;;  %v424_v41 = vmul.f32 %v2647_v61, %v2350_v9 }
  0x8d   : > { %616 = vst [vmem:[%s2552_s26] sm:$0xff] %v479_v48  ;;  %v312_v37 = vadd.f32 %v310_v59, %v298_v34  ;;  %v2668_v45 = vmul.f32 %v1750_v56, %v2364_v17  ;;  %v412_v42 = vmul.f32 %v2647_v61, %v2376_v24  ;;  %v446_v62 = vmul.f32 %v2655_v38, %v2352_v10 }
  0x8e   : > { %v403_v44 = vadd.f32 %v401_v6, %v385_v40  ;;  %v434_v2 = vmul.f32 %v2655_v38, %v2378_v25  ;;  %v442_v43 = vmul.f32 %v2655_v38, %v2360_v15  ;;  %v468_v59 = vmul.f32 %v2659_v35, %v2354_v12 }
  0x8f   : > { %v326_v5 = vadd.f32 %v324_v47, %v312_v37  ;;  %v448_v50 = vadd.f32 %v446_v62, %v424_v41  ;;  %v456_v54 = vmul.f32 %v2659_v35, %v3615_v23  ;;  %v464_v49 = vmul.f32 %v2659_v35, %v2362_v16  ;;  %v2700_v41 = vld [vmem:[%s2344_s30 + $0x40] sm:$0xff] }
  0x90   : > { %v422_v3 = vadd.f32 %v420_v58, %v403_v44  ;;  %v2686_v56 = vmul.f32 %v1758_v31, %v2387_v32  ;;  %v490_v4 = vmul.f32 %v1758_v31, %v2356_v13  ;;  %v344_v7 = vadd.f32 %v2532_v46, %v2528_v53  ;;  %v2712_v62 = vld [vmem:[%s2344_s30 + $0x41] sm:$0xff] }
  0x91   : > { %v341_v22 = vadd.f32 %v339_v60, %v326_v5  ;;  %v470_v57 = vadd.f32 %v468_v59, %v448_v50  ;;  %v486_v47 = vmul.f32 %v1758_v31, %v2364_v17  ;;  %v415_v48 = vmul.f32 %v2547_v11, %v2366_v18  ;;  %v2720_v59 = vld [vmem:[%s2344_s30 + $0x42] sm:$0xff] }
  0x92   : > { %v444_v34 = vadd.f32 %v442_v43, %v422_v3  ;;  %v362_v6 = vadd.f32 %v2540_v63, %v344_v7  ;;  %v437_v40 = vmul.f32 %v2563_v29, %v2368_v19  ;;  %v459_v58 = vmul.f32 %v2577_v52, %v2370_v20  ;;  %v2736_v7 = vld [vmem:[%s2344_s30 + $0x43] sm:$0xff] }
  0x93   : > { %v359_v53 = vadd.f32 %v357_v1, %v341_v22  ;;  %v481_v46 = vmul.f32 %v2586_v26, %v2372_v21  ;;  %v496_v60 = vmul.f32 %v2700_v41, %v2376_v24  ;;  %v504_v11 = vmul.f32 %v2700_v41, %v2358_v14 }
  0x94   : > { %v466_v63 = vadd.f32 %v464_v49, %v444_v34  ;;  %v492_v37 = vadd.f32 %v490_v4, %v470_v57  ;;  %v380_v29 = vadd.f32 %v2556_v8, %v362_v6  ;;  %v500_v52 = vmul.f32 %v2700_v41, %v2366_v18 }
  0x95   : > { %v377_v1 = vadd.f32 %v375_v51, %v359_v53  ;;  %v506_v44 = vadd.f32 %v504_v11, %v2619_v30  ;;  %v510_v26 = vmul.f32 %v2712_v62, %v2378_v25  ;;  %v518_v43 = vmul.f32 %v2712_v62, %v2360_v15 }
  0x96   : > { %v398_v8 = vadd.f32 %v2574_v33, %v380_v29  ;;  %v514_v5 = vmul.f32 %v2712_v62, %v2368_v19  ;;  %v2727_v50 = vmul.f32 %v2720_v59, %v3615_v23  ;;  %v532_v30 = vmul.f32 %v2720_v59, %v2362_v16 }
  0x97   : > { %v395_v51 = vadd.f32 %v393_v55, %v377_v1  ;;  %v2731_v49 = vadd.f32 %v486_v47, %v466_v63  ;;  %v520_v3 = vadd.f32 %v518_v43, %v506_v44  ;;  %v528_v4 = vmul.f32 %v2720_v59, %v2370_v20  ;;  %v1760_v47 = vld [vmem:[%s2344_s30 + $0x48] sm:$0x1f] }
  0x98   : > { %v417_v33 = vadd.f32 %v415_v48, %v398_v8  ;;  %v2740_v22 = vmul.f32 %v2736_v7, %v2387_v32  ;;  %v546_v57 = vmul.f32 %v2736_v7, %v2364_v17  ;;  %v345_v55 = vadd.f32 %v2638_v0, %v330_v27  ;;  %v1762_v0 = vld [vmem:[%s2344_s30 + $0x49] sm:$0x1f] }
  0x99   : > { %v414_v34 = vadd.f32 %v412_v42, %v395_v51  ;;  %v534_v6 = vadd.f32 %v532_v30, %v520_v3  ;;  %v542_v53 = vmul.f32 %v2736_v7, %v2372_v21  ;;  %v416_v11 = vmul.f32 %v2647_v61, %v2366_v18  ;;  %v1764_v8 = vld [vmem:[%s2344_s30 + $0x4a] sm:$0x1f] }
  0x9a   : > { %v439_v48 = vadd.f32 %v437_v40, %v417_v33  ;;  %v363_v63 = vadd.f32 %v2644_v36, %v345_v55  ;;  %v438_v29 = vmul.f32 %v2655_v38, %v2368_v19  ;;  %v460_v1 = vmul.f32 %v2659_v35, %v2370_v20 }
  0x9b   : > { %v436_v27 = vadd.f32 %v434_v2, %v414_v34  ;;  %v482_v42 = vmul.f32 %v1758_v31, %v2372_v21  ;;  %v497_v44 = vmul.f32 %v1760_v47, %v2376_v24  ;;  %v505_v43 = vmul.f32 %v1760_v47, %v2358_v14  ;;  %v1766_v31 = vld [vmem:[%s2344_s30 + $0x4b] sm:$0x1f] }
  0x9c   : > { %v461_v61 = vadd.f32 %v459_v58, %v439_v48  ;;  %v548_v40 = vadd.f32 %v546_v57, %v534_v6  ;;  %v381_v36 = vadd.f32 %v2651_v28, %v363_v63  ;;  %v501_v30 = vmul.f32 %v1760_v47, %v2366_v18  ;;  %v2776_v6 = vld [vmem:[%s2344_s30 + $0x50] sm:$0xff] }
  0x9d   : > { %v458_v38 = vadd.f32 %v456_v54, %v436_v27  ;;  %v507_v51 = vadd.f32 %v505_v43, %v492_v37  ;;  %v511_v35 = vmul.f32 %v1762_v0, %v2378_v25  ;;  %v519_v2 = vmul.f32 %v1762_v0, %v2360_v15  ;;  %v2791_v43 = vld [vmem:[%s2344_s30 + $0x52] sm:$0xff] }
  0x9e   : > { %v483_v3 = vadd.f32 %v481_v46, %v461_v61  ;;  %v399_v33 = vadd.f32 %v2668_v45, %v381_v36  ;;  %v515_v55 = vmul.f32 %v1762_v0, %v2368_v19  ;;  %v533_v58 = vmul.f32 %v1764_v8, %v2362_v16 }
  0x9f   : > { %v480_v28 = vadd.f32 %v2686_v56, %v458_v38  ;;  %v521_v57 = vadd.f32 %v519_v2, %v507_v51  ;;  %v2770_v54 = vmul.f32 %v1764_v8, %v3615_v23  ;;  %v529_v37 = vmul.f32 %v1764_v8, %v2370_v20  ;;  %v1768_v51 = vld [vmem:[%s2344_s30 + $0x58] sm:$0x1f] }
  0xa0   : > { %v498_v47 = vadd.f32 %v496_v60, %v483_v3  ;;  %v418_v34 = vadd.f32 %v416_v11, %v399_v33  ;;  %v547_v46 = vmul.f32 %v1766_v31, %v2364_v17  ;;  %v502_v45 = vadd.f32 %v500_v52, %v2626_v39  ;;  %v2786_v60 = vld [vmem:[%s2344_s30 + $0x51] sm:$0xff]  ;;  %v1770_v3 = vld [vmem:[%s2344_s30 + $0x59] sm:$0x1f] }
  0xa1   : > { %617 = vst [vmem:[%s2552_s26 + $0x8] sm:$0x1f] %v480_v28  ;;  %v535_v48 = vadd.f32 %v533_v58, %v521_v57  ;;  %v2780_v56 = vmul.f32 %v1766_v31, %v2387_v32  ;;  %v543_v63 = vmul.f32 %v1766_v31, %v2372_v21  ;;  %v557_v0 = vmul.f32 %v2776_v6, %v2366_v18  ;;  %v2802_v31 = vld [vmem:[%s2344_s30 + $0x53] sm:$0xff] }
  0xa2   : > { %v512_v11 = vadd.f32 %v510_v26, %v498_v47  ;;  %v440_v27 = vadd.f32 %v438_v29, %v418_v34  ;;  %v516_v39 = vadd.f32 %v514_v5, %v502_v45  ;;  %v567_v52 = vmul.f32 %v2786_v60, %v2368_v19  ;;  %v1772_v47 = vld [vmem:[%s2344_s30 + $0x5a] sm:$0x1f] }
  0xa3   : > { %v553_v8 = vmul.f32 %v2776_v6, %v2376_v24  ;;  %v559_v61 = vadd.f32 %v557_v0, %v548_v40  ;;  %v563_v36 = vmul.f32 %v2786_v60, %v2378_v25  ;;  %v577_v38 = vmul.f32 %v2791_v43, %v2370_v20  ;;  %v1774_v0 = vld [vmem:[%s2344_s30 + $0x5b] sm:$0x1f] }
  0xa4   : > { %v526_v26 = vadd.f32 %v2727_v50, %v512_v11  ;;  %v462_v5 = vadd.f32 %v460_v1, %v440_v27  ;;  %v549_v29 = vadd.f32 %v547_v46, %v535_v48  ;;  %v530_v2 = vadd.f32 %v528_v4, %v516_v39 }
  0xa5   : > { %v569_v33 = vadd.f32 %v567_v52, %v559_v61  ;;  %v573_v40 = vmul.f32 %v2791_v43, %v3615_v23  ;;  %v587_v58 = vmul.f32 %v2802_v31, %v2372_v21  ;;  %v503_v28 = vadd.f32 %v501_v30, %v2731_v49 }
  0xa6   : > { %v540_v57 = vadd.f32 %v2740_v22, %v526_v26  ;;  %v484_v50 = vadd.f32 %v482_v42, %v462_v5  ;;  %v544_v1 = vadd.f32 %v542_v53, %v530_v2  ;;  %v558_v4 = vmul.f32 %v1768_v51, %v2366_v18  ;;  %v1775_v26 = vld [vmem:[%s2344_s30 + $0x60] sm:$0xff]  ;;  %v1778_v2 = vld [vmem:[%s2344_s30 + $0x69] sm:$0x1f] }
  0xa7   : > { %v579_v34 = vadd.f32 %v577_v38, %v569_v33  ;;  %v583_v46 = vmul.f32 %v2802_v31, %v2387_v32  ;;  %v517_v45 = vadd.f32 %v515_v55, %v503_v28  ;;  %v568_v48 = vmul.f32 %v1770_v3, %v2368_v19  ;;  %v1777_v5 = vld [vmem:[%s2344_s30 + $0x61] sm:$0xff] }
  0xa8   : > { %1783 = vst [vmem:[%s2552_s26 + $0x10] sm:$0xff] %v540_v57  ;;  %v499_v49 = vadd.f32 %v497_v44, %v484_v50  ;;  %v555_v30 = vadd.f32 %v553_v8, %v544_v1  ;;  %v554_v22 = vmul.f32 %v1768_v51, %v2376_v24  ;;  %v560_v53 = vadd.f32 %v558_v4, %v549_v29  ;;  %v1776_v44 = vld [vmem:[%s2344_s30 + $0x68] sm:$0x1f] }
  0xa9   : > { %v589_v42 = vadd.f32 %v587_v58, %v579_v34  ;;  %v531_v11 = vadd.f32 %v529_v37, %v517_v45  ;;  %v564_v27 = vmul.f32 %v1770_v3, %v2378_v25  ;;  %v578_v39 = vmul.f32 %v1772_v47, %v2370_v20  ;;  %v1779_v58 = vld [vmem:[%s2344_s30 + $0x62] sm:$0xff]  ;;  %v1780_v1 = vld [vmem:[%s2344_s30 + $0x6a] sm:$0x1f] }
  0xaa   : > { %v513_v55 = vadd.f32 %v511_v35, %v499_v49  ;;  %v565_v52 = vadd.f32 %v563_v36, %v555_v30  ;;  %v570_v61 = vadd.f32 %v568_v48, %v560_v53  ;;  %v588_v38 = vmul.f32 %v1774_v0, %v2372_v21  ;;  %v1781_v45 = vld [vmem:[%s2344_s30 + $0x63] sm:$0xff] }
  0xab   : > { %v545_v8 = vadd.f32 %v543_v63, %v531_v11  ;;  %v574_v51 = vmul.f32 %v1772_v47, %v3615_v23  ;;  %v594_v29 = vmul.f32 %v1775_v26, %v2376_v24  ;;  %v600_v37 = vmul.f32 %v1777_v5, %v2378_v25 }
  0xac   : > { %v527_v35 = vadd.f32 %v2770_v54, %v513_v55  ;;  %v575_v36 = vadd.f32 %v573_v40, %v565_v52  ;;  %v580_v3 = vadd.f32 %v578_v39, %v570_v61  ;;  %v584_v33 = vmul.f32 %v1774_v0, %v2387_v32  ;;  %v1782_v40 = vld [vmem:[%s2344_s30 + $0x6b] sm:$0x1f] }
  0xad   : > { %v556_v28 = vadd.f32 %v554_v22, %v545_v8  ;;  %v596_v63 = vadd.f32 %v594_v29, %v589_v42  ;;  %v606_v57 = vmul.f32 %v1779_v58, %v3615_v23  ;;  %v595_v50 = vmul.f32 %v1776_v44, %v2376_v24 }
  0xae   : > { %v541_v4 = vadd.f32 %v2780_v56, %v527_v35  ;;  %v585_v47 = vadd.f32 %v583_v46, %v575_v36  ;;  %v590_v34 = vadd.f32 %v588_v38, %v580_v3  ;;  %v601_v54 = vmul.f32 %v1778_v2, %v2378_v25 }
  0xaf   : > { %v566_v48 = vadd.f32 %v564_v27, %v556_v28  ;;  %v602_v0 = vadd.f32 %v600_v37, %v596_v63  ;;  %v612_v49 = vmul.f32 %v1781_v45, %v2387_v32  ;;  %v629_v30 = vmul.f32 %v2700_v41, %v2350_v9 }
  0xb0   : > { %1784 = vst [vmem:[%s2552_s26 + $0x18] sm:$0x1f] %v541_v4  ;;  %1785 = vst [vmem:[%s2552_s26 + $0x20] sm:$0xff] %v585_v47  ;;  %v597_v22 = vadd.f32 %v595_v50, %v590_v34  ;;  %v607_v53 = vmul.f32 %v1780_v1, %v3615_v23  ;;  %v635_v56 = vmul.f32 %v2712_v62, %v2352_v10  ;;  %v2890_v47 = vld [vmem:[%s2344_s30 + $0x71] sm:$0xff] }
  0xb1   : > { %v641_v46 = vmul.f32 %v2720_v59, %v2354_v12  ;;  %v576_v42 = vadd.f32 %v574_v51, %v566_v48  ;;  %v608_v11 = vadd.f32 %v606_v57, %v602_v0  ;;  %v613_v27 = vmul.f32 %v1782_v40, %v2387_v32  ;;  %v2899_v48 = vld [vmem:[%s2344_s30 + $0x72] sm:$0xff] }
  0xb2   : > { %v657_v41 = vmul.f32 %v2776_v6, %v2350_v9  ;;  %v603_v39 = vadd.f32 %v601_v54, %v597_v22  ;;  %v637_v55 = vadd.f32 %v635_v56, %v629_v30  ;;  %v647_v52 = vmul.f32 %v2736_v7, %v2356_v13  ;;  %v2911_v22 = vld [vmem:[%s2344_s30 + $0x73] sm:$0xff] }
  0xb3   : > { %v667_v62 = vmul.f32 %v2786_v60, %v2352_v10  ;;  %v586_v61 = vadd.f32 %v584_v33, %v576_v42  ;;  %v614_v38 = vadd.f32 %v612_v49, %v608_v11  ;;  %v653_v59 = vmul.f32 %v2776_v6, %v2358_v14  ;;  %v1790_v42 = vld [vmem:[%s2344_s30 + $0x48] sm:$0x1f] }
  0xb4   : > { %v677_v44 = vmul.f32 %v2791_v43, %v2354_v12  ;;  %v609_v8 = vadd.f32 %v607_v53, %v603_v39  ;;  %v643_v51 = vadd.f32 %v641_v46, %v637_v55  ;;  %v663_v29 = vmul.f32 %v2786_v60, %v2360_v15  ;;  %v1792_v11 = vld [vmem:[%s2344_s30 + $0x49] sm:$0x1f] }
  0xb5   : > { %v669_v37 = vadd.f32 %v667_v62, %v657_v41  ;;  %1786 = vst [vmem:[%s2552_s26 + $0x28] sm:$0x1f] %v586_v61  ;;  %1787 = vst [vmem:[%s2552_s26 + $0x30] sm:$0xff] %v614_v38  ;;  %v673_v7 = vmul.f32 %v2791_v43, %v2362_v16  ;;  %v683_v2 = vmul.f32 %v2802_v31, %v2364_v17 }
  0xb6   : > { %v687_v6 = vmul.f32 %v2802_v31, %v2356_v13  ;;  %v701_v35 = vmul.f32 %v1775_v26, %v2350_v9  ;;  %v615_v36 = vadd.f32 %v613_v27, %v609_v8  ;;  %v649_v3 = vadd.f32 %v647_v52, %v643_v51  ;;  %v2881_v31 = vld [vmem:[%s2344_s30 + $0x70] sm:$0xff]  ;;  %v1794_v27 = vld [vmem:[%s2344_s30 + $0x4a] sm:$0x1f]  ;;  %v1798_v8 = vld [vmem:[%s2344_s30 + $0x58] sm:$0x1f] }
  0xb7   : > { %v679_v60 = vadd.f32 %v677_v44, %v669_v37  ;;  %v693_v33 = vmul.f32 %v1775_v26, %v2366_v18  ;;  %v2873_v28 = vmul.f32 %v1775_v26, %v2358_v14  ;;  %v707_v43 = vmul.f32 %v1777_v5, %v2368_v19  ;;  %v1796_v44 = vld [vmem:[%s2344_s30 + $0x4b] sm:$0x1f] }
  0xb8   : > { %v2877_v63 = vmul.f32 %v1777_v5, %v2360_v15  ;;  %v715_v57 = vmul.f32 %v1777_v5, %v2352_v10  ;;  %1788 = vst [vmem:[%s2552_s26 + $0x38] sm:$0x1f] %v615_v36  ;;  %v655_v50 = vadd.f32 %v653_v59, %v649_v3  ;;  %v721_v1 = vmul.f32 %v1779_v58, %v2370_v20 }
  0xb9   : > { %v2886_v4 = vmul.f32 %v1779_v58, %v2362_v16  ;;  %v729_v26 = vmul.f32 %v1779_v58, %v2354_v12  ;;  %v2892_v34 = vadd.f32 %v687_v6, %v679_v60  ;;  %v2895_v54 = vmul.f32 %v1781_v45, %v2372_v21  ;;  %v1800_v6 = vld [vmem:[%s2344_s30 + $0x59] sm:$0x1f] }
  0xba   : > { %v717_v5 = vadd.f32 %v715_v57, %v701_v35  ;;  %v743_v40 = vmul.f32 %v1781_v45, %v2356_v13  ;;  %v665_v0 = vadd.f32 %v663_v29, %v655_v50  ;;  %v2902_v49 = vmul.f32 %v1781_v45, %v2364_v17  ;;  %v1802_v57 = vld [vmem:[%s2344_s30 + $0x5a] sm:$0x1f] }
  0xbb   : > { %v2906_v58 = vmul.f32 %v2881_v31, %v2376_v24  ;;  %v762_v30 = vmul.f32 %v2881_v31, %v2350_v9  ;;  %v758_v56 = vmul.f32 %v2881_v31, %v2358_v14  ;;  %v2917_v46 = vmul.f32 %v2890_v47, %v2378_v25 }
  0xbc   : > { %v731_v53 = vadd.f32 %v729_v26, %v717_v5  ;;  %v780_v45 = vmul.f32 %v2890_v47, %v2352_v10  ;;  %v675_v41 = vadd.f32 %v673_v7, %v665_v0  ;;  %v776_v39 = vmul.f32 %v2890_v47, %v2360_v15 }
  0xbd   : > { %v2928_v55 = vmul.f32 %v2899_v48, %v3615_v23  ;;  %v798_v52 = vmul.f32 %v2899_v48, %v2354_v12  ;;  %v794_v38 = vmul.f32 %v2899_v48, %v2362_v16  ;;  %v816_v59 = vmul.f32 %v2911_v22, %v2356_v13 }
  0xbe   : > { %v745_v62 = vadd.f32 %v743_v40, %v731_v53  ;;  %v782_v61 = vadd.f32 %v780_v45, %v762_v30  ;;  %v685_v51 = vadd.f32 %v683_v2, %v675_v41  ;;  %v630_v29 = vmul.f32 %v1790_v42, %v2350_v9  ;;  %v1804_v40 = vld [vmem:[%s2344_s30 + $0x5b] sm:$0x1f]  ;;  %v1806_v45 = vld [vmem:[%s2344_s30 + $0x68] sm:$0x1f] }
  0xbf   : > { %v636_v37 = vmul.f32 %v1792_v11, %v2352_v10  ;;  %v642_v7 = vmul.f32 %v1794_v27, %v2354_v12  ;;  %v2944_v3 = vmul.f32 %v2911_v22, %v2387_v32  ;;  %v812_v60 = vmul.f32 %v2911_v22, %v2364_v17 }
  0xc0   : > { %v760_v35 = vadd.f32 %v758_v56, %v745_v62  ;;  %v800_v36 = vadd.f32 %v798_v52, %v782_v61  ;;  %v695_v50 = vadd.f32 %v693_v33, %v685_v51  ;;  %v648_v26 = vmul.f32 %v1796_v44, %v2356_v13  ;;  %v1808_v61 = vld [vmem:[%s2344_s30 + $0x69] sm:$0x1f] }
  0xc1   : > { %v638_v2 = vadd.f32 %v636_v37, %v630_v29  ;;  %v658_v5 = vmul.f32 %v1798_v8, %v2350_v9  ;;  %v654_v30 = vmul.f32 %v1798_v8, %v2358_v14  ;;  %v664_v53 = vmul.f32 %v1800_v6, %v2360_v15 }
  0xc2   : > { %v778_v0 = vadd.f32 %v776_v39, %v760_v35  ;;  %v668_v56 = vmul.f32 %v1800_v6, %v2352_v10  ;;  %v709_v42 = vadd.f32 %v707_v43, %v695_v50  ;;  %v2956_v11 = vadd.f32 %v816_v59, %v800_v36  ;;  %v1810_v59 = vld [vmem:[%s2344_s30 + $0x6a] sm:$0x1f]  ;;  %v2976_v50 = vld [vmem:[%s2344_s30 + $0x78] sm:$0x1f] }
  0xc3   : > { %v644_v33 = vadd.f32 %v642_v7, %v638_v2  ;;  %v678_v27 = vmul.f32 %v1802_v57, %v2354_v12  ;;  %v674_v62 = vmul.f32 %v1802_v57, %v2362_v16  ;;  %v688_v39 = vmul.f32 %v1804_v40, %v2356_v13  ;;  %v1812_v57 = vld [vmem:[%s2344_s30 + $0x6b] sm:$0x1f] }
  0xc4   : > { %v796_v41 = vadd.f32 %v794_v38, %v778_v0  ;;  %v670_v52 = vadd.f32 %v668_v56, %v658_v5  ;;  %v723_v44 = vadd.f32 %v721_v1, %v709_v42  ;;  %v684_v51 = vmul.f32 %v1804_v40, %v2364_v17  ;;  %v2990_v56 = vld [vmem:[%s2344_s30 + $0x79] sm:$0x1f] }
  0xc5   : > { %v650_v8 = vadd.f32 %v648_v26, %v644_v33  ;;  %v702_v43 = vmul.f32 %v1806_v45, %v2350_v9  ;;  %v694_v38 = vmul.f32 %v1806_v45, %v2366_v18  ;;  %v2969_v7 = vmul.f32 %v1806_v45, %v2358_v14 }
  0xc6   : > { %v2965_v29 = vadd.f32 %v812_v60, %v796_v41  ;;  %v680_v37 = vadd.f32 %v678_v27, %v670_v52  ;;  %v737_v6 = vadd.f32 %v2895_v54, %v723_v44  ;;  %v708_v1 = vmul.f32 %v1808_v61, %v2368_v19  ;;  %v3000_v41 = vld [vmem:[%s2344_s30 + $0x7a] sm:$0x1f] }
  0xc7   : > { %v656_v35 = vadd.f32 %v654_v30, %v650_v8  ;;  %v716_v36 = vmul.f32 %v1808_v61, %v2352_v10  ;;  %v2981_v2 = vmul.f32 %v1808_v61, %v2360_v15  ;;  %v722_v26 = vmul.f32 %v1810_v59, %v2370_v20  ;;  %v3006_v61 = vld [vmem:[%s2344_s30 + $0x7b] sm:$0x1f] }
  0xc8   : > { %v2978_v60 = vadd.f32 %v688_v39, %v680_v37  ;;  %v730_v5 = vmul.f32 %v1810_v59, %v2354_v12  ;;  %v752_v54 = vadd.f32 %v2906_v58, %v737_v6  ;;  %v2987_v30 = vmul.f32 %v1810_v59, %v2362_v16 }
  0xc9   : > { %v666_v40 = vadd.f32 %v664_v53, %v656_v35  ;;  %v718_v0 = vadd.f32 %v716_v36, %v702_v43  ;;  %v736_v45 = vmul.f32 %v1812_v57, %v2372_v21  ;;  %v2994_v42 = vmul.f32 %v1812_v57, %v2364_v17 }
  0xca   : > { %v744_v33 = vmul.f32 %v1812_v57, %v2356_v13  ;;  %v763_v27 = vmul.f32 %v2976_v50, %v2350_v9  ;;  %v770_v58 = vadd.f32 %v2917_v46, %v752_v54  ;;  %v759_v39 = vmul.f32 %v2976_v50, %v2358_v14 }
  0xcb   : > { %v676_v53 = vadd.f32 %v674_v62, %v666_v40  ;;  %v732_v52 = vadd.f32 %v730_v5, %v718_v0  ;;  %v751_v44 = vmul.f32 %v2976_v50, %v2376_v24  ;;  %v769_v8 = vmul.f32 %v2990_v56, %v2378_v25 }
  0xcc   : > { %v777_v43 = vmul.f32 %v2990_v56, %v2360_v15  ;;  %v781_v59 = vmul.f32 %v2990_v56, %v2352_v10  ;;  %v788_v46 = vadd.f32 %v2928_v55, %v770_v58  ;;  %v799_v6 = vmul.f32 %v3000_v41, %v2354_v12 }
  0xcd   : > { %v686_v62 = vadd.f32 %v684_v51, %v676_v53  ;;  %v746_v37 = vadd.f32 %v744_v33, %v732_v52  ;;  %v787_v36 = vmul.f32 %v3000_v41, %v3615_v23  ;;  %v795_v57 = vmul.f32 %v3000_v41, %v2362_v16 }
  0xce   : > { %v783_v35 = vadd.f32 %v781_v59, %v763_v27  ;;  %v817_v5 = vmul.f32 %v3006_v61, %v2356_v13  ;;  %v806_v54 = vadd.f32 %v2944_v3, %v788_v46  ;;  %v699_v51 = vadd.f32 %v2873_v28, %v2892_v34  ;;  %v3039_v34 = vld [vmem:[%s2344_s30 + $0x80] sm:$0xff] }
  0xcf   : > { %v696_v55 = vadd.f32 %v694_v38, %v686_v62  ;;  %v761_v40 = vadd.f32 %v759_v39, %v746_v37  ;;  %v805_v33 = vmul.f32 %v3006_v61, %v2387_v32  ;;  %v813_v27 = vmul.f32 %v3006_v61, %v2364_v17  ;;  %v3051_v46 = vld [vmem:[%s2344_s30 + $0x81] sm:$0xff] }
  0xd0   : > { %v801_v0 = vadd.f32 %v799_v6, %v783_v35  ;;  %v754_v58 = vmul.f32 %v2881_v31, %v2366_v18  ;;  %1845 = vst [vmem:[%s2552_s26 + $0x40] sm:$0xff] %v806_v54  ;;  %v713_v3 = vadd.f32 %v2877_v63, %v699_v51  ;;  %v772_v28 = vmul.f32 %v2890_v47, %v2368_v19  ;;  %v3061_v37 = vld [vmem:[%s2344_s30 + $0x82] sm:$0xff] }
  0xd1   : > { %v710_v53 = vadd.f32 %v708_v1, %v696_v55  ;;  %v779_v52 = vadd.f32 %v777_v43, %v761_v40  ;;  %v790_v39 = vmul.f32 %v2899_v48, %v2370_v20  ;;  %v808_v59 = vmul.f32 %v2911_v22, %v2372_v21  ;;  %v3079_v55 = vld [vmem:[%s2344_s30 + $0x83] sm:$0xff] }
  0xd2   : > { %v819_v38 = vadd.f32 %v817_v5, %v801_v0  ;;  %v831_v31 = vmul.f32 %v3039_v34, %v2358_v14  ;;  %v727_v63 = vadd.f32 %v2886_v4, %v713_v3  ;;  %v823_v47 = vmul.f32 %v3039_v34, %v2376_v24 }
  0xd3   : > { %v724_v1 = vadd.f32 %v722_v26, %v710_v53  ;;  %v797_v43 = vadd.f32 %v795_v57, %v779_v52  ;;  %v827_v62 = vmul.f32 %v3039_v34, %v2366_v18  ;;  %v837_v22 = vmul.f32 %v3051_v46, %v2378_v25 }
  0xd4   : > { %v833_v48 = vadd.f32 %v831_v31, %v2956_v11  ;;  %v845_v26 = vmul.f32 %v3051_v46, %v2360_v15  ;;  %v741_v6 = vadd.f32 %v2902_v49, %v727_v63  ;;  %v841_v35 = vmul.f32 %v3051_v46, %v2368_v19 }
  0xd5   : > { %v738_v4 = vadd.f32 %v736_v45, %v724_v1  ;;  %v3068_v57 = vmul.f32 %v3061_v37, %v3615_v23  ;;  %v3070_v11 = vadd.f32 %v813_v27, %v797_v43  ;;  %v3074_v54 = vmul.f32 %v3061_v37, %v2370_v20  ;;  %v1822_v27 = vld [vmem:[%s2344_s30 + $0x88] sm:$0x1f] }
  0xd6   : > { %v847_v5 = vadd.f32 %v845_v26, %v833_v48  ;;  %v859_v45 = vmul.f32 %v3061_v37, %v2362_v16  ;;  %v756_v40 = vadd.f32 %v754_v58, %v741_v6  ;;  %v873_v51 = vmul.f32 %v3079_v55, %v2364_v17 }
  0xd7   : > { %v753_v49 = vadd.f32 %v751_v44, %v738_v4  ;;  %v700_v0 = vadd.f32 %v2969_v7, %v2978_v60  ;;  %v865_v52 = vmul.f32 %v3079_v55, %v2387_v32  ;;  %v869_v3 = vmul.f32 %v3079_v55, %v2372_v21  ;;  %v1824_v60 = vld [vmem:[%s2344_s30 + $0x89] sm:$0x1f] }
  0xd8   : > { %v861_v53 = vadd.f32 %v859_v45, %v847_v5  ;;  %v755_v31 = vmul.f32 %v2976_v50, %v2366_v18  ;;  %v774_v58 = vadd.f32 %v772_v28, %v756_v40  ;;  %v773_v7 = vmul.f32 %v2990_v56, %v2368_v19  ;;  %v1826_v28 = vld [vmem:[%s2344_s30 + $0x8a] sm:$0x1f] }
  0xd9   : > { %v771_v44 = vadd.f32 %v769_v8, %v753_v49  ;;  %v714_v1 = vadd.f32 %v2981_v2, %v700_v0  ;;  %v791_v63 = vmul.f32 %v3000_v41, %v2370_v20  ;;  %v809_v48 = vmul.f32 %v3006_v61, %v2372_v21  ;;  %v1828_v45 = vld [vmem:[%s2344_s30 + $0x8b] sm:$0x1f] }
  0xda   : > { %v875_v43 = vadd.f32 %v873_v51, %v861_v53  ;;  %v832_v26 = vmul.f32 %v1822_v27, %v2358_v14  ;;  %v792_v50 = vadd.f32 %v790_v39, %v774_v58  ;;  %v824_v2 = vmul.f32 %v1822_v27, %v2376_v24 }
  0xdb   : > { %v789_v4 = vadd.f32 %v787_v36, %v771_v44  ;;  %v728_v8 = vadd.f32 %v2987_v30, %v714_v1  ;;  %v828_v56 = vmul.f32 %v1822_v27, %v2366_v18  ;;  %v838_v5 = vmul.f32 %v1824_v60, %v2378_v25 }
  0xdc   : > { %v834_v6 = vadd.f32 %v832_v26, %v819_v38  ;;  %v846_v41 = vmul.f32 %v1824_v60, %v2360_v15  ;;  %v810_v49 = vadd.f32 %v808_v59, %v792_v50  ;;  %v842_v30 = vmul.f32 %v1824_v60, %v2368_v19  ;;  %v3128_v60 = vld [vmem:[%s2344_s30 + $0x91] sm:$0xff] }
  0xdd   : > { %v807_v61 = vadd.f32 %v805_v33, %v789_v4  ;;  %v742_v36 = vadd.f32 %v2994_v42, %v728_v8  ;;  %v3111_v40 = vmul.f32 %v1826_v28, %v3615_v23  ;;  %v856_v51 = vmul.f32 %v1826_v28, %v2370_v20  ;;  %v3119_v42 = vld [vmem:[%s2344_s30 + $0x90] sm:$0xff] }
  0xde   : > { %v848_v39 = vadd.f32 %v846_v41, %v834_v6  ;;  %v860_v38 = vmul.f32 %v1826_v28, %v2362_v16  ;;  %v825_v0 = vadd.f32 %v823_v47, %v810_v49  ;;  %v874_v33 = vmul.f32 %v1828_v45, %v2364_v17  ;;  %v1830_v6 = vld [vmem:[%s2344_s30 + $0x98] sm:$0x1f] }
  0xdf   : > { %1846 = vst [vmem:[%s2552_s26 + $0x48] sm:$0x1f] %v807_v61  ;;  %v757_v27 = vadd.f32 %v755_v31, %v742_v36  ;;  %v829_v59 = vadd.f32 %v827_v62, %v2965_v29  ;;  %v3122_v44 = vmul.f32 %v1828_v45, %v2387_v32  ;;  %v870_v58 = vmul.f32 %v1828_v45, %v2372_v21  ;;  %v3133_v62 = vld [vmem:[%s2344_s30 + $0x92] sm:$0xff] }
  0xe0   : > { %v862_v53 = vadd.f32 %v860_v38, %v848_v39  ;;  %v884_v1 = vmul.f32 %v3119_v42, %v2366_v18  ;;  %v839_v47 = vadd.f32 %v837_v22, %v825_v0  ;;  %v894_v29 = vmul.f32 %v3128_v60, %v2368_v19  ;;  %v3145_v45 = vld [vmem:[%s2344_s30 + $0x93] sm:$0xff] }
  0xe1   : > { %v775_v31 = vadd.f32 %v773_v7, %v757_v27  ;;  %v843_v26 = vadd.f32 %v841_v35, %v829_v59  ;;  %v880_v4 = vmul.f32 %v3119_v42, %v2376_v24  ;;  %v890_v8 = vmul.f32 %v3128_v60, %v2378_v25  ;;  %v1832_v61 = vld [vmem:[%s2344_s30 + $0x99] sm:$0x1f] }
  0xe2   : > { %v886_v50 = vadd.f32 %v884_v1, %v875_v43  ;;  %v904_v28 = vmul.f32 %v3133_v62, %v2370_v20  ;;  %v853_v22 = vadd.f32 %v3068_v57, %v839_v47  ;;  %v876_v7 = vadd.f32 %v874_v33, %v862_v53  ;;  %v1836_v1 = vld [vmem:[%s2344_s30 + $0x9b] sm:$0x1f] }
  0xe3   : > { %v793_v35 = vadd.f32 %v791_v63, %v775_v31  ;;  %v857_v41 = vadd.f32 %v3074_v54, %v843_v26  ;;  %v900_v49 = vmul.f32 %v3133_v62, %v3615_v23  ;;  %v914_v36 = vmul.f32 %v3145_v45, %v2372_v21  ;;  %v1834_v54 = vld [vmem:[%s2344_s30 + $0x9a] sm:$0x1f] }
  0xe4   : > { %v896_v43 = vadd.f32 %v894_v29, %v886_v50  ;;  %v830_v39 = vadd.f32 %v828_v56, %v3070_v11  ;;  %v867_v38 = vadd.f32 %v865_v52, %v853_v22  ;;  %v885_v0 = vmul.f32 %v1830_v6, %v2366_v18  ;;  %v3165_v22 = vld [vmem:[%s2344_s30 + $0xa0] sm:$0xff] }
  0xe5   : > { %v811_v57 = vadd.f32 %v809_v48, %v793_v35  ;;  %v871_v63 = vadd.f32 %v869_v3, %v857_v41  ;;  %v910_v33 = vmul.f32 %v3145_v45, %v2387_v32  ;;  %v895_v53 = vmul.f32 %v1832_v61, %v2368_v19 }
  0xe6   : > { %v906_v27 = vadd.f32 %v904_v28, %v896_v43  ;;  %v844_v59 = vadd.f32 %v842_v30, %v830_v39  ;;  %1847 = vst [vmem:[%s2552_s26 + $0x50] sm:$0xff] %v867_v38  ;;  %v881_v52 = vmul.f32 %v1830_v6, %v2376_v24  ;;  %v887_v3 = vadd.f32 %v885_v0, %v876_v7 }
  0xe7   : > { %v826_v47 = vadd.f32 %v824_v2, %v811_v57  ;;  %v882_v11 = vadd.f32 %v880_v4, %v871_v63  ;;  %v891_v31 = vmul.f32 %v1832_v61, %v2378_v25  ;;  %v905_v26 = vmul.f32 %v1834_v54, %v2370_v20  ;;  %v3168_v2 = vld [vmem:[%s2344_s30 + $0xa1] sm:$0xff]  ;;  %v1842_v63 = vld [vmem:[%s2344_s30 + $0xaa] sm:$0x1f] }
  0xe8   : > { %v916_v48 = vadd.f32 %v914_v36, %v906_v27  ;;  %v858_v56 = vadd.f32 %v856_v51, %v844_v59  ;;  %v897_v50 = vadd.f32 %v895_v53, %v887_v3  ;;  %v915_v28 = vmul.f32 %v1836_v1, %v2372_v21  ;;  %v1838_v4 = vld [vmem:[%s2344_s30 + $0xa8] sm:$0x1f] }
  0xe9   : > { %v840_v30 = vadd.f32 %v838_v5, %v826_v47  ;;  %v892_v29 = vadd.f32 %v890_v8, %v882_v11  ;;  %v901_v35 = vmul.f32 %v1834_v54, %v3615_v23  ;;  %v921_v51 = vmul.f32 %v3165_v22, %v2376_v24  ;;  %v1840_v8 = vld [vmem:[%s2344_s30 + $0xa9] sm:$0x1f] }
  0xea   : > { %v872_v6 = vadd.f32 %v870_v58, %v858_v56  ;;  %v927_v5 = vmul.f32 %v3168_v2, %v2378_v25  ;;  %v907_v61 = vadd.f32 %v905_v26, %v897_v50  ;;  %v911_v43 = vmul.f32 %v1836_v1, %v2387_v32  ;;  %v3180_v36 = vld [vmem:[%s2344_s30 + $0xa2] sm:$0xff]  ;;  %v1844_v47 = vld [vmem:[%s2344_s30 + $0xab] sm:$0x1f]  ;;  %v1863_v56 = vld [vmem:[%s2344_s30 + $0x91] sm:$0xff] }
  0xeb   : > { %v854_v7 = vadd.f32 %v3111_v40, %v840_v30  ;;  %v902_v41 = vadd.f32 %v900_v49, %v892_v29  ;;  %v923_v39 = vadd.f32 %v921_v51, %v916_v48  ;;  %v933_v38 = vmul.f32 %v3180_v36, %v3615_v23  ;;  %v3188_v54 = vld [vmem:[%s2344_s30 + $0xa3] sm:$0xff]  ;;  %v1861_v48 = vld [vmem:[%s2344_s30 + $0x90] sm:$0xff] }
  0xec   : > { %v883_v58 = vadd.f32 %v881_v52, %v872_v6  ;;  %v922_v57 = vmul.f32 %v1838_v4, %v2376_v24  ;;  %v917_v49 = vadd.f32 %v915_v28, %v907_v61  ;;  %v928_v27 = vmul.f32 %v1840_v8, %v2378_v25  ;;  %v1865_v26 = vld [vmem:[%s2344_s30 + $0x92] sm:$0xff]  ;;  %v1869_v29 = vld [vmem:[%s2344_s30 + $0xa0] sm:$0xff] }
  0xed   : > { %v868_v0 = vadd.f32 %v3122_v44, %v854_v7  ;;  %v912_v40 = vadd.f32 %v910_v33, %v902_v41  ;;  %v929_v53 = vadd.f32 %v927_v5, %v923_v39  ;;  %v939_v1 = vmul.f32 %v3188_v54, %v2387_v32  ;;  %v1867_v30 = vld [vmem:[%s2344_s30 + $0x93] sm:$0xff]  ;;  %v1871_v4 = vld [vmem:[%s2344_s30 + $0xa1] sm:$0xff]  ;;  %v1856_v5 = vld [vmem:[%s2344_s30 + $0x89] sm:$0x1f] }
  0xee   : > { %v893_v59 = vadd.f32 %v891_v31, %v883_v58  ;;  %v957_v44 = vmul.f32 %v3039_v34, %v2350_v9  ;;  %v924_v33 = vadd.f32 %v922_v57, %v917_v49  ;;  %v934_v11 = vmul.f32 %v1842_v63, %v3615_v23  ;;  %v1873_v8 = vld [vmem:[%s2344_s30 + $0xa2] sm:$0xff]  ;;  %v1858_v39 = vld [vmem:[%s2344_s30 + $0x8a] sm:$0x1f]  ;;  %v1881_v49 = vld [vmem:[%s2344_s30 + $0xb2] sm:$0xff] }
  0xef   : > { %1848 = vst [vmem:[%s2552_s26 + $0x58] sm:$0x1f] %v868_v0  ;;  %1849 = vst [vmem:[%s2552_s26 + $0x60] sm:$0xff] %v912_v40  ;;  %v963_v52 = vmul.f32 %v3051_v46, %v2352_v10  ;;  %v969_v3 = vmul.f32 %v3061_v37, %v2354_v12  ;;  %v935_v34 = vadd.f32 %v933_v38, %v929_v53  ;;  %v1875_v7 = vld [vmem:[%s2344_s30 + $0xa3] sm:$0xff]  ;;  %v1877_v38 = vld [vmem:[%s2344_s30 + $0xb0] sm:$0xff] }
  0xf0   : > { %v903_v31 = vadd.f32 %v901_v35, %v893_v59  ;;  %v930_v50 = vadd.f32 %v928_v27, %v924_v33  ;;  %v940_v46 = vmul.f32 %v1844_v47, %v2387_v32  ;;  %v975_v37 = vmul.f32 %v3079_v55, %v2356_v13  ;;  %v1854_v35 = vld [vmem:[%s2344_s30 + $0x88] sm:$0x1f]  ;;  %v1879_v40 = vld [vmem:[%s2344_s30 + $0xb1] sm:$0xff] }
  0xf1   : > { %v965_v28 = vadd.f32 %v963_v52, %v957_v44  ;;  %v941_v51 = vadd.f32 %v939_v1, %v935_v34  ;;  %v981_v58 = vmul.f32 %v1861_v48, %v2358_v14  ;;  %v991_v55 = vmul.f32 %v1863_v56, %v2360_v15  ;;  %v1860_v0 = vld [vmem:[%s2344_s30 + $0x8b] sm:$0x1f]  ;;  %v1883_v27 = vld [vmem:[%s2344_s30 + $0xb3] sm:$0xff] }
  0xf2   : > { %v913_v6 = vadd.f32 %v911_v43, %v903_v31  ;;  %v936_v41 = vadd.f32 %v934_v11, %v930_v50  ;;  %v1001_v43 = vmul.f32 %v1865_v26, %v2362_v16  ;;  %v1011_v57 = vmul.f32 %v1867_v30, %v2364_v17 }
  0xf3   : > { %v971_v61 = vadd.f32 %v969_v3, %v965_v28  ;;  %1851 = vst [vmem:[%s2552_s26 + $0x70] sm:$0xff] %v941_v51  ;;  %v1021_v63 = vmul.f32 %v1869_v29, %v2366_v18  ;;  %v958_v1 = vmul.f32 %v1854_v35, %v2350_v9  ;;  %v964_v47 = vmul.f32 %v1856_v5, %v2352_v10  ;;  %v2050_v29 = vld [vmem:[%s2344_s30 + $0x98] sm:$0x1f] }
  0xf4   : > { %1850 = vst [vmem:[%s2552_s26 + $0x68] sm:$0x1f] %v913_v6  ;;  %v942_v59 = vadd.f32 %v940_v46, %v936_v41  ;;  %v1035_v44 = vmul.f32 %v1871_v4, %v2368_v19  ;;  %v3233_v33 = vmul.f32 %v1873_v8, %v2370_v20  ;;  %v3236_v11 = vmul.f32 %v1875_v7, %v2372_v21  ;;  %v2052_v6 = vld [vmem:[%s2344_s30 + $0x9a] sm:$0x1f]  ;;  %v2054_v8 = vld [vmem:[%s2344_s30 + $0xa8] sm:$0x1f] }
  0xf5   : > { %v977_v53 = vadd.f32 %v975_v37, %v971_v61  ;;  %v970_v52 = vmul.f32 %v1858_v39, %v2354_v12  ;;  %v3241_v48 = vmul.f32 %v1877_v38, %v2376_v24  ;;  %v966_v56 = vadd.f32 %v964_v47, %v958_v1  ;;  %v2051_v37 = vld [vmem:[%s2344_s30 + $0x99] sm:$0x1f]  ;;  %v2055_v38 = vld [vmem:[%s2344_s30 + $0xa9] sm:$0x1f]  ;;  %v1933_v47 = vld [vmem:[%s2344_s30 + $0xb0] sm:$0xff] }
  0xf6   : > { %1852 = vst [vmem:[%s2552_s26 + $0x78] sm:$0x1f] %v942_v59  ;;  %v976_v31 = vmul.f32 %v1860_v0, %v2356_v13  ;;  %v3245_v34 = vmul.f32 %v1879_v40, %v2378_v25  ;;  %v3248_v26 = vmul.f32 %v1881_v49, %v3615_v23  ;;  %v3251_v30 = vmul.f32 %v1883_v27, %v2387_v32  ;;  %v2053_v35 = vld [vmem:[%s2344_s30 + $0x9b] sm:$0x1f]  ;;  %v2056_v40 = vld [vmem:[%s2344_s30 + $0xaa] sm:$0x1f] }
  0xf7   : > { %v983_v3 = vadd.f32 %v981_v58, %v977_v53  ;;  %v982_v50 = vmul.f32 %v2050_v29, %v2358_v14  ;;  %v972_v28 = vadd.f32 %v970_v52, %v966_v56  ;;  %v992_v4 = vmul.f32 %v2051_v37, %v2360_v15  ;;  %v2057_v27 = vld [vmem:[%s2344_s30 + $0xab] sm:$0x1f]  ;;  %v2058_v52 = vld [vmem:[%s2344_s30 + $0xb8] sm:$0x1f] }
  0xf8   : > { %v1002_v51 = vmul.f32 %v2052_v6, %v2362_v16  ;;  %v1012_v5 = vmul.f32 %v2053_v35, %v2364_v17  ;;  %v1022_v7 = vmul.f32 %v2054_v8, %v2366_v18  ;;  %v1285_v41 = vmul.f32 %v3119_v42, %v2350_v9  ;;  %v2059_v56 = vld [vmem:[%s2344_s30 + $0xb9] sm:$0x1f]  ;;  %v1935_v35 = vld [vmem:[%s2344_s30 + $0xb1] sm:$0xff] }
  0xf9   : > { %v993_v46 = vadd.f32 %v991_v55, %v983_v3  ;;  %v1291_v61 = vmul.f32 %v3128_v60, %v2352_v10  ;;  %v978_v39 = vadd.f32 %v976_v31, %v972_v28  ;;  %v1036_v55 = vmul.f32 %v2055_v38, %v2368_v19  ;;  %v2061_v37 = vld [vmem:[%s2344_s30 + $0xbb] sm:$0x1f] }
  0xfa   : > { %v1297_v0 = vmul.f32 %v3133_v62, %v2354_v12  ;;  %v3273_v49 = vmul.f32 %v2056_v40, %v2370_v20  ;;  %v3277_v42 = vmul.f32 %v2057_v27, %v2372_v21  ;;  %v1313_v62 = vmul.f32 %v3165_v22, %v2350_v9 }
  0xfb   : > { %v1003_v58 = vadd.f32 %v1001_v43, %v993_v46  ;;  %v1293_v60 = vadd.f32 %v1291_v61, %v1285_v41  ;;  %v1303_v43 = vmul.f32 %v3145_v45, %v2356_v13  ;;  %v984_v53 = vadd.f32 %v982_v50, %v978_v39  ;;  %v2060_v46 = vld [vmem:[%s2344_s30 + $0xba] sm:$0x1f] }
  0xfc   : > { %v1323_v1 = vmul.f32 %v3168_v2, %v2352_v10  ;;  %v3288_v3 = vmul.f32 %v2058_v52, %v2376_v24  ;;  %v3292_v31 = vmul.f32 %v2059_v56, %v2378_v25  ;;  %v3298_v28 = vmul.f32 %v2060_v46, %v3615_v23 }
  0xfd   : > { %v1013_v59 = vadd.f32 %v1011_v57, %v1003_v58  ;;  %v1299_v45 = vadd.f32 %v1297_v0, %v1293_v60  ;;  %v1309_v57 = vmul.f32 %v3165_v22, %v2358_v14  ;;  %v994_v50 = vadd.f32 %v992_v4, %v984_v53  ;;  %v3319_v60 = vld [vmem:[%s2344_s30 + $0xb3] sm:$0xff] }
  0xfe   : > { %v3302_v6 = vmul.f32 %v2061_v37, %v2387_v32  ;;  %v1319_v41 = vmul.f32 %v3168_v2, %v2360_v15  ;;  %v1329_v61 = vmul.f32 %v3180_v36, %v2362_v16  ;;  %v1357_v22 = vmul.f32 %v1933_v47, %v2350_v9 }
  0xff   : > { %v1023_v29 = vadd.f32 %v1021_v63, %v1013_v59  ;;  %v1305_v8 = vadd.f32 %v1303_v43, %v1299_v45  ;;  %v1937_v63 = vld [vmem:[%s2344_s30 + $0xb2] sm:$0xff]  ;;  %v1004_v58 = vadd.f32 %v1002_v51, %v994_v50  ;;  %v1325_v39 = vadd.f32 %v1323_v1, %v1313_v62 }
 0x100   : > { %v1333_v38 = vmul.f32 %v3180_v36, %v2354_v12  ;;  %v1339_v40 = vmul.f32 %v3188_v54, %v2364_v17  ;;  %v1343_v2 = vmul.f32 %v3188_v54, %v2356_v13  ;;  %v1371_v27 = vmul.f32 %v1935_v35, %v2352_v10  ;;  %v3329_v54 = vld [vmem:[%s2344_s30 + $0xc0] sm:$0xff] }
 0x101   : > { %v1037_v4 = vadd.f32 %v1035_v44, %v1023_v29  ;;  %v1311_v0 = vadd.f32 %v1309_v57, %v1305_v8  ;;  %v1014_v51 = vadd.f32 %v1012_v5, %v1004_v58  ;;  %v1349_v43 = vmul.f32 %v1933_v47, %v2366_v18  ;;  %v3335_v5 = vld [vmem:[%s2344_s30 + $0xc1] sm:$0xff] }
 0x102   : > { %v1385_v59 = vmul.f32 %v1937_v63, %v2354_v12  ;;  %v3325_v53 = vmul.f32 %v1933_v47, %v2358_v14  ;;  %v1363_v62 = vmul.f32 %v1935_v35, %v2368_v19  ;;  %v1373_v1 = vadd.f32 %v1371_v27, %v1357_v22  ;;  %v3351_v22 = vld [vmem:[%s2344_s30 + $0xc2] sm:$0xff] }
 0x103   : > { %v1051_v44 = vadd.f32 %v3233_v33, %v1037_v4  ;;  %v1321_v36 = vadd.f32 %v1319_v41, %v1311_v0  ;;  %v1024_v56 = vadd.f32 %v1022_v7, %v1014_v51  ;;  %v1335_v45 = vadd.f32 %v1333_v38, %v1325_v39  ;;  %v1918_v39 = vld [vmem:[%s2344_s30 + $0x98] sm:$0x1f] }
 0x104   : > { %v1399_v33 = vmul.f32 %v3319_v60, %v2356_v13  ;;  %v3338_v29 = vmul.f32 %v1935_v35, %v2360_v15  ;;  %v1387_v47 = vadd.f32 %v1385_v59, %v1373_v1  ;;  %v1413_v50 = vmul.f32 %v3329_v54, %v2358_v14 }
 0x105   : > { %v1065_v52 = vadd.f32 %v3236_v11, %v1051_v44  ;;  %v1331_v57 = vadd.f32 %v1329_v61, %v1321_v36  ;;  %v1038_v11 = vadd.f32 %v1036_v55, %v1024_v56  ;;  %v1377_v7 = vmul.f32 %v1937_v63, %v2370_v20  ;;  %v1920_v44 = vld [vmem:[%s2344_s30 + $0x99] sm:$0x1f] }
 0x106   : > { %v1417_v37 = vmul.f32 %v3329_v54, %v2350_v9  ;;  %v1401_v41 = vadd.f32 %v1399_v33, %v1387_v47  ;;  %v1431_v35 = vmul.f32 %v3335_v5, %v2360_v15  ;;  %v1435_v61 = vmul.f32 %v3335_v5, %v2352_v10  ;;  %v1924_v56 = vld [vmem:[%s2344_s30 + $0x9b] sm:$0x1f]  ;;  %v1928_v47 = vld [vmem:[%s2344_s30 + $0xa9] sm:$0x1f] }
 0x107   : > { %v1080_v46 = vadd.f32 %v3241_v48, %v1065_v52  ;;  %v1341_v8 = vadd.f32 %v1339_v40, %v1331_v57  ;;  %v1052_v55 = vadd.f32 %v3273_v49, %v1038_v11  ;;  %v3355_v4 = vadd.f32 %v1343_v2, %v1335_v45  ;;  %v1926_v45 = vld [vmem:[%s2344_s30 + $0xa8] sm:$0x1f] }
 0x108   : > { %v3358_v58 = vmul.f32 %v1937_v63, %v2362_v16  ;;  %v1391_v0 = vmul.f32 %v3319_v60, %v2372_v21  ;;  %v1405_v40 = vmul.f32 %v3329_v54, %v2376_v24  ;;  %v1415_v27 = vadd.f32 %v1413_v50, %v1401_v41 }
 0x109   : > { %v1098_v48 = vadd.f32 %v3245_v34, %v1080_v46  ;;  %v1351_v38 = vadd.f32 %v1349_v43, %v1341_v8  ;;  %v1922_v34 = vld [vmem:[%s2344_s30 + $0x9a] sm:$0x1f]  ;;  %v1066_v2 = vadd.f32 %v3277_v42, %v1052_v55  ;;  %v1449_v63 = vmul.f32 %v3351_v22, %v2362_v16  ;;  %v3374_v43 = vld [vmem:[%s2344_s30 + $0xc3] sm:$0xff] }
 0x10a   : > { %v1453_v51 = vmul.f32 %v3351_v22, %v2354_v12  ;;  %v1433_v36 = vadd.f32 %v1431_v35, %v1415_v27  ;;  %v1437_v1 = vadd.f32 %v1435_v61, %v1417_v37  ;;  %v1286_v52 = vmul.f32 %v1918_v39, %v2350_v9  ;;  %v1934_v27 = vld [vmem:[%s2344_s30 + $0xb8] sm:$0x1f] }
 0x10b   : > { %v1116_v49 = vadd.f32 %v3248_v26, %v1098_v48  ;;  %v1365_v59 = vadd.f32 %v1363_v62, %v1351_v38  ;;  %v1081_v42 = vadd.f32 %v3288_v3, %v1066_v2  ;;  %v1292_v33 = vmul.f32 %v1920_v44, %v2352_v10  ;;  %v1936_v2 = vld [vmem:[%s2344_s30 + $0xb9] sm:$0x1f] }
 0x10c   : > { %v1298_v57 = vmul.f32 %v1922_v34, %v2354_v12  ;;  %v1423_v62 = vmul.f32 %v3335_v5, %v2378_v25  ;;  %v1467_v46 = vmul.f32 %v3374_v43, %v2364_v17  ;;  %v1471_v11 = vmul.f32 %v3374_v43, %v2356_v13 }
 0x10d   : > { %v1134_v26 = vadd.f32 %v3251_v30, %v1116_v49  ;;  %v1379_v50 = vadd.f32 %v1377_v7, %v1365_v59  ;;  %v1099_v30 = vadd.f32 %v3292_v31, %v1081_v42  ;;  %v1294_v3 = vadd.f32 %v1292_v33, %v1286_v52  ;;  %v1930_v7 = vld [vmem:[%s2344_s30 + $0xaa] sm:$0x1f]  ;;  %v1940_v33 = vld [vmem:[%s2344_s30 + $0xbb] sm:$0x1f] }
 0x10e   : > { %v1304_v37 = vmul.f32 %v1924_v56, %v2356_v13  ;;  %v1314_v8 = vmul.f32 %v1926_v45, %v2350_v9  ;;  %v1451_v35 = vadd.f32 %v1449_v63, %v1433_v36  ;;  %v1455_v61 = vadd.f32 %v1453_v51, %v1437_v1  ;;  %v1932_v59 = vld [vmem:[%s2344_s30 + $0xab] sm:$0x1f]  ;;  %v1938_v36 = vld [vmem:[%s2344_s30 + $0xba] sm:$0x1f] }
 0x10f   : > { %1909 = vst [vmem:[%s2552_s26 + $0x80] sm:$0xff] %v1134_v26  ;;  %v1393_v41 = vadd.f32 %v1391_v0, %v1379_v50  ;;  %v1324_v48 = vmul.f32 %v1928_v47, %v2352_v10  ;;  %v1117_v55 = vadd.f32 %v3298_v28, %v1099_v30  ;;  %v3399_v39 = vmul.f32 %v3319_v60, %v2364_v17 }
 0x110   : > { %v1300_v31 = vadd.f32 %v1298_v57, %v1294_v3  ;;  %v1310_v38 = vmul.f32 %v1926_v45, %v2358_v14  ;;  %v1441_v0 = vmul.f32 %v3351_v22, %v3615_v23  ;;  %v1334_v49 = vmul.f32 %v1930_v7, %v2354_v12 }
 0x111   : > { %v1407_v44 = vadd.f32 %v1405_v40, %v1393_v41  ;;  %v1326_v34 = vadd.f32 %v1324_v48, %v1314_v8  ;;  %v1135_v28 = vadd.f32 %v3302_v6, %v1117_v55  ;;  %v1459_v60 = vmul.f32 %v3374_v43, %v2387_v32  ;;  %v3433_v8 = vld [vmem:[%s2344_s30 + $0xc9] sm:$0x1f] }
 0x112   : > { %v1306_v63 = vadd.f32 %v1304_v37, %v1300_v31  ;;  %v1320_v51 = vmul.f32 %v1928_v47, %v2360_v15  ;;  %v3413_v1 = vadd.f32 %v1467_v46, %v1451_v35  ;;  %v3415_v52 = vadd.f32 %v1471_v11, %v1455_v61  ;;  %v3426_v46 = vld [vmem:[%s2344_s30 + $0xc8] sm:$0x1f] }
 0x113   : > { %v1425_v40 = vadd.f32 %v1423_v62, %v1407_v44  ;;  %v1358_v56 = vmul.f32 %v1934_v27, %v2350_v9  ;;  %1910 = vst [vmem:[%s2552_s26 + $0x88] sm:$0x1f] %v1135_v28  ;;  %v1330_v6 = vmul.f32 %v1930_v7, %v2362_v16  ;;  %v1340_v26 = vmul.f32 %v1932_v59, %v2364_v17  ;;  %v3441_v48 = vld [vmem:[%s2344_s30 + $0xca] sm:$0x1f] }
 0x114   : > { %v1312_v45 = vadd.f32 %v1310_v38, %v1306_v63  ;;  %v1372_v42 = vmul.f32 %v1936_v2, %v2352_v10  ;;  %v1336_v47 = vadd.f32 %v1334_v49, %v1326_v34  ;;  %v1344_v50 = vmul.f32 %v1932_v59, %v2356_v13 }
 0x115   : > { %v1443_v57 = vadd.f32 %v1441_v0, %v1425_v40  ;;  %v1386_v62 = vmul.f32 %v1938_v36, %v2354_v12  ;;  %v1350_v30 = vmul.f32 %v1934_v27, %v2366_v18  ;;  %v3430_v3 = vmul.f32 %v1934_v27, %v2358_v14 }
 0x116   : > { %v1322_v11 = vadd.f32 %v1320_v51, %v1312_v45  ;;  %v1374_v37 = vadd.f32 %v1372_v42, %v1358_v56  ;;  %v1364_v41 = vmul.f32 %v1936_v2, %v2368_v19  ;;  %v3437_v35 = vmul.f32 %v1936_v2, %v2360_v15 }
 0x117   : > { %v1461_v7 = vadd.f32 %v1459_v60, %v1443_v57  ;;  %v1400_v61 = vmul.f32 %v1940_v33, %v2356_v13  ;;  %v1414_v38 = vmul.f32 %v3426_v46, %v2358_v14  ;;  %v1418_v27 = vmul.f32 %v3426_v46, %v2350_v9 }
 0x118   : > { %v1332_v55 = vadd.f32 %v1330_v6, %v1322_v11  ;;  %v1388_v31 = vadd.f32 %v1386_v62, %v1374_v37  ;;  %v1346_v44 = vadd.f32 %v1344_v50, %v1336_v47  ;;  %v1378_v0 = vmul.f32 %v1938_v36, %v2370_v20 }
 0x119   : > { %1973 = vst [vmem:[%s2552_s26 + $0x90] sm:$0xff] %v1461_v7  ;;  %v3450_v34 = vmul.f32 %v1938_v36, %v2362_v16  ;;  %v1436_v49 = vmul.f32 %v3433_v8, %v2352_v10  ;;  %v1432_v60 = vmul.f32 %v3433_v8, %v2360_v15  ;;  %v1454_v9 = vmul.f32 %v3441_v48, %v2354_v12  ;;  %v3463_v36 = vld [vmem:[%s2344_s30 + $0xcb] sm:$0x1f]  ;;  %v1949_v12 = vld [vmem:[%s2344_s30 + $0xd0] sm:$0xff] }
 0x11a   : > { %v1342_v2 = vadd.f32 %v1340_v26, %v1332_v55  ;;  %v1402_v28 = vadd.f32 %v1400_v61, %v1388_v31  ;;  %v1392_v63 = vmul.f32 %v1940_v33, %v2372_v21  ;;  %v3460_v51 = vmul.f32 %v1940_v33, %v2364_v17  ;;  %v1953_v55 = vld [vmem:[%s2344_s30 + $0xd2] sm:$0xff] }
 0x11b   : > { %v1438_v59 = vadd.f32 %v1436_v49, %v1418_v27  ;;  %v1355_v10 = vadd.f32 %v3325_v53, %v3355_v4  ;;  %v1406_v56 = vmul.f32 %v3426_v46, %v2376_v24  ;;  %v1424_v6 = vmul.f32 %v3433_v8, %v2378_v25  ;;  %v1951_v4 = vld [vmem:[%s2344_s30 + $0xd1] sm:$0xff] }
 0x11c   : > { %v1352_v40 = vadd.f32 %v1350_v30, %v1342_v2  ;;  %v1416_v45 = vadd.f32 %v1414_v38, %v1402_v28  ;;  %v1442_v26 = vmul.f32 %v3441_v48, %v3615_v23  ;;  %v1450_v42 = vmul.f32 %v3441_v48, %v2362_v16 }
 0x11d   : > { %v1460_v33 = vmul.f32 %v3463_v36, %v2387_v32  ;;  %v1369_v53 = vadd.f32 %v3338_v29, %v1355_v10  ;;  %v1456_v50 = vadd.f32 %v1454_v9, %v1438_v59  ;;  %v1472_v62 = vmul.f32 %v3463_v36, %v2356_v13 }
 0x11e   : > { %v1366_v57 = vadd.f32 %v1364_v41, %v1352_v40  ;;  %v1434_v47 = vadd.f32 %v1432_v60, %v1416_v45  ;;  %v1468_v11 = vmul.f32 %v3463_v36, %v2364_v17  ;;  %v1409_v37 = vmul.f32 %v3329_v54, %v2366_v18 }
 0x11f   : > { %v1383_v30 = vadd.f32 %v3358_v58, %v1369_v53  ;;  %v1485_v7 = vmul.f32 %v1949_v12, %v2358_v14  ;;  %v1427_v29 = vmul.f32 %v3335_v5, %v2368_v19  ;;  %v1445_v41 = vmul.f32 %v3351_v22, %v2370_v20 }
 0x120   : > { %v1380_v61 = vadd.f32 %v1378_v0, %v1366_v57  ;;  %v1499_v13 = vmul.f32 %v1951_v4, %v2360_v15  ;;  %v1452_v31 = vadd.f32 %v1450_v42, %v1434_v47  ;;  %v1463_v54 = vmul.f32 %v3374_v43, %v2372_v21  ;;  %v1952_v42 = vld [vmem:[%s2344_s30 + $0xd9] sm:$0x1f] }
 0x121   : > { %v1397_v38 = vadd.f32 %v3399_v39, %v1383_v30  ;;  %v1487_v58 = vadd.f32 %v1485_v7, %v3415_v52  ;;  %v1474_v0 = vadd.f32 %v1472_v62, %v1456_v50  ;;  %v1477_v5 = vmul.f32 %v1949_v12, %v2376_v24  ;;  %v1955_v39 = vld [vmem:[%s2344_s30 + $0xd3] sm:$0xff] }
 0x122   : > { %v1394_v27 = vadd.f32 %v1392_v63, %v1380_v61  ;;  %v1481_v49 = vmul.f32 %v1949_v12, %v2366_v18  ;;  %v1491_v2 = vmul.f32 %v1951_v4, %v2378_v25  ;;  %v1513_v60 = vmul.f32 %v1953_v55, %v2362_v16  ;;  %v1950_v63 = vld [vmem:[%s2344_s30 + $0xd8] sm:$0x1f] }
 0x123   : > { %v1411_v22 = vadd.f32 %v1409_v37, %v1397_v38  ;;  %v1501_v28 = vadd.f32 %v1499_v13, %v1487_v58  ;;  %v1495_v59 = vmul.f32 %v1951_v4, %v2368_v19  ;;  %v1505_v43 = vmul.f32 %v1953_v55, %v3615_v23  ;;  %v1954_v62 = vld [vmem:[%s2344_s30 + $0xda] sm:$0x1f] }
 0x124   : > { %v1408_v9 = vadd.f32 %v1406_v56, %v1394_v27  ;;  %v1356_v52 = vadd.f32 %v3430_v3, %v1346_v44  ;;  %v1470_v10 = vadd.f32 %v1468_v11, %v1452_v31  ;;  %v1509_v45 = vmul.f32 %v1953_v55, %v2370_v20 }
 0x125   : > { %v1429_v40 = vadd.f32 %v1427_v29, %v1411_v22  ;;  %v1519_v12 = vmul.f32 %v1955_v39, %v2387_v32  ;;  %v1523_v57 = vmul.f32 %v1955_v39, %v2372_v21  ;;  %v1527_v56 = vmul.f32 %v1955_v39, %v2364_v17 }
 0x126   : > { %v1426_v53 = vadd.f32 %v1424_v6, %v1408_v9  ;;  %v1370_v4 = vadd.f32 %v3437_v35, %v1356_v52  ;;  %v1515_v50 = vadd.f32 %v1513_v60, %v1501_v28  ;;  %v1410_v3 = vmul.f32 %v3426_v46, %v2366_v18  ;;  %v1959_v28 = vld [vmem:[%s2344_s30 + $0xe1] sm:$0xff] }
 0x127   : > { %v1447_v47 = vadd.f32 %v1445_v41, %v1429_v40  ;;  %v1486_v44 = vmul.f32 %v1950_v63, %v2358_v14  ;;  %v1428_v6 = vmul.f32 %v3433_v8, %v2368_v19  ;;  %v1500_v37 = vmul.f32 %v1952_v42, %v2360_v15  ;;  %v1956_v41 = vld [vmem:[%s2344_s30 + $0xdb] sm:$0x1f] }
 0x128   : > { %v1444_v11 = vadd.f32 %v1442_v26, %v1426_v53  ;;  %v1384_v30 = vadd.f32 %v3450_v34, %v1370_v4  ;;  %v1446_v35 = vmul.f32 %v3441_v48, %v2370_v20  ;;  %v1464_v61 = vmul.f32 %v3463_v36, %v2372_v21 }
 0x129   : > { %v1465_v7 = vadd.f32 %v1463_v54, %v1447_v47  ;;  %v1488_v46 = vadd.f32 %v1486_v44, %v1474_v0  ;;  %v1478_v34 = vmul.f32 %v1950_v63, %v2376_v24  ;;  %v1514_v29 = vmul.f32 %v1954_v62, %v2362_v16 }
 0x12a   : > { %v1462_v14 = vadd.f32 %v1460_v33, %v1444_v11  ;;  %v1398_v26 = vadd.f32 %v3460_v51, %v1384_v30  ;;  %v1529_v13 = vadd.f32 %v1527_v56, %v1515_v50  ;;  %v1482_v15 = vmul.f32 %v1950_v63, %v2366_v18  ;;  %v1957_v33 = vld [vmem:[%s2344_s30 + $0xe0] sm:$0xff]  ;;  %v1960_v56 = vld [vmem:[%s2344_s30 + $0xe9] sm:$0x1f] }
 0x12b   : > { %v1479_v8 = vadd.f32 %v1477_v5, %v1465_v7  ;;  %v1502_v55 = vadd.f32 %v1500_v37, %v1488_v46  ;;  %v1492_v36 = vmul.f32 %v1952_v42, %v2378_v25  ;;  %v1496_v31 = vmul.f32 %v1952_v42, %v2368_v19  ;;  %v1961_v63 = vld [vmem:[%s2344_s30 + $0xe2] sm:$0xff]  ;;  %v1964_v7 = vld [vmem:[%s2344_s30 + $0xeb] sm:$0x1f] }
 0x12c   : > { %1974 = vst [vmem:[%s2552_s26 + $0x98] sm:$0x1f] %v1462_v14  ;;  %v1412_v48 = vadd.f32 %v1410_v3, %v1398_v26  ;;  %v1483_v51 = vadd.f32 %v1481_v49, %v3413_v1  ;;  %v1506_v16 = vmul.f32 %v1954_v62, %v3615_v23  ;;  %v1528_v58 = vmul.f32 %v1956_v41, %v2364_v17  ;;  %v1963_v50 = vld [vmem:[%s2344_s30 + $0xe3] sm:$0xff] }
 0x12d   : > { %v1493_v38 = vadd.f32 %v1491_v2, %v1479_v8  ;;  %v1516_v54 = vadd.f32 %v1514_v29, %v1502_v55  ;;  %v1510_v0 = vmul.f32 %v1954_v62, %v2370_v20  ;;  %v1520_v5 = vmul.f32 %v1956_v41, %v2387_v32  ;;  %v1958_v2 = vld [vmem:[%s2344_s30 + $0xe8] sm:$0x1f]  ;;  %v1967_v8 = vld [vmem:[%s2344_s30 + $0xf1] sm:$0xff] }
 0x12e   : > { %v1430_v27 = vadd.f32 %v1428_v6, %v1412_v48  ;;  %v1497_v22 = vadd.f32 %v1495_v59, %v1483_v51  ;;  %v1524_v39 = vmul.f32 %v1956_v41, %v2372_v21  ;;  %v1533_v1 = vmul.f32 %v1957_v33, %v2376_v24 }
 0x12f   : > { %v1507_v60 = vadd.f32 %v1505_v43, %v1493_v38  ;;  %v1537_v49 = vmul.f32 %v1957_v33, %v2366_v18  ;;  %v1543_v52 = vmul.f32 %v1959_v28, %v2378_v25  ;;  %v1484_v40 = vadd.f32 %v1482_v15, %v1470_v10 }
 0x130   : > { %v1448_v9 = vadd.f32 %v1446_v35, %v1430_v27  ;;  %v1511_v17 = vadd.f32 %v1509_v45, %v1497_v22  ;;  %v1530_v42 = vadd.f32 %v1528_v58, %v1516_v54  ;;  %v1547_v43 = vmul.f32 %v1959_v28, %v2368_v19  ;;  %v1962_v45 = vld [vmem:[%s2344_s30 + $0xea] sm:$0x1f]  ;;  %v1965_v35 = vld [vmem:[%s2344_s30 + $0xf0] sm:$0xff] }
 0x131   : > { %v1521_v59 = vadd.f32 %v1519_v12, %v1507_v60  ;;  %v1553_v53 = vmul.f32 %v1961_v63, %v3615_v23  ;;  %v1498_v3 = vadd.f32 %v1496_v31, %v1484_v40  ;;  %v1538_v44 = vmul.f32 %v1958_v2, %v2366_v18 }
 0x132   : > { %v1466_v4 = vadd.f32 %v1464_v61, %v1448_v9  ;;  %v1525_v47 = vadd.f32 %v1523_v57, %v1511_v17  ;;  %v1557_v62 = vmul.f32 %v1961_v63, %v2370_v20  ;;  %v1563_v10 = vmul.f32 %v1963_v50, %v2387_v32 }
 0x133   : > { %1975 = vst [vmem:[%s2552_s26 + $0xa0] sm:$0xff] %v1521_v59  ;;  %v1534_v12 = vmul.f32 %v1958_v2, %v2376_v24  ;;  %v1539_v11 = vadd.f32 %v1537_v49, %v1529_v13  ;;  %v1512_v37 = vadd.f32 %v1510_v0, %v1498_v3  ;;  %v1548_v57 = vmul.f32 %v1960_v56, %v2368_v19  ;;  %v1966_v13 = vld [vmem:[%s2344_s30 + $0xf8] sm:$0x1f] }
 0x134   : > { %v1480_v30 = vadd.f32 %v1478_v34, %v1466_v4  ;;  %v1535_v6 = vadd.f32 %v1533_v1, %v1525_v47  ;;  %v1567_v18 = vmul.f32 %v1963_v50, %v2372_v21  ;;  %v1544_v61 = vmul.f32 %v1960_v56, %v2378_v25  ;;  %v1970_v49 = vld [vmem:[%s2344_s30 + $0xfa] sm:$0x1f] }
 0x135   : > { %v1558_v46 = vmul.f32 %v1962_v45, %v2370_v20  ;;  %v1549_v14 = vadd.f32 %v1547_v43, %v1539_v11  ;;  %v1526_v41 = vadd.f32 %v1524_v39, %v1512_v37  ;;  %v1540_v34 = vadd.f32 %v1538_v44, %v1530_v42 }
 0x136   : > { %v1494_v26 = vadd.f32 %v1492_v36, %v1480_v30  ;;  %v1545_v29 = vadd.f32 %v1543_v52, %v1535_v6  ;;  %v1554_v15 = vmul.f32 %v1962_v45, %v3615_v23  ;;  %v1568_v19 = vmul.f32 %v1964_v7, %v2372_v21  ;;  %v1969_v36 = vld [vmem:[%s2344_s30 + $0xf2] sm:$0xff]  ;;  %v1972_v52 = vld [vmem:[%s2344_s30 + $0xfb] sm:$0x1f] }
 0x137   : > { %v1559_v55 = vadd.f32 %v1557_v62, %v1549_v14  ;;  %v1574_v48 = vmul.f32 %v1965_v35, %v2376_v24  ;;  %v1536_v20 = vadd.f32 %v1534_v12, %v1526_v41  ;;  %v1550_v33 = vadd.f32 %v1548_v57, %v1540_v34  ;;  %v1968_v21 = vld [vmem:[%s2344_s30 + $0xf9] sm:$0x1f] }
 0x138   : > { %v1508_v31 = vadd.f32 %v1506_v16, %v1494_v26  ;;  %v1555_v51 = vadd.f32 %v1553_v53, %v1545_v29  ;;  %v1564_v38 = vmul.f32 %v1964_v7, %v2387_v32  ;;  %v1580_v58 = vmul.f32 %v1967_v8, %v2378_v25  ;;  %v1971_v16 = vld [vmem:[%s2344_s30 + $0xf3] sm:$0xff] }
 0x139   : > { %v1569_v54 = vadd.f32 %v1567_v18, %v1559_v55  ;;  %v1575_v27 = vmul.f32 %v1966_v13, %v2376_v24  ;;  %v1546_v28 = vadd.f32 %v1544_v61, %v1536_v20  ;;  %v1560_v60 = vadd.f32 %v1558_v46, %v1550_v33 }
 0x13a   : > { %v1522_v0 = vadd.f32 %v1520_v5, %v1508_v31  ;;  %v1565_v22 = vadd.f32 %v1563_v10, %v1555_v51  ;;  %v1586_v1 = vmul.f32 %v1969_v36, %v3615_v23  ;;  %v1581_v24 = vmul.f32 %v1968_v21, %v2378_v25 }
 0x13b   : > { %v1576_v39 = vadd.f32 %v1574_v48, %v1569_v54  ;;  %v1556_v2 = vadd.f32 %v1554_v15, %v1546_v28  ;;  %v1570_v9 = vadd.f32 %v1568_v19, %v1560_v60  ;;  %v1592_v5 = vmul.f32 %v1971_v16, %v2387_v32 }
 0x13c   : > { %1976 = vst [vmem:[%s2552_s26 + $0xa8] sm:$0x1f] %v1522_v0  ;;  %1977 = vst [vmem:[%s2552_s26 + $0xb0] sm:$0xff] %v1565_v22  ;;  %v1587_v59 = vmul.f32 %v1970_v49, %v3615_v23  ;;  %v1593_v53 = vmul.f32 %v1972_v52, %v2387_v32 }
 0x13d   : > { %v1582_v17 = vadd.f32 %v1580_v58, %v1576_v39  ;;  %v1566_v63 = vadd.f32 %v1564_v38, %v1556_v2  ;;  %v1577_v40 = vadd.f32 %v1575_v27, %v1570_v9 }
 0x13f   : > { %v1588_v42 = vadd.f32 %v1586_v1, %v1582_v17  ;;  %1978 = vst [vmem:[%s2552_s26 + $0xb8] sm:$0x1f] %v1566_v63  ;;  %v1583_v43 = vadd.f32 %v1581_v24, %v1577_v40 }
 0x141   : > { %v1594_v56 = vadd.f32 %v1592_v5, %v1588_v42  ;;  %v1589_v4 = vadd.f32 %v1587_v59, %v1583_v43 }
 0x143   : > { %1979 = vst [vmem:[%s2552_s26 + $0xc0] sm:$0xff] %v1594_v56  ;;  %v1595_v47 = vadd.f32 %v1593_v53, %v1589_v4 }
 0x145   : > { %1980 = vst [vmem:[%s2552_s26 + $0xc8] sm:$0x1f] %v1595_v47 }
 0x146 PF: > { %s18_s14 = sadd.s32 1, %s2176_s14   ;;  %s3616_s9 = smov %s2160_s10 }
 0x147   : > { %p15_p11 = scmp.ge.s32.totalorder %s18_s14, 4   ;;  %s3617_s10 = smov %s2164_s11 }
 0x148   : > { %s3618_s11 = smov %s2248_s21  ;;  %s3619_s12 = smov %s2172_s13 }
 0x149   : > { %s3620_s13 = smov %s3622_s16  ;;  %17 = sbr.rel (!%p15_p11) target bundleno = 6 (0x6), region = 108 }
 0x150   :  { %1632 = vsyncpa [#allocation3], 1 }
 0x151   :  { %1634 = vsyncpa [#allocation3 + $0x1], 1 }
 0x152   :  { %1635 = vsyncpa [#allocation5], 1 }
 0x153   :  { %1637 = vsyncpa [#allocation5 + $0x1], 1 }

</bundles_post_ra>
